<compile_context>
chip_gen: v7x
topology: tpu7x:2x2x1
jax: 0.10.0
libtpu: 0.0.40
codegen_flags: <defaults>
</compile_context>

<pallas_src>
import jax
import jax.numpy as jnp
from jax import lax
from jax.experimental import pallas as pl
from jax.experimental.pallas import tpu as pltpu


def _round_up(x, m):
    return (x + m - 1) // m * m


def _zero_halo(ref):
    """Zero the 1-pixel spatial halo of a (nb, Hp, Wp, C) VMEM scratch.

    Done every grid step (not only at program_id==0) so the kernel stays correct
    when the 'parallel' grid axis is sharded across TensorCores (each core owns
    its own scratch).  Cost is ~2*(Hp+Wp)*C elements per image instead of
    re-zeroing the whole padded buffer.
    """
    nb, Hp, Wp, C = ref.shape
    z_row = jnp.zeros((nb, 1, Wp, C), ref.dtype)
    z_col = jnp.zeros((nb, Hp, 1, C), ref.dtype)
    ref[:, pl.ds(0, 1), :, :] = z_row
    ref[:, pl.ds(Hp - 1, 1), :, :] = z_row
    ref[:, :, pl.ds(0, 1), :] = z_col
    ref[:, :, pl.ds(Wp - 1, 1), :] = z_col


def _im2col(xpad_ref, Hout, Wout, stride):
    """Gather the 9 (optionally strided) 3x3 tap windows of a zero-padded scratch
    and concatenate them along lanes: one (nb*Hout*Wout, 9*C) bf16 matrix, so the
    whole conv is a single MXU matmul instead of 9 thin K=C matmuls."""
    nb = xpad_ref.shape[0]
    C = xpad_ref.shape[-1]
    taps = []
    for kh in range(3):
        for kw in range(3):
            if stride == 1:
                t = xpad_ref[:, pl.ds(kh, Hout), pl.ds(kw, Wout), :]
            else:  # strided window read realizes the stride-2 conv directly
                t = xpad_ref[:, pl.ds(kh, Hout, stride=stride),
                             pl.ds(kw, Wout, stride=stride), :]
            taps.append(t)
    xs = jnp.concatenate(taps, axis=-1)                  # (nb, Hout, Wout, 9*C)
    xs = xs.reshape(nb * Hout * Wout, 9 * C)
    return xs.astype(jnp.bfloat16)


def _mg_restriction_kernel(u_ref, f_ref,
                           wa1_ref, wpi_ref, wr_ref, wa2_ref, bnb_ref,
                           u1_ref, f1_ref,
                           u_pad, resid_pad, u1_pad):
    nb, H, W, Cin = u_ref.shape
    _, Ho, Wo, Cp = u1_ref.shape

    # ---- stage u into its zero-padded VMEM frame ----
    _zero_halo(u_pad)
    u_pad[:, pl.ds(1, H), pl.ds(1, W), :] = u_ref[...]

    # ---- A1(u): 3x3 stride-1 on the fine grid (single im2col matmul) ----
    xs_fine = _im2col(u_pad, H, W, stride=1)                       # (nb*H*W, 9*Cin)
    a1u = jnp.dot(xs_fine, wa1_ref[...],
                  preferred_element_type=jnp.float32)              # (nb*H*W, Cin)

    # ---- residual r = f - A1(u), staged padded for the strided R conv ----
    _zero_halo(resid_pad)
    resid_pad[:, pl.ds(1, H), pl.ds(1, W), :] = (
        f_ref[...].astype(jnp.float32) - a1u.reshape(nb, H, W, Cin))

    # ---- R(f - A1(u)): 3x3 stride-2 via strided tap windows ----
    #      (BN scale is pre-folded into wr; only the shift + ReLU remain.)
    xs_r = _im2col(resid_pad, Ho, Wo, stride=2)                    # (M2, 9*Cin)
    r = jnp.dot(xs_r, wr_ref[...], preferred_element_type=jnp.float32)
    f_bn = jnp.maximum(r + bnb_ref[...], 0.0)                      # (M2, Cp)

    # ---- u1 = Pi(u): 3x3 stride-2, strided windows of the same padded u ----
    xs_pi = _im2col(u_pad, Ho, Wo, stride=2)
    u1 = jnp.dot(xs_pi, wpi_ref[...], preferred_element_type=jnp.float32)
    u1_ref[...] = u1.reshape(nb, Ho, Wo, Cp).astype(u1_ref.dtype)

    # ---- A2(u1): 3x3 stride-1 on the coarse grid ----
    _zero_halo(u1_pad)
    u1_pad[:, pl.ds(1, Ho), pl.ds(1, Wo), :] = u1.reshape(nb, Ho, Wo, Cp)
    xs_a2 = _im2col(u1_pad, Ho, Wo, stride=1)                      # (M2, 9*Cp)
    a2u1 = jnp.dot(xs_a2, wa2_ref[...], preferred_element_type=jnp.float32)

    f1_ref[...] = (f_bn + a2u1).reshape(nb, Ho, Wo, Cp).astype(f1_ref.dtype)


def mg_restriction_forward(u, f, params, *, batch_chunk=None):
    """u, f: float32 NCHW. Returns (u1, f1) NCHW with Cout channels, spatial /2."""
    N, Cin, H, W = u.shape
    Cout = params["w_pi"].shape[-1]
    Ho, Wo = H // 2, W // 2
    assert H % 2 == 0 and W % 16 == 0, "kernel assumes even H and W % 16 == 0"
    # TODO(synk): add a spatial tile axis to the grid (+ halo handling in the
    # index_map) for images too large for VMEM; CIFAR-scale images fit whole.

    # batch chunk per grid step: keep >=2 grid steps (v7x has 2 TensorCores)
    # while stacking images onto the matmul M axis once the batch grows.
    if batch_chunk is None:
        batch_chunk = max(1, N // 2)
    while batch_chunk > 1 and N % batch_chunk:
        batch_chunk -= 1
    nb = batch_chunk
    G = N // nb

    # lane-dense outputs: pad Cout up to a multiple of 128 (sliced off below)
    Cp = _round_up(Cout, 128)

    # --- layout glue: NCHW -> NHWC (no wrapper-side spatial padding) ---
    u_nhwc = jnp.transpose(u, (0, 2, 3, 1)).astype(jnp.float32)
    f_nhwc = jnp.transpose(f, (0, 2, 3, 1)).astype(jnp.float32)

    # --- weights: HWIO (3,3,Ci,Co) -> im2col (9*Ci, Co), bf16, Cout padded ---
    eps = 1e-5
    scale = params["bn_gamma"] / jnp.sqrt(params["bn_var"] + eps)
    shift = params["bn_beta"] - params["bn_mean"] * scale

    def pad_co(w):  # pad output channels to Cp
        return jnp.pad(w, ((0, 0), (0, Cp - w.shape[-1])))

    wa1 = params["w_a1"].reshape(9 * Cin, Cin).astype(jnp.bfloat16)
    wpi = pad_co(params["w_pi"].reshape(9 * Cin, Cout)).astype(jnp.bfloat16)
    # fold the BN scale into R's weights (per output channel)
    wr = pad_co(params["w_r"].reshape(9 * Cin, Cout)
                * scale[None, :]).astype(jnp.bfloat16)
    wa2 = jnp.pad(params["w_a2"],
                  ((0, 0), (0, 0), (0, Cp - Cout), (0, Cp - Cout))
                  ).reshape(9 * Cp, Cp).astype(jnp.bfloat16)
    bnb = jnp.pad(shift, (0, Cp - Cout)).reshape(1, Cp).astype(jnp.float32)

    grid_spec = pltpu.PrefetchScalarGridSpec(
        num_scalar_prefetch=0,
        grid=(G,),
        in_specs=[
            pl.BlockSpec((nb, H, W, Cin), lambda g: (g, 0, 0, 0)),   # u
            pl.BlockSpec((nb, H, W, Cin), lambda g: (g, 0, 0, 0)),   # f
            # grid-invariant operands (constant index_map -> fetched once)
            pl.BlockSpec((9 * Cin, Cin), lambda g: (0, 0)),          # wa1
            pl.BlockSpec((9 * Cin, Cp), lambda g: (0, 0)),           # wpi
            pl.BlockSpec((9 * Cin, Cp), lambda g: (0, 0)),           # wr (scaled)
            pl.BlockSpec((9 * Cp, Cp), lambda g: (0, 0)),            # wa2
            pl.BlockSpec((1, Cp), lambda g: (0, 0)),                 # bn shift
        ],
        out_specs=[
            pl.BlockSpec((nb, Ho, Wo, Cp), lambda g: (g, 0, 0, 0)),  # u1
            pl.BlockSpec((nb, Ho, Wo, Cp), lambda g: (g, 0, 0, 0)),  # f1
        ],
        scratch_shapes=[
            pltpu.VMEM((nb, H + 2, W + 2, Cin), jnp.float32),    # u_pad
            pltpu.VMEM((nb, H + 2, W + 2, Cin), jnp.float32),    # resid_pad
            pltpu.VMEM((nb, Ho + 2, Wo + 2, Cp), jnp.float32),   # u1_pad
        ],
    )

    u1_p, f1_p = pl.pallas_call(
        _mg_restriction_kernel,
        grid_spec=grid_spec,
        out_shape=(
            jax.ShapeDtypeStruct((N, Ho, Wo, Cp), jnp.float32),
            jax.ShapeDtypeStruct((N, Ho, Wo, Cp), jnp.float32),
        ),
        compiler_params=pltpu.CompilerParams(
            dimension_semantics=("parallel",),
            vmem_limit_bytes=32 * 1024 * 1024,
        ),
    )(u_nhwc, f_nhwc, wa1, wpi, wr, wa2, bnb)

    u1 = jnp.transpose(u1_p[..., :Cout], (0, 3, 1, 2))
    f1 = jnp.transpose(f1_p[..., :Cout], (0, 3, 1, 2))
    return u1, f1


def _reference(u, f, params):
    """Pure-JAX reference matching the PyTorch forward (inference-mode BN)."""
    def conv(x, w, stride):
        return lax.conv_general_dilated(
            x, w, window_strides=(stride, stride), padding=((1, 1), (1, 1)),
            dimension_numbers=("NCHW", "HWIO", "NCHW"))

    eps = 1e-5
    scale = params["bn_gamma"] / jnp.sqrt(params["bn_var"] + eps)
    shift = params["bn_beta"] - params["bn_mean"] * scale
    u1 = conv(u, params["w_pi"], 2)
    r = conv(f - conv(u, params["w_a1"], 1), params["w_r"], 2)
    f_bn = jnp.maximum(r * scale.reshape(1, -1, 1, 1) + shift.reshape(1, -1, 1, 1), 0.0)
    f1 = f_bn + conv(u1, params["w_a2"], 1)
    return u1, f1


if __name__ == "__main__":
    N, Cin, Cout, H, W = 2, 4, 8, 16, 16
    key = jax.random.PRNGKey(0)
    ks = jax.random.split(key, 10)

    u = jax.random.normal(ks[0], (N, Cin, H, W), jnp.float32)
    f = jax.random.normal(ks[1], (N, Cin, H, W), jnp.float32)

    # Deterministic synthetic parameters (module __init__ shapes, HWIO weights).
    params = dict(
        w_a1=0.2 * jax.random.normal(ks[2], (3, 3, Cin, Cin), jnp.float32),
        w_pi=0.2 * jax.random.normal(ks[3], (3, 3, Cin, Cout), jnp.float32),
        w_r=0.2 * jax.random.normal(ks[4], (3, 3, Cin, Cout), jnp.float32),
        w_a2=0.2 * jax.random.normal(ks[5], (3, 3, Cout, Cout), jnp.float32),
        bn_gamma=1.0 + 0.1 * jax.random.normal(ks[6], (Cout,), jnp.float32),
        bn_beta=0.1 * jax.random.normal(ks[7], (Cout,), jnp.float32),
        bn_mean=0.1 * jax.random.normal(ks[8], (Cout,), jnp.float32),
        bn_var=jnp.abs(jax.random.normal(ks[9], (Cout,), jnp.float32)) + 0.5,
    )

    u1, f1 = jax.jit(mg_restriction_forward)(u, f, params)
    jax.block_until_ready((u1, f1))

    u1_ref, f1_ref = _reference(u, f, params)
    assert u1.shape == (N, Cout, H // 2, W // 2) and f1.shape == (N, Cout, H // 2, W // 2)
    # bf16 MXU operands (f32 accumulation) vs. an f32 XLA reference -> 5e-2 tol.
    assert jnp.allclose(u1, u1_ref, atol=5e-2, rtol=5e-2)
    assert jnp.allclose(f1, f1_ref, atol=5e-2, rtol=5e-2)

    print("KERNEL_OK")
</pallas_src>

<mosaic_0001>
module attributes {stable_mosaic.version = 11 : i64} {
  func.func @_mg_restriction_kernel(%arg0: i32, %arg1: memref<1x16x16x4xf32, #tpu.memory_space<vmem>>, %arg2: memref<1x16x16x4xf32, #tpu.memory_space<vmem>>, %arg3: memref<36x4xbf16, #tpu.memory_space<vmem>>, %arg4: memref<36x128xbf16, #tpu.memory_space<vmem>>, %arg5: memref<36x128xbf16, #tpu.memory_space<vmem>>, %arg6: memref<1152x128xbf16, #tpu.memory_space<vmem>>, %arg7: memref<1x128xf32, #tpu.memory_space<vmem>>, %arg8: memref<1x8x8x128xf32, #tpu.memory_space<vmem>>, %arg9: memref<1x8x8x128xf32, #tpu.memory_space<vmem>>, %arg10: memref<1x18x18x4xf32, #tpu.memory_space<vmem>>, %arg11: memref<1x18x18x4xf32, #tpu.memory_space<vmem>>, %arg12: memref<1x10x10x128xf32, #tpu.memory_space<vmem>>) attributes {dimension_semantics = [#tpu.dimension_semantics<parallel>], iteration_bounds = array<i64: 2>, scalar_prefetch = 0 : i64, scratch_operands = 3 : i64, tpu.core_type = #tpu.core_type<tc>, window_params = [{transform_indices = @transform_0, window_bounds = array<i64: 1, 16, 16, 4>}, {transform_indices = @transform_1, window_bounds = array<i64: 1, 16, 16, 4>}, {pipeline_mode = #tpu.pipeline_mode<synchronous>, transform_indices = @transform_2, window_bounds = array<i64: 36, 4>}, {pipeline_mode = #tpu.pipeline_mode<synchronous>, transform_indices = @transform_3, window_bounds = array<i64: 36, 128>}, {pipeline_mode = #tpu.pipeline_mode<synchronous>, transform_indices = @transform_4, window_bounds = array<i64: 36, 128>}, {pipeline_mode = #tpu.pipeline_mode<synchronous>, transform_indices = @transform_5, window_bounds = array<i64: 1152, 128>}, {pipeline_mode = #tpu.pipeline_mode<synchronous>, transform_indices = @transform_6, window_bounds = array<i64: 1, 128>}, {transform_indices = @transform_7, window_bounds = array<i64: 1, 8, 8, 128>}, {transform_indices = @transform_8, window_bounds = array<i64: 1, 8, 8, 128>}]} {
    %cst = arith.constant 0.000000e+00 : f32
    %0 = vector.broadcast %cst : f32 to vector<1x1x18x4xf32>
    %cst_0 = arith.constant 0.000000e+00 : f32
    %1 = vector.broadcast %cst_0 : f32 to vector<1x18x1x4xf32>
    %c0 = arith.constant 0 : index
    %c0_1 = arith.constant 0 : index
    %c0_2 = arith.constant 0 : index
    %c0_3 = arith.constant 0 : index
    %2 = vector.load %arg10[%c0, %c0_1, %c0_2, %c0_3] : memref<1x18x18x4xf32, #tpu.memory_space<vmem>>, vector<1x1x18x4xf32>
    tpu.vector_store %arg10[%c0, %c0_1, %c0_2, %c0_3], %0 {strides = array<i32>} : memref<1x18x18x4xf32, #tpu.memory_space<vmem>>, vector<1x1x18x4xf32>,
    %c0_4 = arith.constant 0 : index
    %c17 = arith.constant 17 : index
    %c0_5 = arith.constant 0 : index
    %c0_6 = arith.constant 0 : index
    %3 = vector.load %arg10[%c0_4, %c17, %c0_5, %c0_6] : memref<1x18x18x4xf32, #tpu.memory_space<vmem>>, vector<1x1x18x4xf32>
    tpu.vector_store %arg10[%c0_4, %c17, %c0_5, %c0_6], %0 {strides = array<i32>} : memref<1x18x18x4xf32, #tpu.memory_space<vmem>>, vector<1x1x18x4xf32>,
    %c0_7 = arith.constant 0 : index
    %c0_8 = arith.constant 0 : index
    %c0_9 = arith.constant 0 : index
    %c0_10 = arith.constant 0 : index
    %4 = vector.load %arg10[%c0_7, %c0_8, %c0_9, %c0_10] : memref<1x18x18x4xf32, #tpu.memory_space<vmem>>, vector<1x18x1x4xf32>
    tpu.vector_store %arg10[%c0_7, %c0_8, %c0_9, %c0_10], %1 {strides = array<i32>} : memref<1x18x18x4xf32, #tpu.memory_space<vmem>>, vector<1x18x1x4xf32>,
    %c0_11 = arith.constant 0 : index
    %c0_12 = arith.constant 0 : index
    %c17_13 = arith.constant 17 : index
    %c0_14 = arith.constant 0 : index
    %5 = vector.load %arg10[%c0_11, %c0_12, %c17_13, %c0_14] : memref<1x18x18x4xf32, #tpu.memory_space<vmem>>, vector<1x18x1x4xf32>
    tpu.vector_store %arg10[%c0_11, %c0_12, %c17_13, %c0_14], %1 {strides = array<i32>} : memref<1x18x18x4xf32, #tpu.memory_space<vmem>>, vector<1x18x1x4xf32>,
    %c0_15 = arith.constant 0 : index
    %c0_16 = arith.constant 0 : index
    %c0_17 = arith.constant 0 : index
    %c0_18 = arith.constant 0 : index
    %6 = vector.load %arg1[%c0_15, %c0_16, %c0_17, %c0_18] : memref<1x16x16x4xf32, #tpu.memory_space<vmem>>, vector<1x16x16x4xf32>
    %c0_19 = arith.constant 0 : index
    %c1 = arith.constant 1 : index
    %c1_20 = arith.constant 1 : index
    %c0_21 = arith.constant 0 : index
    %7 = vector.load %arg10[%c0_19, %c1, %c1_20, %c0_21] : memref<1x18x18x4xf32, #tpu.memory_space<vmem>>, vector<1x16x16x4xf32>
    tpu.vector_store %arg10[%c0_19, %c1, %c1_20, %c0_21], %6 {strides = array<i32>} : memref<1x18x18x4xf32, #tpu.memory_space<vmem>>, vector<1x16x16x4xf32>,
    %c0_22 = arith.constant 0 : index
    %c0_23 = arith.constant 0 : index
    %c0_24 = arith.constant 0 : index
    %c0_25 = arith.constant 0 : index
    %8 = vector.load %arg10[%c0_22, %c0_23, %c0_24, %c0_25] : memref<1x18x18x4xf32, #tpu.memory_space<vmem>>, vector<1x16x16x4xf32>
    %c0_26 = arith.constant 0 : index
    %c0_27 = arith.constant 0 : index
    %c1_28 = arith.constant 1 : index
    %c0_29 = arith.constant 0 : index
    %9 = vector.load %arg10[%c0_26, %c0_27, %c1_28, %c0_29] : memref<1x18x18x4xf32, #tpu.memory_space<vmem>>, vector<1x16x16x4xf32>
    %c0_30 = arith.constant 0 : index
    %c0_31 = arith.constant 0 : index
    %c2 = arith.constant 2 : index
    %c0_32 = arith.constant 0 : index
    %10 = vector.load %arg10[%c0_30, %c0_31, %c2, %c0_32] : memref<1x18x18x4xf32, #tpu.memory_space<vmem>>, vector<1x16x16x4xf32>
    %c0_33 = arith.constant 0 : index
    %c1_34 = arith.constant 1 : index
    %c0_35 = arith.constant 0 : index
    %c0_36 = arith.constant 0 : index
    %11 = vector.load %arg10[%c0_33, %c1_34, %c0_35, %c0_36] : memref<1x18x18x4xf32, #tpu.memory_space<vmem>>, vector<1x16x16x4xf32>
    %c0_37 = arith.constant 0 : index
    %c1_38 = arith.constant 1 : index
    %c1_39 = arith.constant 1 : index
    %c0_40 = arith.constant 0 : index
    %12 = vector.load %arg10[%c0_37, %c1_38, %c1_39, %c0_40] : memref<1x18x18x4xf32, #tpu.memory_space<vmem>>, vector<1x16x16x4xf32>
    %c0_41 = arith.constant 0 : index
    %c1_42 = arith.constant 1 : index
    %c2_43 = arith.constant 2 : index
    %c0_44 = arith.constant 0 : index
    %13 = vector.load %arg10[%c0_41, %c1_42, %c2_43, %c0_44] : memref<1x18x18x4xf32, #tpu.memory_space<vmem>>, vector<1x16x16x4xf32>
    %c0_45 = arith.constant 0 : index
    %c2_46 = arith.constant 2 : index
    %c0_47 = arith.constant 0 : index
    %c0_48 = arith.constant 0 : index
    %14 = vector.load %arg10[%c0_45, %c2_46, %c0_47, %c0_48] : memref<1x18x18x4xf32, #tpu.memory_space<vmem>>, vector<1x16x16x4xf32>
    %c0_49 = arith.constant 0 : index
    %c2_50 = arith.constant 2 : index
    %c1_51 = arith.constant 1 : index
    %c0_52 = arith.constant 0 : index
    %15 = vector.load %arg10[%c0_49, %c2_50, %c1_51, %c0_52] : memref<1x18x18x4xf32, #tpu.memory_space<vmem>>, vector<1x16x16x4xf32>
    %c0_53 = arith.constant 0 : index
    %c2_54 = arith.constant 2 : index
    %c2_55 = arith.constant 2 : index
    %c0_56 = arith.constant 0 : index
    %16 = vector.load %arg10[%c0_53, %c2_54, %c2_55, %c0_56] : memref<1x18x18x4xf32, #tpu.memory_space<vmem>>, vector<1x16x16x4xf32>
    %17 = tpu.concatenate %8, %9, %10, %11, %12, %13, %14, %15, %16 in 3 : vector<1x16x16x4xf32>, vector<1x16x16x4xf32>, vector<1x16x16x4xf32>, vector<1x16x16x4xf32>, vector<1x16x16x4xf32>, vector<1x16x16x4xf32>, vector<1x16x16x4xf32>, vector<1x16x16x4xf32>, vector<1x16x16x4xf32> -> vector<1x16x16x36xf32>
    %18 = vector.shape_cast %17 : vector<1x16x16x36xf32> to vector<256x36xf32>
    %19 = arith.truncf %18 : vector<256x36xf32> to vector<256x36xbf16>
    %c0_57 = arith.constant 0 : index
    %c0_58 = arith.constant 0 : index
    %20 = vector.load %arg3[%c0_57, %c0_58] : memref<36x4xbf16, #tpu.memory_space<vmem>>, vector<36x4xbf16>
    %cst_59 = arith.constant dense<0.000000e+00> : vector<256x4xf32>
    %21 = tpu.matmul %19, %20, %cst_59 {dimension_numbers = #tpu.dot_dimension_numbers<[1], [0], [0], [1], [0, 0, 1, 1], [], []>} : vector<256x36xbf16>, vector<36x4xbf16>, vector<256x4xf32> -> vector<256x4xf32>
    %cst_60 = arith.constant 0.000000e+00 : f32
    %22 = vector.broadcast %cst_60 : f32 to vector<1x1x18x4xf32>
    %cst_61 = arith.constant 0.000000e+00 : f32
    %23 = vector.broadcast %cst_61 : f32 to vector<1x18x1x4xf32>
    %c0_62 = arith.constant 0 : index
    %c0_63 = arith.constant 0 : index
    %c0_64 = arith.constant 0 : index
    %c0_65 = arith.constant 0 : index
    %24 = vector.load %arg11[%c0_62, %c0_63, %c0_64, %c0_65] : memref<1x18x18x4xf32, #tpu.memory_space<vmem>>, vector<1x1x18x4xf32>
    tpu.vector_store %arg11[%c0_62, %c0_63, %c0_64, %c0_65], %22 {strides = array<i32>} : memref<1x18x18x4xf32, #tpu.memory_space<vmem>>, vector<1x1x18x4xf32>,
    %c0_66 = arith.constant 0 : index
    %c17_67 = arith.constant 17 : index
    %c0_68 = arith.constant 0 : index
    %c0_69 = arith.constant 0 : index
    %25 = vector.load %arg11[%c0_66, %c17_67, %c0_68, %c0_69] : memref<1x18x18x4xf32, #tpu.memory_space<vmem>>, vector<1x1x18x4xf32>
    tpu.vector_store %arg11[%c0_66, %c17_67, %c0_68, %c0_69], %22 {strides = array<i32>} : memref<1x18x18x4xf32, #tpu.memory_space<vmem>>, vector<1x1x18x4xf32>,
    %c0_70 = arith.constant 0 : index
    %c0_71 = arith.constant 0 : index
    %c0_72 = arith.constant 0 : index
    %c0_73 = arith.constant 0 : index
    %26 = vector.load %arg11[%c0_70, %c0_71, %c0_72, %c0_73] : memref<1x18x18x4xf32, #tpu.memory_space<vmem>>, vector<1x18x1x4xf32>
    tpu.vector_store %arg11[%c0_70, %c0_71, %c0_72, %c0_73], %23 {strides = array<i32>} : memref<1x18x18x4xf32, #tpu.memory_space<vmem>>, vector<1x18x1x4xf32>,
    %c0_74 = arith.constant 0 : index
    %c0_75 = arith.constant 0 : index
    %c17_76 = arith.constant 17 : index
    %c0_77 = arith.constant 0 : index
    %27 = vector.load %arg11[%c0_74, %c0_75, %c17_76, %c0_77] : memref<1x18x18x4xf32, #tpu.memory_space<vmem>>, vector<1x18x1x4xf32>
    tpu.vector_store %arg11[%c0_74, %c0_75, %c17_76, %c0_77], %23 {strides = array<i32>} : memref<1x18x18x4xf32, #tpu.memory_space<vmem>>, vector<1x18x1x4xf32>,
    %c0_78 = arith.constant 0 : index
    %c0_79 = arith.constant 0 : index
    %c0_80 = arith.constant 0 : index
    %c0_81 = arith.constant 0 : index
    %28 = vector.load %arg2[%c0_78, %c0_79, %c0_80, %c0_81] : memref<1x16x16x4xf32, #tpu.memory_space<vmem>>, vector<1x16x16x4xf32>
    %29 = vector.shape_cast %21 : vector<256x4xf32> to vector<1x16x16x4xf32>
    %30 = arith.subf %28, %29 : vector<1x16x16x4xf32>
    %c0_82 = arith.constant 0 : index
    %c1_83 = arith.constant 1 : index
    %c1_84 = arith.constant 1 : index
    %c0_85 = arith.constant 0 : index
    %31 = vector.load %arg11[%c0_82, %c1_83, %c1_84, %c0_85] : memref<1x18x18x4xf32, #tpu.memory_space<vmem>>, vector<1x16x16x4xf32>
    tpu.vector_store %arg11[%c0_82, %c1_83, %c1_84, %c0_85], %30 {strides = array<i32>} : memref<1x18x18x4xf32, #tpu.memory_space<vmem>>, vector<1x16x16x4xf32>,
    %c0_86 = arith.constant 0 : index
    %c0_87 = arith.constant 0 : index
    %c0_88 = arith.constant 0 : index
    %c0_89 = arith.constant 0 : index
    %32 = tpu.strided_load %arg11[%c0_86, %c0_87, %c0_88, %c0_89] {strides = array<i32: 1, 2, 2, 1>} : memref<1x18x18x4xf32, #tpu.memory_space<vmem>>, vector<1x8x8x4xf32>
    %c0_90 = arith.constant 0 : index
    %c0_91 = arith.constant 0 : index
    %c1_92 = arith.constant 1 : index
    %c0_93 = arith.constant 0 : index
    %33 = tpu.strided_load %arg11[%c0_90, %c0_91, %c1_92, %c0_93] {strides = array<i32: 1, 2, 2, 1>} : memref<1x18x18x4xf32, #tpu.memory_space<vmem>>, vector<1x8x8x4xf32>
    %c0_94 = arith.constant 0 : index
    %c0_95 = arith.constant 0 : index
    %c2_96 = arith.constant 2 : index
    %c0_97 = arith.constant 0 : index
    %34 = tpu.strided_load %arg11[%c0_94, %c0_95, %c2_96, %c0_97] {strides = array<i32: 1, 2, 2, 1>} : memref<1x18x18x4xf32, #tpu.memory_space<vmem>>, vector<1x8x8x4xf32>
    %c0_98 = arith.constant 0 : index
    %c1_99 = arith.constant 1 : index
    %c0_100 = arith.constant 0 : index
    %c0_101 = arith.constant 0 : index
    %35 = tpu.strided_load %arg11[%c0_98, %c1_99, %c0_100, %c0_101] {strides = array<i32: 1, 2, 2, 1>} : memref<1x18x18x4xf32, #tpu.memory_space<vmem>>, vector<1x8x8x4xf32>
    %c0_102 = arith.constant 0 : index
    %c1_103 = arith.constant 1 : index
    %c1_104 = arith.constant 1 : index
    %c0_105 = arith.constant 0 : index
    %36 = tpu.strided_load %arg11[%c0_102, %c1_103, %c1_104, %c0_105] {strides = array<i32: 1, 2, 2, 1>} : memref<1x18x18x4xf32, #tpu.memory_space<vmem>>, vector<1x8x8x4xf32>
    %c0_106 = arith.constant 0 : index
    %c1_107 = arith.constant 1 : index
    %c2_108 = arith.constant 2 : index
    %c0_109 = arith.constant 0 : index
    %37 = tpu.strided_load %arg11[%c0_106, %c1_107, %c2_108, %c0_109] {strides = array<i32: 1, 2, 2, 1>} : memref<1x18x18x4xf32, #tpu.memory_space<vmem>>, vector<1x8x8x4xf32>
    %c0_110 = arith.constant 0 : index
    %c2_111 = arith.constant 2 : index
    %c0_112 = arith.constant 0 : index
    %c0_113 = arith.constant 0 : index
    %38 = tpu.strided_load %arg11[%c0_110, %c2_111, %c0_112, %c0_113] {strides = array<i32: 1, 2, 2, 1>} : memref<1x18x18x4xf32, #tpu.memory_space<vmem>>, vector<1x8x8x4xf32>
    %c0_114 = arith.constant 0 : index
    %c2_115 = arith.constant 2 : index
    %c1_116 = arith.constant 1 : index
    %c0_117 = arith.constant 0 : index
    %39 = tpu.strided_load %arg11[%c0_114, %c2_115, %c1_116, %c0_117] {strides = array<i32: 1, 2, 2, 1>} : memref<1x18x18x4xf32, #tpu.memory_space<vmem>>, vector<1x8x8x4xf32>
    %c0_118 = arith.constant 0 : index
    %c2_119 = arith.constant 2 : index
    %c2_120 = arith.constant 2 : index
    %c0_121 = arith.constant 0 : index
    %40 = tpu.strided_load %arg11[%c0_118, %c2_119, %c2_120, %c0_121] {strides = array<i32: 1, 2, 2, 1>} : memref<1x18x18x4xf32, #tpu.memory_space<vmem>>, vector<1x8x8x4xf32>
    %41 = tpu.concatenate %32, %33, %34, %35, %36, %37, %38, %39, %40 in 3 : vector<1x8x8x4xf32>, vector<1x8x8x4xf32>, vector<1x8x8x4xf32>, vector<1x8x8x4xf32>, vector<1x8x8x4xf32>, vector<1x8x8x4xf32>, vector<1x8x8x4xf32>, vector<1x8x8x4xf32>, vector<1x8x8x4xf32> -> vector<1x8x8x36xf32>
    %42 = vector.shape_cast %41 : vector<1x8x8x36xf32> to vector<64x36xf32>
    %43 = arith.truncf %42 : vector<64x36xf32> to vector<64x36xbf16>
    %c0_122 = arith.constant 0 : index
    %c0_123 = arith.constant 0 : index
    %44 = vector.load %arg5[%c0_122, %c0_123] : memref<36x128xbf16, #tpu.memory_space<vmem>>, vector<36x128xbf16>
    %cst_124 = arith.constant dense<0.000000e+00> : vector<64x128xf32>
    %45 = tpu.matmul %43, %44, %cst_124 {dimension_numbers = #tpu.dot_dimension_numbers<[1], [0], [0], [1], [0, 0, 1, 1], [], []>} : vector<64x36xbf16>, vector<36x128xbf16>, vector<64x128xf32> -> vector<64x128xf32>
    %c0_125 = arith.constant 0 : index
    %c0_126 = arith.constant 0 : index
    %46 = vector.load %arg7[%c0_125, %c0_126] : memref<1x128xf32, #tpu.memory_space<vmem>>, vector<1x128xf32>
    %47 = vector.broadcast %46 : vector<1x128xf32> to vector<64x128xf32>
    %48 = arith.addf %45, %47 : vector<64x128xf32>
    %cst_127 = arith.constant 0.000000e+00 : f32
    %49 = vector.broadcast %cst_127 : f32 to vector<64x128xf32>
    %50 = arith.maximumf %48, %49 : vector<64x128xf32>
    %c0_128 = arith.constant 0 : index
    %c0_129 = arith.constant 0 : index
    %c0_130 = arith.constant 0 : index
    %c0_131 = arith.constant 0 : index
    %51 = tpu.strided_load %arg10[%c0_128, %c0_129, %c0_130, %c0_131] {strides = array<i32: 1, 2, 2, 1>} : memref<1x18x18x4xf32, #tpu.memory_space<vmem>>, vector<1x8x8x4xf32>
    %c0_132 = arith.constant 0 : index
    %c0_133 = arith.constant 0 : index
    %c1_134 = arith.constant 1 : index
    %c0_135 = arith.constant 0 : index
    %52 = tpu.strided_load %arg10[%c0_132, %c0_133, %c1_134, %c0_135] {strides = array<i32: 1, 2, 2, 1>} : memref<1x18x18x4xf32, #tpu.memory_space<vmem>>, vector<1x8x8x4xf32>
    %c0_136 = arith.constant 0 : index
    %c0_137 = arith.constant 0 : index
    %c2_138 = arith.constant 2 : index
    %c0_139 = arith.constant 0 : index
    %53 = tpu.strided_load %arg10[%c0_136, %c0_137, %c2_138, %c0_139] {strides = array<i32: 1, 2, 2, 1>} : memref<1x18x18x4xf32, #tpu.memory_space<vmem>>, vector<1x8x8x4xf32>
    %c0_140 = arith.constant 0 : index
    %c1_141 = arith.constant 1 : index
    %c0_142 = arith.constant 0 : index
    %c0_143 = arith.constant 0 : index
    %54 = tpu.strided_load %arg10[%c0_140, %c1_141, %c0_142, %c0_143] {strides = array<i32: 1, 2, 2, 1>} : memref<1x18x18x4xf32, #tpu.memory_space<vmem>>, vector<1x8x8x4xf32>
    %c0_144 = arith.constant 0 : index
    %c1_145 = arith.constant 1 : index
    %c1_146 = arith.constant 1 : index
    %c0_147 = arith.constant 0 : index
    %55 = tpu.strided_load %arg10[%c0_144, %c1_145, %c1_146, %c0_147] {strides = array<i32: 1, 2, 2, 1>} : memref<1x18x18x4xf32, #tpu.memory_space<vmem>>, vector<1x8x8x4xf32>
    %c0_148 = arith.constant 0 : index
    %c1_149 = arith.constant 1 : index
    %c2_150 = arith.constant 2 : index
    %c0_151 = arith.constant 0 : index
    %56 = tpu.strided_load %arg10[%c0_148, %c1_149, %c2_150, %c0_151] {strides = array<i32: 1, 2, 2, 1>} : memref<1x18x18x4xf32, #tpu.memory_space<vmem>>, vector<1x8x8x4xf32>
    %c0_152 = arith.constant 0 : index
    %c2_153 = arith.constant 2 : index
    %c0_154 = arith.constant 0 : index
    %c0_155 = arith.constant 0 : index
    %57 = tpu.strided_load %arg10[%c0_152, %c2_153, %c0_154, %c0_155] {strides = array<i32: 1, 2, 2, 1>} : memref<1x18x18x4xf32, #tpu.memory_space<vmem>>, vector<1x8x8x4xf32>
    %c0_156 = arith.constant 0 : index
    %c2_157 = arith.constant 2 : index
    %c1_158 = arith.constant 1 : index
    %c0_159 = arith.constant 0 : index
    %58 = tpu.strided_load %arg10[%c0_156, %c2_157, %c1_158, %c0_159] {strides = array<i32: 1, 2, 2, 1>} : memref<1x18x18x4xf32, #tpu.memory_space<vmem>>, vector<1x8x8x4xf32>
    %c0_160 = arith.constant 0 : index
    %c2_161 = arith.constant 2 : index
    %c2_162 = arith.constant 2 : index
    %c0_163 = arith.constant 0 : index
    %59 = tpu.strided_load %arg10[%c0_160, %c2_161, %c2_162, %c0_163] {strides = array<i32: 1, 2, 2, 1>} : memref<1x18x18x4xf32, #tpu.memory_space<vmem>>, vector<1x8x8x4xf32>
    %60 = tpu.concatenate %51, %52, %53, %54, %55, %56, %57, %58, %59 in 3 : vector<1x8x8x4xf32>, vector<1x8x8x4xf32>, vector<1x8x8x4xf32>, vector<1x8x8x4xf32>, vector<1x8x8x4xf32>, vector<1x8x8x4xf32>, vector<1x8x8x4xf32>, vector<1x8x8x4xf32>, vector<1x8x8x4xf32> -> vector<1x8x8x36xf32>
    %61 = vector.shape_cast %60 : vector<1x8x8x36xf32> to vector<64x36xf32>
    %62 = arith.truncf %61 : vector<64x36xf32> to vector<64x36xbf16>
    %c0_164 = arith.constant 0 : index
    %c0_165 = arith.constant 0 : index
    %63 = vector.load %arg4[%c0_164, %c0_165] : memref<36x128xbf16, #tpu.memory_space<vmem>>, vector<36x128xbf16>
    %cst_166 = arith.constant dense<0.000000e+00> : vector<64x128xf32>
    %64 = tpu.matmul %62, %63, %cst_166 {dimension_numbers = #tpu.dot_dimension_numbers<[1], [0], [0], [1], [0, 0, 1, 1], [], []>} : vector<64x36xbf16>, vector<36x128xbf16>, vector<64x128xf32> -> vector<64x128xf32>
    %65 = vector.shape_cast %64 : vector<64x128xf32> to vector<1x8x8x128xf32>
    %c0_167 = arith.constant 0 : index
    %c0_168 = arith.constant 0 : index
    %c0_169 = arith.constant 0 : index
    %c0_170 = arith.constant 0 : index
    %66 = vector.load %arg8[%c0_167, %c0_168, %c0_169, %c0_170] : memref<1x8x8x128xf32, #tpu.memory_space<vmem>>, vector<1x8x8x128xf32>
    tpu.vector_store %arg8[%c0_167, %c0_168, %c0_169, %c0_170], %65 {strides = array<i32>} : memref<1x8x8x128xf32, #tpu.memory_space<vmem>>, vector<1x8x8x128xf32>,
    %cst_171 = arith.constant 0.000000e+00 : f32
    %67 = vector.broadcast %cst_171 : f32 to vector<1x1x10x128xf32>
    %cst_172 = arith.constant 0.000000e+00 : f32
    %68 = vector.broadcast %cst_172 : f32 to vector<1x10x1x128xf32>
    %c0_173 = arith.constant 0 : index
    %c0_174 = arith.constant 0 : index
    %c0_175 = arith.constant 0 : index
    %c0_176 = arith.constant 0 : index
    %69 = vector.load %arg12[%c0_173, %c0_174, %c0_175, %c0_176] : memref<1x10x10x128xf32, #tpu.memory_space<vmem>>, vector<1x1x10x128xf32>
    tpu.vector_store %arg12[%c0_173, %c0_174, %c0_175, %c0_176], %67 {strides = array<i32>} : memref<1x10x10x128xf32, #tpu.memory_space<vmem>>, vector<1x1x10x128xf32>,
    %c0_177 = arith.constant 0 : index
    %c9 = arith.constant 9 : index
    %c0_178 = arith.constant 0 : index
    %c0_179 = arith.constant 0 : index
    %70 = vector.load %arg12[%c0_177, %c9, %c0_178, %c0_179] : memref<1x10x10x128xf32, #tpu.memory_space<vmem>>, vector<1x1x10x128xf32>
    tpu.vector_store %arg12[%c0_177, %c9, %c0_178, %c0_179], %67 {strides = array<i32>} : memref<1x10x10x128xf32, #tpu.memory_space<vmem>>, vector<1x1x10x128xf32>,
    %c0_180 = arith.constant 0 : index
    %c0_181 = arith.constant 0 : index
    %c0_182 = arith.constant 0 : index
    %c0_183 = arith.constant 0 : index
    %71 = vector.load %arg12[%c0_180, %c0_181, %c0_182, %c0_183] : memref<1x10x10x128xf32, #tpu.memory_space<vmem>>, vector<1x10x1x128xf32>
    tpu.vector_store %arg12[%c0_180, %c0_181, %c0_182, %c0_183], %68 {strides = array<i32>} : memref<1x10x10x128xf32, #tpu.memory_space<vmem>>, vector<1x10x1x128xf32>,
    %c0_184 = arith.constant 0 : index
    %c0_185 = arith.constant 0 : index
    %c9_186 = arith.constant 9 : index
    %c0_187 = arith.constant 0 : index
    %72 = vector.load %arg12[%c0_184, %c0_185, %c9_186, %c0_187] : memref<1x10x10x128xf32, #tpu.memory_space<vmem>>, vector<1x10x1x128xf32>
    tpu.vector_store %arg12[%c0_184, %c0_185, %c9_186, %c0_187], %68 {strides = array<i32>} : memref<1x10x10x128xf32, #tpu.memory_space<vmem>>, vector<1x10x1x128xf32>,
    %73 = vector.shape_cast %64 : vector<64x128xf32> to vector<1x8x8x128xf32>
    %c0_188 = arith.constant 0 : index
    %c1_189 = arith.constant 1 : index
    %c1_190 = arith.constant 1 : index
    %c0_191 = arith.constant 0 : index
    %74 = vector.load %arg12[%c0_188, %c1_189, %c1_190, %c0_191] : memref<1x10x10x128xf32, #tpu.memory_space<vmem>>, vector<1x8x8x128xf32>
    tpu.vector_store %arg12[%c0_188, %c1_189, %c1_190, %c0_191], %73 {strides = array<i32>} : memref<1x10x10x128xf32, #tpu.memory_space<vmem>>, vector<1x8x8x128xf32>,
    %c0_192 = arith.constant 0 : index
    %c0_193 = arith.constant 0 : index
    %c0_194 = arith.constant 0 : index
    %c0_195 = arith.constant 0 : index
    %75 = vector.load %arg12[%c0_192, %c0_193, %c0_194, %c0_195] : memref<1x10x10x128xf32, #tpu.memory_space<vmem>>, vector<1x8x8x128xf32>
    %c0_196 = arith.constant 0 : index
    %c0_197 = arith.constant 0 : index
    %c1_198 = arith.constant 1 : index
    %c0_199 = arith.constant 0 : index
    %76 = vector.load %arg12[%c0_196, %c0_197, %c1_198, %c0_199] : memref<1x10x10x128xf32, #tpu.memory_space<vmem>>, vector<1x8x8x128xf32>
    %c0_200 = arith.constant 0 : index
    %c0_201 = arith.constant 0 : index
    %c2_202 = arith.constant 2 : index
    %c0_203 = arith.constant 0 : index
    %77 = vector.load %arg12[%c0_200, %c0_201, %c2_202, %c0_203] : memref<1x10x10x128xf32, #tpu.memory_space<vmem>>, vector<1x8x8x128xf32>
    %c0_204 = arith.constant 0 : index
    %c1_205 = arith.constant 1 : index
    %c0_206 = arith.constant 0 : index
    %c0_207 = arith.constant 0 : index
    %78 = vector.load %arg12[%c0_204, %c1_205, %c0_206, %c0_207] : memref<1x10x10x128xf32, #tpu.memory_space<vmem>>, vector<1x8x8x128xf32>
    %c0_208 = arith.constant 0 : index
    %c1_209 = arith.constant 1 : index
    %c1_210 = arith.constant 1 : index
    %c0_211 = arith.constant 0 : index
    %79 = vector.load %arg12[%c0_208, %c1_209, %c1_210, %c0_211] : memref<1x10x10x128xf32, #tpu.memory_space<vmem>>, vector<1x8x8x128xf32>
    %c0_212 = arith.constant 0 : index
    %c1_213 = arith.constant 1 : index
    %c2_214 = arith.constant 2 : index
    %c0_215 = arith.constant 0 : index
    %80 = vector.load %arg12[%c0_212, %c1_213, %c2_214, %c0_215] : memref<1x10x10x128xf32, #tpu.memory_space<vmem>>, vector<1x8x8x128xf32>
    %c0_216 = arith.constant 0 : index
    %c2_217 = arith.constant 2 : index
    %c0_218 = arith.constant 0 : index
    %c0_219 = arith.constant 0 : index
    %81 = vector.load %arg12[%c0_216, %c2_217, %c0_218, %c0_219] : memref<1x10x10x128xf32, #tpu.memory_space<vmem>>, vector<1x8x8x128xf32>
    %c0_220 = arith.constant 0 : index
    %c2_221 = arith.constant 2 : index
    %c1_222 = arith.constant 1 : index
    %c0_223 = arith.constant 0 : index
    %82 = vector.load %arg12[%c0_220, %c2_221, %c1_222, %c0_223] : memref<1x10x10x128xf32, #tpu.memory_space<vmem>>, vector<1x8x8x128xf32>
    %c0_224 = arith.constant 0 : index
    %c2_225 = arith.constant 2 : index
    %c2_226 = arith.constant 2 : index
    %c0_227 = arith.constant 0 : index
    %83 = vector.load %arg12[%c0_224, %c2_225, %c2_226, %c0_227] : memref<1x10x10x128xf32, #tpu.memory_space<vmem>>, vector<1x8x8x128xf32>
    %84 = tpu.concatenate %75, %76, %77, %78, %79, %80, %81, %82, %83 in 3 : vector<1x8x8x128xf32>, vector<1x8x8x128xf32>, vector<1x8x8x128xf32>, vector<1x8x8x128xf32>, vector<1x8x8x128xf32>, vector<1x8x8x128xf32>, vector<1x8x8x128xf32>, vector<1x8x8x128xf32>, vector<1x8x8x128xf32> -> vector<1x8x8x1152xf32>
    %85 = vector.shape_cast %84 : vector<1x8x8x1152xf32> to vector<64x1152xf32>
    %86 = arith.truncf %85 : vector<64x1152xf32> to vector<64x1152xbf16>
    %c0_228 = arith.constant 0 : index
    %c0_229 = arith.constant 0 : index
    %87 = vector.load %arg6[%c0_228, %c0_229] : memref<1152x128xbf16, #tpu.memory_space<vmem>>, vector<1152x128xbf16>
    %cst_230 = arith.constant dense<0.000000e+00> : vector<64x128xf32>
    %88 = tpu.matmul %86, %87, %cst_230 {dimension_numbers = #tpu.dot_dimension_numbers<[1], [0], [0], [1], [0, 0, 1, 1], [], []>} : vector<64x1152xbf16>, vector<1152x128xbf16>, vector<64x128xf32> -> vector<64x128xf32>
    %89 = arith.addf %50, %88 : vector<64x128xf32>
    %90 = vector.shape_cast %89 : vector<64x128xf32> to vector<1x8x8x128xf32>
    %c0_231 = arith.constant 0 : index
    %c0_232 = arith.constant 0 : index
    %c0_233 = arith.constant 0 : index
    %c0_234 = arith.constant 0 : index
    %91 = vector.load %arg9[%c0_231, %c0_232, %c0_233, %c0_234] : memref<1x8x8x128xf32, #tpu.memory_space<vmem>>, vector<1x8x8x128xf32>
    tpu.vector_store %arg9[%c0_231, %c0_232, %c0_233, %c0_234], %90 {strides = array<i32>} : memref<1x8x8x128xf32, #tpu.memory_space<vmem>>, vector<1x8x8x128xf32>,
    return
  }
  func.func @transform_0(%arg0: i32) -> (i32, i32, i32, i32) {
    %c0_i32 = arith.constant 0 : i32
    %c0_i32_0 = arith.constant 0 : i32
    %c0_i32_1 = arith.constant 0 : i32
    %c0_i32_2 = arith.constant 0 : i32
    return %arg0, %c0_i32, %c0_i32_0, %c0_i32_1 : i32, i32, i32, i32
  }
  func.func @transform_1(%arg0: i32) -> (i32, i32, i32, i32) {
    %c0_i32 = arith.constant 0 : i32
    %c0_i32_0 = arith.constant 0 : i32
    %c0_i32_1 = arith.constant 0 : i32
    %c0_i32_2 = arith.constant 0 : i32
    return %arg0, %c0_i32, %c0_i32_0, %c0_i32_1 : i32, i32, i32, i32
  }
  func.func @transform_2(%arg0: i32) -> (i32, i32) {
    %c0_i32 = arith.constant 0 : i32
    %c0_i32_0 = arith.constant 0 : i32
    %c0_i32_1 = arith.constant 0 : i32
    return %c0_i32, %c0_i32_0 : i32, i32
  }
  func.func @transform_3(%arg0: i32) -> (i32, i32) {
    %c0_i32 = arith.constant 0 : i32
    %c0_i32_0 = arith.constant 0 : i32
    %c0_i32_1 = arith.constant 0 : i32
    return %c0_i32, %c0_i32_0 : i32, i32
  }
  func.func @transform_4(%arg0: i32) -> (i32, i32) {
    %c0_i32 = arith.constant 0 : i32
    %c0_i32_0 = arith.constant 0 : i32
    %c0_i32_1 = arith.constant 0 : i32
    return %c0_i32, %c0_i32_0 : i32, i32
  }
  func.func @transform_5(%arg0: i32) -> (i32, i32) {
    %c0_i32 = arith.constant 0 : i32
    %c0_i32_0 = arith.constant 0 : i32
    %c0_i32_1 = arith.constant 0 : i32
    return %c0_i32, %c0_i32_0 : i32, i32
  }
  func.func @transform_6(%arg0: i32) -> (i32, i32) {
    %c0_i32 = arith.constant 0 : i32
    %c0_i32_0 = arith.constant 0 : i32
    %c0_i32_1 = arith.constant 0 : i32
    return %c0_i32, %c0_i32_0 : i32, i32
  }
  func.func @transform_7(%arg0: i32) -> (i32, i32, i32, i32) {
    %c0_i32 = arith.constant 0 : i32
    %c0_i32_0 = arith.constant 0 : i32
    %c0_i32_1 = arith.constant 0 : i32
    %c0_i32_2 = arith.constant 0 : i32
    return %arg0, %c0_i32, %c0_i32_0, %c0_i32_1 : i32, i32, i32, i32
  }
  func.func @transform_8(%arg0: i32) -> (i32, i32, i32, i32) {
    %c0_i32 = arith.constant 0 : i32
    %c0_i32_0 = arith.constant 0 : i32
    %c0_i32_1 = arith.constant 0 : i32
    %c0_i32_2 = arith.constant 0 : i32
    return %arg0, %c0_i32, %c0_i32_0, %c0_i32_1 : i32, i32, i32, i32
  }
}

</mosaic_0001>

<bundles_post_ra>
// kernel: mg_restriction_forward.1
= control target key start
LH: loop header
LB: loop body
LE: loop exit
PB: predicated region body
PF: predicated region fallthrough
CT: control target
= control target key end

     0   :  { %s6374_s27 = smov 0   ;;  %s8120_s0 = inlined_call_operand.vmem [shape: f32[2,16,16,4], index: 0, kind: input, shape index: {}]   ;;  %s8121_s1 = inlined_call_operand.vmem [shape: f32[2,16,16,4], index: 1, kind: input, shape index: {}]   ;;  %s8122_s2 = inlined_call_operand.vmem [shape: bf16[36,4], index: 2, kind: input, shape index: {}]   ;;  %s8123_s3 = inlined_call_operand.vmem [shape: bf16[36,128], index: 3, kind: input, shape index: {}]   ;;  %s8124_s4 = inlined_call_operand.vmem [shape: bf16[36,128], index: 4, kind: input, shape index: {}]   ;;  %s8125_s5 = inlined_call_operand.vmem [shape: bf16[1152,128], index: 5, kind: input, shape index: {}]   ;;  %s8126_s6 = inlined_call_operand.vmem [shape: f32[1,128], index: 6, kind: input, shape index: {}]   ;;  %s8127_s7 = inlined_call_operand.vmem [shape: f32[2,8,8,128], index: 7, kind: output, shape index: {0}]   ;;  %s8128_s8 = inlined_call_operand.vmem [shape: f32[2,8,8,128], index: 8, kind: output, shape index: {1}]  }
   0x1 LB: > { %s4823_s28 = sadd.s32 4294967295, %s6318_s27   ;;  %p4827_p0 = scmp.ge.s32.totalorder %s6318_s27, 1  ;;  %s6318_s27 = sphi %s6374_s27, %s19_s27  }
   0x2   : > { %p275_p1 = scmp.lt.s32.totalorder %s6318_s27, 3 }
   0x4   : > { %p276_p2 = pnand %p4827_p0, %p275_p1 }
   0x5   : > { %vm340_vm0 = vcmask (!%p276_p2), 31744   ;;  %vm343_vm1 = vcmask (!%p276_p2), 25600   ;;  %vm349_vm2 = vcmask (!%p276_p2), 24576   ;;  %v6320_v0 = vmov (!%p276_p2), 0.0   ;;  %p319_p3 = scmp.lt.s32.totalorder (!%p276_p2), %s4823_s28, 1  ;;  %s6321_s11 = smov (!%p276_p2), 4  }
   0x6   : > { %279 = sbr.rel (%p276_p2) target bundleno = 1322 (0x52a), region = 48  ;;  %341 = vst.msk [vmem:[#allocation2] sm:$0xff] (!%p276_p2), %vm340_vm0, %v6320_v0  ;;  %342 = vst.msk [vmem:[#allocation2 + $0x8] sm:$0xff] (!%p276_p2), %vm340_vm0, %v6320_v0  ;;  %s6322_s12 = smov (!%p276_p2), 8   ;;  %v6223_v50 = vld [vmem:[%s8122_s2] sm:$0xff] (!%p276_p2)   ;;  %v6224_v52 = vld [vmem:[%s8122_s2 + $0x8] sm:$0xff] (!%p276_p2)  }
   0x7   : > { %344 = vst.msk [vmem:[#allocation2 + $0x10] sm:$0x3] (!%p276_p2), %vm343_vm1, %v6320_v0  ;;  %348 = vst.msk [vmem:[#allocation2 + $0x1a8] sm:$0x3] (!%p276_p2), %vm343_vm1, %v6320_v0  ;;  %s6323_s13 = smov (!%p276_p2), 12   ;;  %s6324_s14 = smov (!%p276_p2), 16   ;;  %5153 = vmatprep.subr.bf16.mxu0 (!%p276_p2), %v6223_v50 }
   0x8   : > { %346 = vst.msk [vmem:[#allocation2 + $0x198] sm:$0xff] (!%p276_p2), %vm340_vm0, %v6320_v0  ;;  %347 = vst.msk [vmem:[#allocation2 + $0x1a0] sm:$0xff] (!%p276_p2), %vm340_vm0, %v6320_v0  ;;  %s6325_s15 = smov (!%p276_p2), 20   ;;  %s6326_s18 = smov (!%p276_p2), 24   ;;  %5154 = vmatpush3.bf16.msra.mxu0 (!%p276_p2), %v6223_v50  ;;  %vm2112_vm3 = vcmask (!%p276_p2), 1041408   ;;  %vm1796_vm4 = vcmask (!%p276_p2), 64512  }
   0x9   : > { %351 = vst.msk [vmem:[#allocation2 + $0x18] sm:$0x1] (!%p276_p2), %vm349_vm2, %v6320_v0  ;;  %352 = vst.msk [vmem:[#allocation2 + $0x30] sm:$0x1] (!%p276_p2), %vm349_vm2, %v6320_v0  ;;  %5155 = vmatprep.subr.bf16.mxu0 (!%p276_p2), %v6224_v52  ;;  %s6327_s23 = smov (!%p276_p2), 28   ;;  %s6328_s24 = smov (!%p276_p2), 32  }
   0xa   : > { %353 = vst.msk [vmem:[#allocation2 + $0x48] sm:$0x1] (!%p276_p2), %vm349_vm2, %v6320_v0  ;;  %354 = vst.msk [vmem:[#allocation2 + $0x60] sm:$0x1] (!%p276_p2), %vm349_vm2, %v6320_v0  ;;  %vm1829_vm5 = vcmask (!%p276_p2), 97280   ;;  %vm1862_vm6 = vcmask (!%p276_p2), 130048  }
   0xb   : > { %355 = vst.msk [vmem:[#allocation2 + $0x78] sm:$0x1] (!%p276_p2), %vm349_vm2, %v6320_v0  ;;  %356 = vst.msk [vmem:[#allocation2 + $0x90] sm:$0x1] (!%p276_p2), %vm349_vm2, %v6320_v0  ;;  %vm1895_vm7 = vcmask (!%p276_p2), 162816   ;;  %vm1928_vm8 = vcmask (!%p276_p2), 195584  }
   0xc   : > { %357 = vst.msk [vmem:[#allocation2 + $0xa8] sm:$0x1] (!%p276_p2), %vm349_vm2, %v6320_v0  ;;  %358 = vst.msk [vmem:[#allocation2 + $0xc0] sm:$0x1] (!%p276_p2), %vm349_vm2, %v6320_v0  ;;  %5156 = vmatpush3.bf16.msra.mxu0 (!%p276_p2), %v6224_v52  ;;  %vm1961_vm9 = vcmask (!%p276_p2), 228352   ;;  %vm1994_vm10 = vcmask (!%p276_p2), 261120  }
   0xd   : > { %359 = vst.msk [vmem:[#allocation2 + $0xd8] sm:$0x1] %vm349_vm2, %v6320_v0  ;;  %360 = vst.msk [vmem:[#allocation2 + $0xf0] sm:$0x1] %vm349_vm2, %v6320_v0  ;;  %s8130_s28 = smov (!%p319_p3, %s4823_s28), 1  ;;  %v515_v4 = vld [vmem:[#allocation2 + $0x2] sm:$0xff] }
   0xe   : > { %361 = vst.msk [vmem:[#allocation2 + $0x108] sm:$0x1] %vm349_vm2, %v6320_v0  ;;  %362 = vst.msk [vmem:[#allocation2 + $0x120] sm:$0x1] %vm349_vm2, %v6320_v0  ;;  %s4944_s29 = sshll.u32 %s8130_s28, 8  ;;  %v483_v5 = vld [vmem:[#allocation2 + $0x1] sm:$0xff] }
   0xf   : > { %363 = vst.msk [vmem:[#allocation2 + $0x138] sm:$0x1] %vm349_vm2, %v6320_v0  ;;  %364 = vst.msk [vmem:[#allocation2 + $0x150] sm:$0x1] %vm349_vm2, %v6320_v0  ;;  %s6542_s10 = scalar_lea.vmem %s8120_s0, %s4944_s29  ;;  %v484_v6 = vld [vmem:[#allocation2 + $0x9] sm:$0xff]  ;;  %vm2063_vm11 = vcmask 293888   ;;  %s7379_s30 = scalar_lea.vmem %s8121_s1, %s4944_s29 }
  0x10   : > { %365 = vst.msk [vmem:[#allocation2 + $0x168] sm:$0x1] %vm349_vm2, %v6320_v0  ;;  %366 = vst.msk [vmem:[#allocation2 + $0x180] sm:$0x1] %vm349_vm2, %v6320_v0  ;;  %v386_v1 = vld [vmem:[%s6542_s10] sm:$0xff]  ;;  %v387_v2 = vld [vmem:[%s6542_s10 + $0x8] sm:$0xff]  ;;  %v5263_v8 = vpack.i.bf16 %v484_v6, %v483_v5 }
  0x11   : > { %369 = vst.msk [vmem:[#allocation2 + $0x29] sm:$0x1] %vm349_vm2, %v6320_v0  ;;  %370 = vst.msk [vmem:[#allocation2 + $0x41] sm:$0x1] %vm349_vm2, %v6320_v0  ;;  %v388_v3 = vld [vmem:[%s6542_s10 + $0x10] sm:$0xff]  ;;  %v389_v9 = vld [vmem:[%s6542_s10 + $0x18] sm:$0xff] }
  0x12   : > { %371 = vst.msk [vmem:[#allocation2 + $0x59] sm:$0x1] %vm349_vm2, %v6320_v0  ;;  %372 = vst.msk [vmem:[#allocation2 + $0x71] sm:$0x1] %vm349_vm2, %v6320_v0  ;;  %v390_v10 = vld [vmem:[%s6542_s10 + $0x20] sm:$0xff]  ;;  %v391_v12 = vld [vmem:[%s6542_s10 + $0x28] sm:$0xff]  ;;  %5264 = vrot.lane.b32.xlu0 %v5263_v8, %s6321_s11 }
  0x13   : > { %373 = vst.msk [vmem:[#allocation2 + $0x89] sm:$0x1] %vm349_vm2, %v6320_v0  ;;  %374 = vst.msk [vmem:[#allocation2 + $0xa1] sm:$0x1] %vm349_vm2, %v6320_v0  ;;  %v392_v13 = vld [vmem:[%s6542_s10 + $0x30] sm:$0xff]  ;;  %v393_v14 = vld [vmem:[%s6542_s10 + $0x38] sm:$0xff] }
  0x14   : > { %375 = vst.msk [vmem:[#allocation2 + $0xb9] sm:$0x1] %vm349_vm2, %v6320_v0  ;;  %376 = vst.msk [vmem:[#allocation2 + $0xd1] sm:$0x1] %vm349_vm2, %v6320_v0  ;;  %v394_v15 = vld [vmem:[%s6542_s10 + $0x40] sm:$0xff]  ;;  %v395_v16 = vld [vmem:[%s6542_s10 + $0x48] sm:$0xff] }
  0x15   : > { %377 = vst.msk [vmem:[#allocation2 + $0xe9] sm:$0x1] %vm349_vm2, %v6320_v0  ;;  %378 = vst.msk [vmem:[#allocation2 + $0x101] sm:$0x1] %vm349_vm2, %v6320_v0  ;;  %v396_v17 = vld [vmem:[%s6542_s10 + $0x50] sm:$0xff]  ;;  %v397_v18 = vld [vmem:[%s6542_s10 + $0x58] sm:$0xff] }
  0x16   : > { %379 = vst.msk [vmem:[#allocation2 + $0x119] sm:$0x1] %vm349_vm2, %v6320_v0  ;;  %380 = vst.msk [vmem:[#allocation2 + $0x131] sm:$0x1] %vm349_vm2, %v6320_v0  ;;  %v398_v19 = vld [vmem:[%s6542_s10 + $0x60] sm:$0xff]  ;;  %v399_v20 = vld [vmem:[%s6542_s10 + $0x68] sm:$0xff] }
  0x17   : > { %381 = vst.msk [vmem:[#allocation2 + $0x149] sm:$0x1] %vm349_vm2, %v6320_v0  ;;  %382 = vst.msk [vmem:[#allocation2 + $0x161] sm:$0x1] %vm349_vm2, %v6320_v0  ;;  %v400_v21 = vld [vmem:[%s6542_s10 + $0x70] sm:$0xff]  ;;  %v401_v22 = vld [vmem:[%s6542_s10 + $0x78] sm:$0xff] }
  0x18   : > { %383 = vst.msk [vmem:[#allocation2 + $0x179] sm:$0x1] %vm349_vm2, %v6320_v0  ;;  %384 = vst.msk [vmem:[#allocation2 + $0x191] sm:$0x1] %vm349_vm2, %v6320_v0  ;;  %v402_v23 = vld [vmem:[%s6542_s10 + $0x80] sm:$0xff]  ;;  %v403_v24 = vld [vmem:[%s6542_s10 + $0x88] sm:$0xff] }
  0x19   : > { %2277 = vst.msk [vmem:[#allocation3] sm:$0xff] %vm340_vm0, %v6320_v0  ;;  %2278 = vst.msk [vmem:[#allocation3 + $0x8] sm:$0xff] %vm340_vm0, %v6320_v0  ;;  %v404_v48 = vld [vmem:[%s6542_s10 + $0x90] sm:$0xff]  ;;  %v405_v49 = vld [vmem:[%s6542_s10 + $0x98] sm:$0xff]  ;;  %s4946_s29 = sshll.u32 %s8130_s28, 6 }
  0x1a   : > { %2279 = vst.msk [vmem:[#allocation3 + $0x10] sm:$0x3] %vm343_vm1, %v6320_v0  ;;  %3571 = vst [vmem:[#allocation4] sm:$0xff] %v6320_v0  ;;  %v406_v53 = vld [vmem:[%s6542_s10 + $0xa0] sm:$0xff]  ;;  %v407_v55 = vld [vmem:[%s6542_s10 + $0xa8] sm:$0xff]  ;;  %s7852_s16 = scalar_lea.vmem %s8127_s7, %s4946_s29  ;;  %s8102_s22 = scalar_lea.vmem %s8128_s8, %s4946_s29 }
  0x1b   : > { %2285 = vst.msk [vmem:[#allocation3 + $0x18] sm:$0x1] %vm349_vm2, %v6320_v0  ;;  %2286 = vst.msk [vmem:[#allocation3 + $0x30] sm:$0x1] %vm349_vm2, %v6320_v0  ;;  %v408_v62 = vld [vmem:[%s6542_s10 + $0xb0] sm:$0xff]  ;;  %v409_v63 = vld [vmem:[%s6542_s10 + $0xb8] sm:$0xff] }
  0x1c   : > { %2287 = vst.msk [vmem:[#allocation3 + $0x48] sm:$0x1] %vm349_vm2, %v6320_v0  ;;  %2288 = vst.msk [vmem:[#allocation3 + $0x60] sm:$0x1] %vm349_vm2, %v6320_v0  ;;  %v410_v6 = vld [vmem:[%s6542_s10 + $0xc0] sm:$0xff] }
  0x1d   : > { %2289 = vst.msk [vmem:[#allocation3 + $0x78] sm:$0x1] %vm349_vm2, %v6320_v0  ;;  %2290 = vst.msk [vmem:[#allocation3 + $0x90] sm:$0x1] %vm349_vm2, %v6320_v0 }
  0x1e   : > { %2291 = vst.msk [vmem:[#allocation3 + $0xa8] sm:$0x1] %vm349_vm2, %v6320_v0  ;;  %2292 = vst.msk [vmem:[#allocation3 + $0xc0] sm:$0x1] %vm349_vm2, %v6320_v0 }
  0x1f   : > { %2293 = vst.msk [vmem:[#allocation3 + $0xd8] sm:$0x1] %vm349_vm2, %v6320_v0  ;;  %2294 = vst.msk [vmem:[#allocation3 + $0xf0] sm:$0x1] %vm349_vm2, %v6320_v0 }
  0x20   : > { %2295 = vst.msk [vmem:[#allocation3 + $0x108] sm:$0x1] %vm349_vm2, %v6320_v0  ;;  %2296 = vst.msk [vmem:[#allocation3 + $0x120] sm:$0x1] %vm349_vm2, %v6320_v0 }
  0x21   : > { %2297 = vst.msk [vmem:[#allocation3 + $0x138] sm:$0x1] %vm349_vm2, %v6320_v0  ;;  %2298 = vst.msk [vmem:[#allocation3 + $0x150] sm:$0x1] %vm349_vm2, %v6320_v0 }
  0x22   : > { %2299 = vst.msk [vmem:[#allocation3 + $0x168] sm:$0x1] %vm349_vm2, %v6320_v0  ;;  %2300 = vst.msk [vmem:[#allocation3 + $0x180] sm:$0x1] %vm349_vm2, %v6320_v0 }
  0x23   : > { %3572 = vst [vmem:[#allocation4 + $0x8] sm:$0x3] %v6320_v0  ;;  %3574 = vst [vmem:[#allocation4 + $0x90] sm:$0xff] %v6320_v0  ;;  %v6225_v54 = vld [vmem:[%s8122_s2 + $0x10] ss:$0 sps:$4 sm:$0x33]  }
  0x24   : > { %3575 = vst [vmem:[#allocation4 + $0x98] sm:$0x3] %v6320_v0  ;;  %3577 = vst [vmem:[#allocation4 + $0x10] sm:$0x1] %v6320_v0  ;;  %5243 = vmatprep.subr.msk.bf16.mxu0 %vm2112_vm3, %v6225_v54  ;;  %v2114_v58 = vsel %vm2112_vm3, %v6225_v54, 0 }
  0x25   : > { %3578 = vst [vmem:[#allocation4 + $0x20] sm:$0x1] %v6320_v0  ;;  %3579 = vst [vmem:[#allocation4 + $0x30] sm:$0x1] %v6320_v0  ;;  %5158 = vmatpush3.bf16.msra.mxu0 %v2114_v58 }
  0x26   : > { %3580 = vst [vmem:[#allocation4 + $0x40] sm:$0x1] %v6320_v0  ;;  %3581 = vst [vmem:[#allocation4 + $0x50] sm:$0x1] %v6320_v0 }
  0x27   : > { %3582 = vst [vmem:[#allocation4 + $0x60] sm:$0x1] %v6320_v0  ;;  %3583 = vst [vmem:[#allocation4 + $0x70] sm:$0x1] %v6320_v0 }
  0x28   : > { %3584 = vst [vmem:[#allocation4 + $0x80] sm:$0x1] %v6320_v0  ;;  %3587 = vst [vmem:[#allocation4 + $0x19] sm:$0x1] %v6320_v0 }
  0x29   : > { %3588 = vst [vmem:[#allocation4 + $0x29] sm:$0x1] %v6320_v0  ;;  %3589 = vst [vmem:[#allocation4 + $0x39] sm:$0x1] %v6320_v0 }
  0x2a   : > { %3590 = vst [vmem:[#allocation4 + $0x49] sm:$0x1] %v6320_v0  ;;  %3591 = vst [vmem:[#allocation4 + $0x59] sm:$0x1] %v6320_v0 }
  0x2b   : > { %3592 = vst [vmem:[#allocation4 + $0x69] sm:$0x1] %v6320_v0  ;;  %3593 = vst [vmem:[#allocation4 + $0x79] sm:$0x1] %v6320_v0 }
  0x2c   : > { %3594 = vst [vmem:[#allocation4 + $0x89] sm:$0x1] %v6320_v0  ;;  %368 = vst.msk [vmem:[#allocation2 + $0x11] sm:$0x1] %vm349_vm2, %v6320_v0 }
  0x2d   : > { %350 = vst.msk [vmem:[#allocation2] sm:$0x1] %vm349_vm2, %v6320_v0  ;;  %367 = vst.msk [vmem:[#allocation2 + $0x198] sm:$0x1] %vm349_vm2, %v6320_v0 }
  0x2e   : > { %385 = vst.msk [vmem:[#allocation2 + $0x1a9] sm:$0x1] %vm349_vm2, %v6320_v0  ;;  %2284 = vst.msk [vmem:[#allocation3] sm:$0x1] %vm349_vm2, %v6320_v0 }
  0x2f   : > { %3576 = vst [vmem:[#allocation4] sm:$0x1] %v6320_v0  ;;  %3585 = vst [vmem:[#allocation4 + $0x90] sm:$0x1] %v6320_v0 }
  0x30   : > { %3586 = vst [vmem:[#allocation4 + $0x9] sm:$0x1] %v6320_v0  ;;  %3595 = vst [vmem:[#allocation4 + $0x99] sm:$0x1] %v6320_v0 }
  0x31   : > { %419 = vst.msk [vmem:[#allocation2 + $0x19] sm:$0xff] %vm340_vm0, %v386_v1  ;;  %420 = vst.msk [vmem:[#allocation2 + $0x21] sm:$0xff] %vm340_vm0, %v387_v2 }
  0x32   : > { %421 = vst.msk [vmem:[#allocation2 + $0x31] sm:$0xff] %vm340_vm0, %v388_v3  ;;  %422 = vst.msk [vmem:[#allocation2 + $0x39] sm:$0xff] %vm340_vm0, %v389_v9  ;;  %v411_v9 = vld [vmem:[%s6542_s10 + $0xc8] sm:$0xff] }
  0x33   : > { %v516_v7 = vld [vmem:[#allocation2 + $0xa] sm:$0xff]  ;;  %423 = vst.msk [vmem:[#allocation2 + $0x49] sm:$0xff] %vm340_vm0, %v390_v10  ;;  %424 = vst.msk [vmem:[#allocation2 + $0x51] sm:$0xff] %vm340_vm0, %v391_v12 }
  0x34   : > { %v5268_v11 = vpack.i.bf16 %v516_v7, %v515_v4  ;;  %425 = vst.msk [vmem:[#allocation2 + $0x61] sm:$0xff] %vm340_vm0, %v392_v13  ;;  %426 = vst.msk [vmem:[#allocation2 + $0x69] sm:$0xff] %vm340_vm0, %v393_v14 }
  0x35   : > { %427 = vst.msk [vmem:[#allocation2 + $0x79] sm:$0xff] %vm340_vm0, %v394_v15  ;;  %428 = vst.msk [vmem:[#allocation2 + $0x81] sm:$0xff] %vm340_vm0, %v395_v16 }
  0x36   : > { %5269 = vrot.lane.b32.xlu1 %v5268_v11, %s6322_s12  ;;  %429 = vst.msk [vmem:[#allocation2 + $0x91] sm:$0xff] %vm340_vm0, %v396_v17  ;;  %430 = vst.msk [vmem:[#allocation2 + $0x99] sm:$0xff] %vm340_vm0, %v397_v18  ;;  %v412_v18 = vld [vmem:[%s6542_s10 + $0xd0] sm:$0xff] }
  0x37   : > { %431 = vst.msk [vmem:[#allocation2 + $0xa9] sm:$0xff] %vm340_vm0, %v398_v19  ;;  %432 = vst.msk [vmem:[#allocation2 + $0xb1] sm:$0xff] %vm340_vm0, %v399_v20 }
  0x38   : > { %433 = vst.msk [vmem:[#allocation2 + $0xc1] sm:$0xff] %vm340_vm0, %v400_v21  ;;  %434 = vst.msk [vmem:[#allocation2 + $0xc9] sm:$0xff] %vm340_vm0, %v401_v22  ;;  %v517_v25 = vld [vmem:[#allocation2 + $0x1a] sm:$0xff]  ;;  %v518_v26 = vld [vmem:[#allocation2 + $0x22] sm:$0xff] }
  0x39   : > { %v485_v27 = vld [vmem:[#allocation2 + $0x19] sm:$0xff]  ;;  %435 = vst.msk [vmem:[#allocation2 + $0xd9] sm:$0xff] %vm340_vm0, %v402_v23  ;;  %436 = vst.msk [vmem:[#allocation2 + $0xe1] sm:$0xff] %vm340_vm0, %v403_v24  ;;  %v5278_v28 = vpack.i.bf16 %v518_v26, %v517_v25  ;;  %v486_v29 = vld [vmem:[#allocation2 + $0x21] sm:$0xff] }
  0x3a   : > { %v6582_v30 = vld [vmem:[#allocation2 + $0x30] sm:$0xff]  ;;  %v6584_v31 = vld [vmem:[#allocation2 + $0x18] sm:$0xff]  ;;  %v5273_v32 = vpack.i.bf16 %v486_v29, %v485_v27  ;;  %v6588_v34 = vld [vmem:[#allocation2 + $0x20] sm:$0xff]  ;;  %437 = vst.msk [vmem:[#allocation2 + $0xf1] sm:$0xff] %vm340_vm0, %v404_v48 }
  0x3b   : > { %v6586_v33 = vld [vmem:[#allocation2 + $0x38] sm:$0xff]  ;;  %5279 = vrot.lane.b32.xlu1 %v5278_v28, %s6322_s12  ;;  %v5283_v36 = vpack.i.bf16 %v6588_v34, %v6584_v31  ;;  %v6600_v43 = vld [vmem:[#allocation2 + $0x48] sm:$0xff]  ;;  %v6602_v44 = vld [vmem:[#allocation2 + $0x50] sm:$0xff]  ;;  %438 = vst.msk [vmem:[#allocation2 + $0xf9] sm:$0xff] %vm340_vm0, %v405_v49 }
  0x3c   : > { %v5288_v35 = vpack.i.bf16 %v6586_v33, %v6582_v30  ;;  %5274 = vrot.lane.b32.xlu0 %v5273_v32, %s6321_s11  ;;  %v581_v37 = vld [vmem:[#allocation2 + $0x31] sm:$0xff]  ;;  %v582_v38 = vld [vmem:[#allocation2 + $0x39] sm:$0xff]  ;;  %v5318_v45 = vpack.i.bf16 %v6602_v44, %v6600_v43  ;;  %v678_v46 = vld [vmem:[#allocation2 + $0x49] sm:$0xff]  ;;  %439 = vst.msk [vmem:[#allocation2 + $0x109] sm:$0xff] %vm340_vm0, %v406_v53 }
  0x3d   : > { %v5298_v39 = vpack.i.bf16 %v582_v38, %v581_v37  ;;  %v613_v40 = vld [vmem:[#allocation2 + $0x32] sm:$0xff]  ;;  %v614_v41 = vld [vmem:[#allocation2 + $0x3a] sm:$0xff]  ;;  %440 = vst.msk [vmem:[#allocation2 + $0x111] sm:$0xff] %vm340_vm0, %v407_v55  ;;  %v710_v56 = vld [vmem:[#allocation2 + $0x4a] sm:$0xff] }
  0x3e   : > { %v5308_v42 = vpack.i.bf16 %v614_v41, %v613_v40  ;;  %v679_v47 = vld [vmem:[#allocation2 + $0x51] sm:$0xff]  ;;  %v553_v60 = vld [vmem:[#allocation2 + $0x60] sm:$0xff]  ;;  %v554_v61 = vld [vmem:[#allocation2 + $0x68] sm:$0xff]  ;;  %441 = vst.msk [vmem:[#allocation2 + $0x121] sm:$0xff] %vm340_vm0, %v408_v62 }
  0x3f   : > { %5289 = vrot.lane.b32.xlu1 %v5288_v35, %s6323_s13  ;;  %v5328_v51 = vpack.i.bf16 %v679_v47, %v678_v46  ;;  %v711_v57 = vld [vmem:[#allocation2 + $0x52] sm:$0xff]  ;;  %442 = vst.msk [vmem:[#allocation2 + $0x129] sm:$0xff] %vm340_vm0, %v409_v63  ;;  %v585_v0 = vld [vmem:[#allocation2 + $0x61] sm:$0xff]  ;;  %v586_v1 = vld [vmem:[#allocation2 + $0x69] sm:$0xff]  ;;  %v5368_v2 = vpack.i.bf16 %v554_v61, %v553_v60 }
  0x40   : > { %5284 = vrot.lane.b32.xlu0 %v5283_v36, %s6323_s13  ;;  %v5343_v59 = vpack.i.bf16 %v711_v57, %v710_v56  ;;  %v617_v3 = vld [vmem:[#allocation2 + $0x62] sm:$0xff]  ;;  %v618_v4 = vld [vmem:[#allocation2 + $0x6a] sm:$0xff]  ;;  %v5378_v5 = vpack.i.bf16 %v586_v1, %v585_v0  ;;  %v6644_v7 = vld [vmem:[#allocation2 + $0x78] sm:$0xff]  ;;  %443 = vst.msk [vmem:[#allocation2 + $0x139] sm:$0xff] %vm340_vm0, %v410_v6 }
  0x41   : > { %v6646_v8 = vld [vmem:[#allocation2 + $0x80] sm:$0xff]  ;;  %v5388_v10 = vpack.i.bf16 %v618_v4, %v617_v3  ;;  %444 = vst.msk [vmem:[#allocation2 + $0x141] sm:$0xff] %vm340_vm0, %v411_v9  ;;  %v557_v19 = vld [vmem:[#allocation2 + $0x90] sm:$0xff]  ;;  %v558_v20 = vld [vmem:[#allocation2 + $0x98] sm:$0xff] }
  0x42   : > { %v682_v11 = vld [vmem:[#allocation2 + $0x79] sm:$0xff]  ;;  %v683_v12 = vld [vmem:[#allocation2 + $0x81] sm:$0xff]  ;;  %v5398_v13 = vpack.i.bf16 %v6646_v8, %v6644_v7  ;;  %445 = vst.msk [vmem:[#allocation2 + $0x151] sm:$0xff] %vm340_vm0, %v412_v18  ;;  %v589_v22 = vld [vmem:[#allocation2 + $0x91] sm:$0xff]  ;;  %v5448_v24 = vpack.i.bf16 %v558_v20, %v557_v19 }
  0x43   : > { %5299 = vrot.lane.b32.xlu1 %v5298_v39, %s6324_s14  ;;  %v5408_v14 = vpack.i.bf16 %v683_v12, %v682_v11  ;;  %v714_v15 = vld [vmem:[#allocation2 + $0x7a] sm:$0xff]  ;;  %v715_v16 = vld [vmem:[#allocation2 + $0x82] sm:$0xff]  ;;  %v621_v25 = vld [vmem:[#allocation2 + $0x92] sm:$0xff] }
  0x44   : > { %5294 = vrot.lane.b32.xlu0 %v5273_v32, %s6324_s14  ;;  %v5423_v17 = vpack.i.bf16 %v715_v16, %v714_v15  ;;  %v413_v21 = vld [vmem:[%s6542_s10 + $0xd8] sm:$0xff]  ;;  %v654_v29 = vld [vmem:[#allocation2 + $0xa8] sm:$0xff]  ;;  %v655_v32 = vld [vmem:[#allocation2 + $0xb0] sm:$0xff] }
  0x45   : > { %446 = vst.msk [vmem:[#allocation2 + $0x159] sm:$0xff] %vm340_vm0, %v413_v21  ;;  %v590_v23 = vld [vmem:[#allocation2 + $0x99] sm:$0xff]  ;;  %v686_v37 = vld [vmem:[#allocation2 + $0xa9] sm:$0xff]  ;;  %v687_v38 = vld [vmem:[#allocation2 + $0xb1] sm:$0xff] }
  0x46   : > { %v622_v26 = vld [vmem:[#allocation2 + $0x9a] sm:$0xff]  ;;  %v5458_v27 = vpack.i.bf16 %v590_v23, %v589_v22  ;;  %v5488_v40 = vpack.i.bf16 %v687_v38, %v686_v37  ;;  %v718_v41 = vld [vmem:[#allocation2 + $0xaa] sm:$0xff]  ;;  %v625_v54 = vld [vmem:[#allocation2 + $0xc2] sm:$0xff] }
  0x47   : > { %5309 = vrot.lane.b32.xlu1 %v5308_v42, %s6325_s15  ;;  %v5468_v36 = vpack.i.bf16 %v622_v26, %v621_v25  ;;  %v416_v46 = vld [vmem:[%s6542_s10 + $0xf0] sm:$0xff]  ;;  %v417_v47 = vld [vmem:[%s6542_s10 + $0xf8] sm:$0xff]  ;;  %v561_v48 = vld [vmem:[#allocation2 + $0xc0] sm:$0xff] }
  0x48   : > { %5304 = vrot.lane.b32.xlu0 %v5278_v28, %s6325_s15  ;;  %v414_v28 = vld [vmem:[%s6542_s10 + $0xe0] sm:$0xff]  ;;  %449 = vst.msk [vmem:[#allocation2 + $0x181] sm:$0xff] %vm340_vm0, %v416_v46  ;;  %450 = vst.msk [vmem:[#allocation2 + $0x189] sm:$0xff] %vm340_vm0, %v417_v47  ;;  %v562_v49 = vld [vmem:[#allocation2 + $0xc8] sm:$0xff] }
  0x49   : > { %447 = vst.msk [vmem:[#allocation2 + $0x169] sm:$0xff] %vm340_vm0, %v414_v28  ;;  %v5528_v50 = vpack.i.bf16 %v562_v49, %v561_v48  ;;  %v594_v52 = vld [vmem:[#allocation2 + $0xc9] sm:$0xff]  ;;  %v658_v57 = vld [vmem:[#allocation2 + $0xd8] sm:$0xff]  ;;  %v659_v58 = vld [vmem:[#allocation2 + $0xe0] sm:$0xff] }
  0x4a   : > { %v626_v55 = vld [vmem:[#allocation2 + $0xca] sm:$0xff]  ;;  %v6702_v60 = vpack.i.bf16 %v659_v58, %v658_v57  ;;  %v690_v62 = vld [vmem:[#allocation2 + $0xd9] sm:$0xff]  ;;  %v691_v63 = vld [vmem:[#allocation2 + $0xe1] sm:$0xff] }
  0x4b   : > { %5319 = vrot.lane.b32.xlu1 %v5318_v45, %s6326_s18  ;;  %v5548_v56 = vpack.i.bf16 %v626_v55, %v625_v54  ;;  %v6707_v0 = vpack.i.bf16 %v691_v63, %v690_v62  ;;  %v722_v4 = vld [vmem:[#allocation2 + $0xda] sm:$0xff]  ;;  %v565_v12 = vld [vmem:[#allocation2 + $0xf0] sm:$0xff]  ;;  %v662_v38 = vld [vmem:[#allocation2 + $0x108] sm:$0xff] }
  0x4c   : > { %5314 = vrot.lane.b32.xlu0 %v5288_v35, %s6326_s18  ;;  %v415_v35 = vld [vmem:[%s6542_s10 + $0xe8] sm:$0xff]  ;;  %v451_v18 = vld [vmem:[#allocation2] sm:$0xff]  ;;  %v597_v25 = vld [vmem:[#allocation2 + $0xf1] sm:$0xff] }
  0x4d   : > { %448 = vst.msk [vmem:[#allocation2 + $0x171] sm:$0xff] %vm340_vm0, %v415_v35  ;;  %v598_v26 = vld [vmem:[#allocation2 + $0xf9] sm:$0xff] }
  0x4e   : > { %v630_v37 = vld [vmem:[#allocation2 + $0xfa] sm:$0xff]  ;;  %v6758_v49 = vpack.i.bf16 %v598_v26, %v597_v25  ;;  %v695_v25 = vld [vmem:[#allocation2 + $0x111] sm:$0xff] }
  0x4f   : > { %5329 = vrot.lane.b32.xlu1 %v5328_v51, %s6327_s23 }
  0x50   : > { %5324 = vrot.lane.b32.xlu0 %v5298_v39, %s6327_s23 }
  0x53   : > { %5339 = vrot.lane.b32.xlu1 %v5298_v39, %s6321_s11  ;;  %v5478_v39 = vpack.i.bf16 %v655_v32, %v654_v29 }
  0x54   : > { %5334 = vrot.lane.b32.xlu0 %v5308_v42, %s6328_s24 }
  0x57   : > { %5349 = vrot.lane.b32.xlu1 %v5328_v51, %s6321_s11 }
  0x58   : > { %5344 = vrot.lane.b32.xlu0 %v5343_v59, %s6328_s24 }
  0x5b   : > { %5359 = vrot.lane.b32.xlu1 %v5343_v59, %s6322_s12 }
  0x5c   : > { %5354 = vrot.lane.b32.xlu0 %v5308_v42, %s6322_s12  ;;  %v719_v42 = vld [vmem:[#allocation2 + $0xb2] sm:$0xff] }
  0x5f   : > { %5369 = vrot.lane.b32.xlu1 %v5368_v2, %s6323_s13 }
  0x60   : > { %5364 = vrot.lane.b32.xlu0 %v5318_v45, %s6323_s13  ;;  %v5503_v45 = vpack.i.bf16 %v719_v42, %v718_v41 }
  0x63   : > { %5379 = vrot.lane.b32.xlu1 %v5378_v5, %s6324_s14 }
  0x64   : > { %5374 = vrot.lane.b32.xlu0 %v5328_v51, %s6324_s14  ;;  %v593_v51 = vld [vmem:[#allocation2 + $0xc1] sm:$0xff] }
  0x65   : > { %v5538_v53 = vpack.i.bf16 %v594_v52, %v593_v51 }
  0x67   : > { %5389 = vrot.lane.b32.xlu1 %v5388_v10, %s6325_s15 }
  0x68   : > { %5384 = vrot.lane.b32.xlu0 %v5343_v59, %s6325_s15 }
  0x6b   : > { %5399 = vrot.lane.b32.xlu1 %v5398_v13, %s6326_s18 }
  0x6c   : > { %5394 = vrot.lane.b32.xlu0 %v5368_v2, %s6326_s18 }
  0x6f   : > { %5409 = vrot.lane.b32.xlu1 %v5408_v14, %s6327_s23 }
  0x70   : > { %5404 = vrot.lane.b32.xlu0 %v5378_v5, %s6327_s23 }
  0x73   : > { %5419 = vrot.lane.b32.xlu1 %v5378_v5, %s6321_s11  ;;  %v723_v5 = vld [vmem:[#allocation2 + $0xe2] sm:$0xff] }
  0x74   : > { %5414 = vrot.lane.b32.xlu0 %v5388_v10, %s6328_s24  ;;  %v6721_v9 = vpack.i.bf16 %v723_v5, %v722_v4 }
  0x77   : > { %5429 = vrot.lane.b32.xlu1 %v5408_v14, %s6321_s11 }
  0x78   : > { %5424 = vrot.lane.b32.xlu0 %v5423_v17, %s6328_s24 }
  0x7b   : > { %5439 = vrot.lane.b32.xlu1 %v5423_v17, %s6322_s12 }
  0x7c   : > { %5434 = vrot.lane.b32.xlu0 %v5388_v10, %s6322_s12 }
  0x7f   : > { %5449 = vrot.lane.b32.xlu1 %v5448_v24, %s6323_s13 }
  0x80   : > { %5444 = vrot.lane.b32.xlu0 %v5398_v13, %s6323_s13  ;;  %v566_v13 = vld [vmem:[#allocation2 + $0xf8] sm:$0xff] }
  0x81   : > { %v6737_v22 = vpack.i.bf16 %v566_v13, %v565_v12 }
  0x83   : > { %5459 = vrot.lane.b32.xlu1 %v5458_v27, %s6324_s14 }
  0x84   : > { %5454 = vrot.lane.b32.xlu0 %v5408_v14, %s6324_s14  ;;  %v5265_v61 = vpop.permute.xlu0 %5264 }
  0x85   : > { %v5267_v14 = vunpack.i.h.bf16 %v5265_v61  ;;  %v5266_v15 = vunpack.i.l.bf16 %v5265_v61 }
  0x87   : > { %5469 = vrot.lane.b32.xlu1 %v5468_v36, %s6325_s15  ;;  %v1764_v29 = vsel %vm340_vm0, %v451_v18, %v5266_v15 }
  0x88   : > { %5464 = vrot.lane.b32.xlu0 %v5423_v17, %s6325_s15  ;;  %v452_v17 = vld [vmem:[#allocation2 + $0x8] sm:$0xff] }
  0x89   : > { %v1765_v28 = vsel %vm340_vm0, %v452_v17, %v5267_v14 }
  0x8b   : > { %5479 = vrot.lane.b32.xlu1 %v5478_v39, %s6326_s18 }
  0x8c   : > { %5474 = vrot.lane.b32.xlu0 %v5448_v24, %s6326_s18 }
  0x8f   : > { %5489 = vrot.lane.b32.xlu1 %v5488_v40, %s6327_s23 }
  0x90   : > { %5484 = vrot.lane.b32.xlu0 %v5458_v27, %s6327_s23 }
  0x93   : > { %5499 = vrot.lane.b32.xlu1 %v5458_v27, %s6321_s11  ;;  %v629_v27 = vld [vmem:[#allocation2 + $0xf2] sm:$0xff] }
  0x94   : > { %5494 = vrot.lane.b32.xlu0 %v5468_v36, %s6328_s24 }
  0x97   : > { %5509 = vrot.lane.b32.xlu1 %v5488_v40, %s6321_s11 }
  0x98   : > { %5504 = vrot.lane.b32.xlu0 %v5503_v45, %s6328_s24 }
  0x9b   : > { %5519 = vrot.lane.b32.xlu1 %v5503_v45, %s6322_s12 }
  0x9c   : > { %5514 = vrot.lane.b32.xlu0 %v5468_v36, %s6322_s12 }
  0x9f   : > { %5529 = vrot.lane.b32.xlu1 %v5528_v50, %s6323_s13 }
  0xa0   : > { %5524 = vrot.lane.b32.xlu0 %v5478_v39, %s6323_s13  ;;  %v663_v39 = vld [vmem:[#allocation2 + $0x110] sm:$0xff] }
  0xa1   : > { %v6766_v51 = vpack.i.bf16 %v663_v39, %v662_v38 }
  0xa3   : > { %5539 = vrot.lane.b32.xlu1 %v5538_v53, %s6324_s14 }
  0xa4   : > { %5534 = vrot.lane.b32.xlu0 %v5488_v40, %s6324_s14 }
  0xa7   : > { %5549 = vrot.lane.b32.xlu1 %v5548_v56, %s6325_s15 }
  0xa8   : > { %v6700_v59 = vpop.permute.xlu1 %5269  ;;  %5544 = vrot.lane.b32.xlu0 %v5503_v45, %s6325_s15 }
  0xa9   : > { %v5272_v23 = vunpack.i.h.bf16 %v6700_v59  ;;  %v5271_v24 = vunpack.i.l.bf16 %v6700_v59 }
  0xab   : > { %5559 = vrot.lane.b32.xlu1 %v6702_v60, %s6326_s18 }
  0xac   : > { %5554 = vrot.lane.b32.xlu0 %v5528_v50, %s6326_s18  ;;  %v1798_v50 = vsel %vm1796_vm4, %v1765_v28, %v5272_v23 }
  0xad   : > { %v6710_v1 = vpop.permute.xlu1 %5279 }
  0xae   : > { %v5275_v2 = vpop.permute.xlu0 %5274  ;;  %v5282_v32 = vunpack.i.h.bf16 %v6710_v1  ;;  %v5281_v35 = vunpack.i.l.bf16 %v6710_v1 }
  0xaf   : > { %5569 = vrot.lane.b32.xlu1 %v6707_v0, %s6327_s23  ;;  %v5277_v19 = vunpack.i.h.bf16 %v5275_v2  ;;  %v5276_v20 = vunpack.i.l.bf16 %v5275_v2 }
  0xb0   : > { %5564 = vrot.lane.b32.xlu0 %v5538_v53, %s6327_s23 }
  0xb1   : > { %v6715_v3 = vpop.permute.xlu1 %5289  ;;  %v1766_v40 = vsel %vm340_vm0, %v6584_v31, %v5276_v20  ;;  %v1767_v41 = vsel %vm340_vm0, %v6588_v34, %v5277_v19  ;;  %v1797_v31 = vsel %vm1796_vm4, %v1764_v29, %v5271_v24  ;;  %v6764_v34 = vpack.i.bf16 %v630_v37, %v629_v27  ;;  %v694_v24 = vld [vmem:[#allocation2 + $0x109] sm:$0xff] }
  0xb2   : > { %v6717_v6 = vpop.permute.xlu0 %5284  ;;  %v5292_v42 = vunpack.i.h.bf16 %v6715_v3  ;;  %v5291_v45 = vunpack.i.l.bf16 %v6715_v3  ;;  %v1799_v52 = vsel %vm1796_vm4, %v1766_v40, %v5281_v35 }
  0xb3   : > { %5579 = vrot.lane.b32.xlu1 %v5538_v53, %s6321_s11  ;;  %v5287_v47 = vunpack.i.h.bf16 %v6717_v6  ;;  %v5286_v48 = vunpack.i.l.bf16 %v6717_v6  ;;  %v1800_v53 = vsel %vm1796_vm4, %v1767_v41, %v5282_v32 }
  0xb4   : > { %5574 = vrot.lane.b32.xlu0 %v5548_v56, %s6328_s24  ;;  %v1832_v57 = vsel %vm1829_vm5, %v1799_v52, %v5291_v45  ;;  %v1833_v58 = vsel %vm1829_vm5, %v1800_v53, %v5292_v42  ;;  %v6810_v42 = vpack.i.bf16 %v695_v25, %v694_v24 }
  0xb5   : > { %v6723_v10 = vpop.permute.xlu1 %5299  ;;  %v1831_v62 = vsel %vm1829_vm5, %v1798_v50, %v5287_v47  ;;  %v1830_v63 = vsel %vm1829_vm5, %v1797_v31, %v5286_v48 }
  0xb6   : > { %v6725_v11 = vpop.permute.xlu0 %5294  ;;  %v5302_v3 = vunpack.i.h.bf16 %v6723_v10  ;;  %v5301_v4 = vunpack.i.l.bf16 %v6723_v10 }
  0xb7   : > { %5589 = vrot.lane.b32.xlu1 %v6707_v0, %s6321_s11  ;;  %v5297_v54 = vunpack.i.h.bf16 %v6725_v11  ;;  %v5296_v55 = vunpack.i.l.bf16 %v6725_v11 }
  0xb8   : > { %5584 = vrot.lane.b32.xlu0 %v6721_v9, %s6328_s24  ;;  %v1865_v32 = vsel %vm1862_vm6, %v1832_v57, %v5301_v4  ;;  %v1866_v35 = vsel %vm1862_vm6, %v1833_v58, %v5302_v3  ;;  %v726_v58 = vld [vmem:[#allocation2 + $0x10a] sm:$0xff]  ;;  %v601_v3 = vld [vmem:[#allocation2 + $0x121] sm:$0xff] }
  0xb9   : > { %v6731_v16 = vpop.permute.xlu1 %5309  ;;  %v1863_v11 = vsel %vm1862_vm6, %v1830_v63, %v5296_v55  ;;  %v1864_v12 = vsel %vm1862_vm6, %v1831_v62, %v5297_v54  ;;  %v569_v63 = vld [vmem:[#allocation2 + $0x120] sm:$0xff]  ;;  %v602_v4 = vld [vmem:[#allocation2 + $0x129] sm:$0xff] }
  0xba   : > { %v6733_v21 = vpop.permute.xlu0 %5304  ;;  %v5312_v13 = vunpack.i.h.bf16 %v6731_v16  ;;  %v5311_v14 = vunpack.i.l.bf16 %v6731_v16 }
  0xbb   : > { %5599 = vrot.lane.b32.xlu1 %v6721_v9, %s6322_s12  ;;  %v5307_v59 = vunpack.i.h.bf16 %v6733_v21 }
  0xbc   : > { %5594 = vrot.lane.b32.xlu0 %v5548_v56, %s6322_s12  ;;  %v1898_v39 = vsel %vm1895_vm7, %v1865_v32, %v5311_v14  ;;  %v1899_v40 = vsel %vm1895_vm7, %v1866_v35, %v5312_v13  ;;  %v634_v13 = vld [vmem:[#allocation2 + $0x12a] sm:$0xff]  ;;  %v666_v14 = vld [vmem:[#allocation2 + $0x138] sm:$0xff] }
  0xbd   : > { %v6746_v36 = vpop.permute.xlu1 %5319  ;;  %v1897_v18 = vsel %vm1895_vm7, %v1864_v12, %v5307_v59 }
  0xbe   : > { %v5315_v46 = vpop.permute.xlu0 %5314  ;;  %v5322_v10 = vunpack.i.h.bf16 %v6746_v36  ;;  %v5321_v19 = vunpack.i.l.bf16 %v6746_v36 }
  0xbf   : > { %5609 = vrot.lane.b32.xlu1 %v6737_v22, %s6323_s13  ;;  %v5317_v1 = vunpack.i.h.bf16 %v5315_v46  ;;  %v5316_v2 = vunpack.i.l.bf16 %v5315_v46 }
  0xc0   : > { %5604 = vrot.lane.b32.xlu0 %v6702_v60, %s6323_s13  ;;  %v5306_v60 = vunpack.i.l.bf16 %v6733_v21  ;;  %v1931_v45 = vsel %vm1928_vm8, %v1898_v39, %v5321_v19  ;;  %v1932_v46 = vsel %vm1928_vm8, %v1899_v40, %v5322_v10 }
  0xc1   : > { %v5330_v56 = vpop.permute.xlu1 %5329  ;;  %v1930_v16 = vsel %vm1928_vm8, %v1897_v18, %v5317_v1  ;;  %v570_v1 = vld [vmem:[#allocation2 + $0x128] sm:$0xff] }
  0xc2   : > { %v5325_v61 = vpop.permute.xlu0 %5324  ;;  %v1896_v17 = vsel %vm1895_vm7, %v1863_v11, %v5306_v60  ;;  %v5332_v26 = vunpack.i.h.bf16 %v5330_v56  ;;  %v5331_v27 = vunpack.i.l.bf16 %v5330_v56  ;;  %v6850_v12 = vpack.i.bf16 %v570_v1, %v569_v63 }
  0xc3   : > { %5619 = vrot.lane.b32.xlu1 %v6758_v49, %s6324_s14  ;;  %v5327_v5 = vunpack.i.h.bf16 %v5325_v61  ;;  %v5326_v6 = vunpack.i.l.bf16 %v5325_v61  ;;  %v1929_v23 = vsel %vm1928_vm8, %v1896_v17, %v5316_v2  ;;  %v667_v17 = vld [vmem:[#allocation2 + $0x140] sm:$0xff] }
  0xc4   : > { %5614 = vrot.lane.b32.xlu0 %v6707_v0, %s6324_s14  ;;  %v1964_v31 = vsel %vm1961_vm9, %v1931_v45, %v5331_v27  ;;  %v1965_v50 = vsel %vm1961_vm9, %v1932_v46, %v5332_v26 }
  0xc5   : > { %v6788_v15 = vpop.permute.xlu1 %5339  ;;  %v1962_v28 = vsel %vm1961_vm9, %v1929_v23, %v5326_v6  ;;  %v1963_v29 = vsel %vm1961_vm9, %v1930_v16, %v5327_v5  ;;  %v633_v5 = vld [vmem:[#allocation2 + $0x122] sm:$0xff]  ;;  %v6858_v16 = vpack.i.bf16 %v602_v4, %v601_v3 }
  0xc6   : > { %v5335_v20 = vpop.permute.xlu0 %5334  ;;  %v5342_v18 = vunpack.i.h.bf16 %v6788_v15  ;;  %v5341_v10 = vunpack.i.l.bf16 %v6788_v15  ;;  %v6860_v27 = vpack.i.bf16 %v634_v13, %v633_v5  ;;  %v699_v5 = vld [vmem:[#allocation2 + $0x141] sm:$0xff] }
  0xc7   : > { %v5337_v0 = vunpack.i.h.bf16 %v5335_v20  ;;  %v5336_v21 = vunpack.i.l.bf16 %v5335_v20  ;;  %5629 = vrot.lane.b32.xlu1 %v6764_v34, %s6325_s15 }
  0xc8   : > { %5624 = vrot.lane.b32.xlu0 %v6721_v9, %s6325_s15  ;;  %v1769_v35 = vsel %vm340_vm0, %v6586_v33, %v5342_v18 }
  0xc9   : > { %v6804_v36 = vpop.permute.xlu1 %5349  ;;  %v1995_v37 = vsel %vm1994_vm10, %v1962_v28, %v5336_v21  ;;  %v1996_v38 = vsel %vm1994_vm10, %v1963_v29, %v5337_v0  ;;  %v6862_v28 = vpack.i.bf16 %v667_v17, %v666_v14 }
  0xca   : > { %v5345_v41 = vpop.permute.xlu0 %5344  ;;  %v2027_v9 = vpack.c.bf16 %v1996_v38, %v1995_v37  ;;  %v5352_v6 = vunpack.i.h.bf16 %v6804_v36  ;;  %v5351_v11 = vunpack.i.l.bf16 %v6804_v36  ;;  %v1768_v36 = vsel %vm340_vm0, %v6582_v30, %v5341_v10 }
  0xcb   : > { %v5347_v47 = vunpack.i.h.bf16 %v5345_v41  ;;  %v5346_v48 = vunpack.i.l.bf16 %v5345_v41  ;;  %5639 = vrot.lane.b32.xlu1 %v6766_v51, %s6326_s18 }
  0xcc   : > { %5634 = vrot.lane.b32.xlu0 %v6737_v22, %s6326_s18  ;;  %5159 = vmatprep.mubr.msk.bf16.mxu0 %vm2063_vm11, %v2027_v9  ;;  %v727_v22 = vld [vmem:[#allocation2 + $0x112] sm:$0xff]  ;;  %v1771_v15 = vsel %vm340_vm0, %v6602_v44, %v5352_v6  ;;  %v1770_v29 = vsel %vm340_vm0, %v6600_v43, %v5351_v11 }
  0xcd   : > { %v1997_v52 = vsel %vm1994_vm10, %v1964_v31, %v5346_v48  ;;  %v1998_v53 = vsel %vm1994_vm10, %v1965_v50, %v5347_v47  ;;  %v5360_v54 = vpop.permute.xlu1 %5359  ;;  %v6832_v60 = vpack.i.bf16 %v727_v22, %v726_v58 }
  0xce   : > { %v5355_v55 = vpop.permute.xlu0 %5354  ;;  %v2028_v56 = vpack.c.bf16 %v1998_v53, %v1997_v52  ;;  %v5362_v19 = vunpack.i.h.bf16 %v5360_v54  ;;  %v5361_v20 = vunpack.i.l.bf16 %v5360_v54 }
  0xcf   : > { %5649 = vrot.lane.b32.xlu1 %v6810_v42, %s6327_s23  ;;  %v5357_v0 = vunpack.i.h.bf16 %v5355_v55  ;;  %v5356_v21 = vunpack.i.l.bf16 %v5355_v55 }
  0xd0   : > { %5644 = vrot.lane.b32.xlu0 %v6758_v49, %s6327_s23  ;;  %5160 = vmatmul.mubr.msk.bf16.vlgmr.msra.gmra.mrb[0].mxu0 %vm2063_vm11, %v2028_v56  ;;  %v1803_v37 = vsel %vm1796_vm4, %v1770_v29, %v5361_v20  ;;  %v1804_v38 = vsel %vm1796_vm4, %v1771_v15, %v5362_v19 }
  0xd1   : > { %v5370_v57 = vpop.permute.xlu1 %5369  ;;  %v1802_v43 = vsel %vm1796_vm4, %v1769_v35, %v5357_v0  ;;  %v1801_v44 = vsel %vm1796_vm4, %v1768_v36, %v5356_v21 }
  0xd2   : > { %v5365_v59 = vpop.permute.xlu0 %5364  ;;  %v5372_v24 = vunpack.i.h.bf16 %v5370_v57  ;;  %v5371_v25 = vunpack.i.l.bf16 %v5370_v57 }
  0xd3   : > { %5659 = vrot.lane.b32.xlu1 %v6758_v49, %s6321_s11  ;;  %v5366_v32 = vunpack.i.l.bf16 %v5365_v59 }
  0xd4   : > { %5654 = vrot.lane.b32.xlu0 %v6764_v34, %s6328_s24  ;;  %v1836_v33 = vsel %vm1829_vm5, %v1803_v37, %v5371_v25  ;;  %v1837_v30 = vsel %vm1829_vm5, %v1804_v38, %v5372_v24 }
  0xd5   : > { %v6834_v61 = vpop.permute.xlu1 %5379 }
  0xd6   : > { %v6836_v62 = vpop.permute.xlu0 %5374  ;;  %v5382_v50 = vunpack.i.h.bf16 %v6834_v61  ;;  %v5381_v52 = vunpack.i.l.bf16 %v6834_v61 }
  0xd7   : > { %5669 = vrot.lane.b32.xlu1 %v6810_v42, %s6321_s11  ;;  %v5377_v39 = vunpack.i.h.bf16 %v6836_v62  ;;  %v5376_v40 = vunpack.i.l.bf16 %v6836_v62 }
  0xd8   : > { %5664 = vrot.lane.b32.xlu0 %v6832_v60, %s6328_s24  ;;  %v1869_v17 = vsel %vm1862_vm6, %v1836_v33, %v5381_v52  ;;  %v1870_v18 = vsel %vm1862_vm6, %v1837_v30, %v5382_v50 }
  0xd9   : > { %v6842_v2 = vpop.permute.xlu1 %5389 }
  0xda   : > { %v6844_v49 = vpop.permute.xlu0 %5384  ;;  %v5392_v57 = vunpack.i.h.bf16 %v6842_v2  ;;  %v5391_v58 = vunpack.i.l.bf16 %v6842_v2  ;;  %v698_v2 = vld [vmem:[#allocation2 + $0x139] sm:$0xff] }
  0xdb   : > { %5679 = vrot.lane.b32.xlu1 %v6832_v60, %s6322_s12  ;;  %v5387_v9 = vunpack.i.h.bf16 %v6844_v49  ;;  %v5386_v45 = vunpack.i.l.bf16 %v6844_v49  ;;  %v6920_v25 = vpack.i.bf16 %v699_v5, %v698_v2 }
  0xdc   : > { %5674 = vrot.lane.b32.xlu0 %v6764_v34, %s6322_s12  ;;  %v5367_v34 = vunpack.i.h.bf16 %v5365_v59  ;;  %v1902_v0 = vsel %vm1895_vm7, %v1869_v17, %v5391_v58  ;;  %v1903_v21 = vsel %vm1895_vm7, %v1870_v18, %v5392_v57 }
  0xdd   : > { %v6856_v23 = vpop.permute.xlu1 %5399 }
  0xde   : > { %v5395_v26 = vpop.permute.xlu0 %5394  ;;  %v1835_v47 = vsel %vm1829_vm5, %v1802_v43, %v5367_v34  ;;  %v5402_v61 = vunpack.i.h.bf16 %v6856_v23  ;;  %v5401_v63 = vunpack.i.l.bf16 %v6856_v23 }
  0xdf   : > { %5689 = vrot.lane.b32.xlu1 %v6850_v12, %s6323_s13  ;;  %v5397_v48 = vunpack.i.h.bf16 %v5395_v26  ;;  %v5396_v31 = vunpack.i.l.bf16 %v5395_v26  ;;  %v1868_v56 = vsel %vm1862_vm6, %v1835_v47, %v5377_v39  ;;  %v730_v39 = vld [vmem:[#allocation2 + $0x13a] sm:$0xff] }
  0xe0   : > { %5684 = vrot.lane.b32.xlu0 %v6766_v51, %s6323_s13  ;;  %v1834_v51 = vsel %vm1829_vm5, %v1801_v44, %v5366_v32  ;;  %v1901_v62 = vsel %vm1895_vm7, %v1868_v56, %v5387_v9  ;;  %v1936_v26 = vsel %vm1928_vm8, %v1903_v21, %v5402_v61  ;;  %v573_v9 = vld [vmem:[#allocation2 + $0x150] sm:$0xff]  ;;  %v606_v47 = vld [vmem:[#allocation2 + $0x159] sm:$0xff] }
  0xe1   : > { %v5410_v41 = vpop.permute.xlu1 %5409  ;;  %v1867_v55 = vsel %vm1862_vm6, %v1834_v51, %v5376_v40  ;;  %v1934_v49 = vsel %vm1928_vm8, %v1901_v62, %v5397_v48  ;;  %v605_v51 = vld [vmem:[#allocation2 + $0x151] sm:$0xff] }
  0xe2   : > { %v5405_v46 = vpop.permute.xlu0 %5404  ;;  %v1900_v59 = vsel %vm1895_vm7, %v1867_v55, %v5386_v45  ;;  %v5412_v6 = vunpack.i.h.bf16 %v5410_v41  ;;  %v5411_v11 = vunpack.i.l.bf16 %v5410_v41  ;;  %v574_v45 = vld [vmem:[#allocation2 + $0x158] sm:$0xff]  ;;  %v671_v55 = vld [vmem:[#allocation2 + $0x170] sm:$0xff] }
  0xe3   : > { %5699 = vrot.lane.b32.xlu1 %v6858_v16, %s6324_s14  ;;  %v5407_v53 = vunpack.i.h.bf16 %v5405_v46  ;;  %v5406_v54 = vunpack.i.l.bf16 %v5405_v46  ;;  %v637_v48 = vld [vmem:[#allocation2 + $0x152] sm:$0xff]  ;;  %v6960_v52 = vpack.i.bf16 %v574_v45, %v573_v9 }
  0xe4   : > { %5694 = vrot.lane.b32.xlu0 %v6810_v42, %s6324_s14  ;;  %v1933_v42 = vsel %vm1928_vm8, %v1900_v59, %v5396_v31  ;;  %v1969_v32 = vsel %vm1961_vm9, %v1936_v26, %v5412_v6 }
  0xe5   : > { %v6898_v22 = vpop.permute.xlu1 %5419  ;;  %v1966_v13 = vsel %vm1961_vm9, %v1933_v42, %v5406_v54  ;;  %v1967_v14 = vsel %vm1961_vm9, %v1934_v49, %v5407_v53  ;;  %v638_v53 = vld [vmem:[#allocation2 + $0x15a] sm:$0xff]  ;;  %v670_v54 = vld [vmem:[#allocation2 + $0x168] sm:$0xff] }
  0xe6   : > { %v5415_v1 = vpop.permute.xlu0 %5414  ;;  %v5422_v56 = vunpack.i.h.bf16 %v6898_v22  ;;  %v5421_v57 = vunpack.i.l.bf16 %v6898_v22  ;;  %v6972_v2 = vpack.i.bf16 %v671_v55, %v670_v54 }
  0xe7   : > { %v5417_v3 = vunpack.i.h.bf16 %v5415_v1  ;;  %v5416_v4 = vunpack.i.l.bf16 %v5415_v1  ;;  %5709 = vrot.lane.b32.xlu1 %v6860_v27, %s6325_s15  ;;  %v6968_v1 = vpack.i.bf16 %v606_v47, %v605_v51 }
  0xe8   : > { %5704 = vrot.lane.b32.xlu0 %v6832_v60, %s6325_s15  ;;  %v1935_v60 = vsel %vm1928_vm8, %v1902_v0, %v5401_v63 }
  0xe9   : > { %v1999_v10 = vsel %vm1994_vm10, %v1966_v13, %v5416_v4  ;;  %v2000_v19 = vsel %vm1994_vm10, %v1967_v14, %v5417_v3  ;;  %v6916_v20 = vpop.permute.xlu1 %5429  ;;  %v1968_v34 = vsel %vm1961_vm9, %v1935_v60, %v5411_v11  ;;  %v6970_v4 = vpack.i.bf16 %v638_v53, %v637_v48  ;;  %v6304_v11 = vld [vmem:[#allocation2 + $0x68] sm:$0xff]  ;;  %v6305_v14 = vld [vmem:[#allocation2 + $0x60] sm:$0xff]  ;;  %v703_v48 = vld [vmem:[#allocation2 + $0x171] sm:$0xff] }
  0xea   : > { %v5425_v23 = vpop.permute.xlu0 %5424  ;;  %v2029_v24 = vpack.c.bf16 %v2000_v19, %v1999_v10  ;;  %v5432_v31 = vunpack.i.h.bf16 %v6916_v20  ;;  %v5431_v50 = vunpack.i.l.bf16 %v6916_v20  ;;  %v1773_v13 = vsel %vm340_vm0, %v6304_v11, %v5422_v56 }
  0xeb   : > { %v5427_v15 = vunpack.i.h.bf16 %v5425_v23  ;;  %v5426_v29 = vunpack.i.l.bf16 %v5425_v23  ;;  %5719 = vrot.lane.b32.xlu1 %v6862_v28, %s6326_s18  ;;  %v1772_v17 = vsel %vm340_vm0, %v6305_v14, %v5421_v57 }
  0xec   : > { %5714 = vrot.lane.b32.xlu0 %v6850_v12, %s6326_s18  ;;  %5163 = vmatprep.mubr.msk.bf16.mxu0 %vm2063_vm11, %v2029_v24  ;;  %v731_v12 = vld [vmem:[#allocation2 + $0x142] sm:$0xff]  ;;  %v1775_v22 = vsel %vm340_vm0, %v6646_v8, %v5432_v31  ;;  %v1774_v5 = vsel %vm340_vm0, %v6644_v7, %v5431_v50 }
  0xed   : > { %v2002_v35 = vsel %vm1994_vm10, %v1969_v32, %v5427_v15  ;;  %v2001_v36 = vsel %vm1994_vm10, %v1968_v34, %v5426_v29  ;;  %v5440_v37 = vpop.permute.xlu1 %5439  ;;  %v6942_v41 = vpack.i.bf16 %v731_v12, %v730_v39 }
  0xee   : > { %v5435_v38 = vpop.permute.xlu0 %5434  ;;  %v2030_v43 = vpack.c.bf16 %v2002_v35, %v2001_v36  ;;  %v5442_v58 = vunpack.i.h.bf16 %v5440_v37  ;;  %v5441_v59 = vunpack.i.l.bf16 %v5440_v37 }
  0xef   : > { %5729 = vrot.lane.b32.xlu1 %v6920_v25, %s6327_s23  ;;  %v5437_v62 = vunpack.i.h.bf16 %v5435_v38  ;;  %v5436_v61 = vunpack.i.l.bf16 %v5435_v38 }
  0xf0   : > { %5724 = vrot.lane.b32.xlu0 %v6858_v16, %s6327_s23  ;;  %5164 = vmatmul.mubr.msk.bf16.gmra.mrb[4].mxu0 %vm2063_vm11, %v2030_v43  ;;  %v1807_v18 = vsel %vm1796_vm4, %v1774_v5, %v5441_v59  ;;  %v1808_v10 = vsel %vm1796_vm4, %v1775_v22, %v5442_v58 }
  0xf1   : > { %v5450_v44 = vpop.permute.xlu1 %5449  ;;  %v1806_v7 = vsel %vm1796_vm4, %v1773_v13, %v5437_v62  ;;  %v1805_v8 = vsel %vm1796_vm4, %v1772_v17, %v5436_v61 }
  0xf2   : > { %v5445_v40 = vpop.permute.xlu0 %5444  ;;  %v5452_v42 = vunpack.i.h.bf16 %v5450_v44  ;;  %v5451_v49 = vunpack.i.l.bf16 %v5450_v44 }
  0xf3   : > { %5739 = vrot.lane.b32.xlu1 %v6858_v16, %s6321_s11  ;;  %v5446_v6 = vunpack.i.l.bf16 %v5445_v40 }
  0xf4   : > { %5734 = vrot.lane.b32.xlu0 %v6860_v27, %s6328_s24  ;;  %v1840_v21 = vsel %vm1829_vm5, %v1807_v18, %v5451_v49  ;;  %v1841_v23 = vsel %vm1829_vm5, %v1808_v10, %v5452_v42 }
  0xf5   : > { %v6944_v33 = vpop.permute.xlu1 %5459 }
  0xf6   : > { %v6946_v30 = vpop.permute.xlu0 %5454  ;;  %v5462_v32 = vunpack.i.h.bf16 %v6944_v33  ;;  %v5461_v35 = vunpack.i.l.bf16 %v6944_v33 }
  0xf7   : > { %5749 = vrot.lane.b32.xlu1 %v6920_v25, %s6321_s11  ;;  %v5457_v19 = vunpack.i.h.bf16 %v6946_v30  ;;  %v5456_v20 = vunpack.i.l.bf16 %v6946_v30 }
  0xf8   : > { %5744 = vrot.lane.b32.xlu0 %v6942_v41, %s6328_s24  ;;  %v1873_v55 = vsel %vm1862_vm6, %v1840_v21, %v5461_v35  ;;  %v1874_v56 = vsel %vm1862_vm6, %v1841_v23, %v5462_v32  ;;  %v577_v21 = vld [vmem:[#allocation2 + $0x180] sm:$0xff]  ;;  %v578_v23 = vld [vmem:[#allocation2 + $0x188] sm:$0xff]  ;;  %v7072_v35 = vld [vmem:[#allocation2 + $0x198] sm:$0xff] }
  0xf9   : > { %v6952_v46 = vpop.permute.xlu1 %5469  ;;  %v642_v32 = vld [vmem:[#allocation2 + $0x18a] sm:$0xff] }
  0xfa   : > { %v6954_v16 = vpop.permute.xlu0 %5464  ;;  %v5472_v44 = vunpack.i.h.bf16 %v6952_v46  ;;  %v5471_v39 = vunpack.i.l.bf16 %v6952_v46  ;;  %v702_v46 = vld [vmem:[#allocation2 + $0x169] sm:$0xff] }
  0xfb   : > { %5759 = vrot.lane.b32.xlu1 %v6942_v41, %s6322_s12  ;;  %v5467_v24 = vunpack.i.h.bf16 %v6954_v16  ;;  %v5466_v60 = vunpack.i.l.bf16 %v6954_v16  ;;  %v7028_v49 = vpack.i.bf16 %v703_v48, %v702_v46 }
  0xfc   : > { %5754 = vrot.lane.b32.xlu0 %v6860_v27, %s6322_s12  ;;  %v5447_v27 = vunpack.i.h.bf16 %v5445_v40  ;;  %v1906_v62 = vsel %vm1895_vm7, %v1873_v55, %v5471_v39  ;;  %v1907_v61 = vsel %vm1895_vm7, %v1874_v56, %v5472_v44  ;;  %v466_v44 = vld [vmem:[#allocation2 + $0xb0] sm:$0xff] }
  0xfd   : > { %v6966_v63 = vpop.permute.xlu1 %5479 }
  0xfe   : > { %v5475_v3 = vpop.permute.xlu0 %5474  ;;  %v1839_v15 = vsel %vm1829_vm5, %v1806_v7, %v5447_v27  ;;  %v5482_v33 = vunpack.i.h.bf16 %v6966_v63  ;;  %v5481_v9 = vunpack.i.l.bf16 %v6966_v63  ;;  %v734_v7 = vld [vmem:[#allocation2 + $0x16a] sm:$0xff] }
  0xff   : > { %5769 = vrot.lane.b32.xlu1 %v6960_v52, %s6323_s13  ;;  %v5477_v29 = vunpack.i.h.bf16 %v5475_v3  ;;  %v5476_v34 = vunpack.i.l.bf16 %v5475_v3  ;;  %v1872_v43 = vsel %vm1862_vm6, %v1839_v15, %v5457_v19 }
 0x100   : > { %5764 = vrot.lane.b32.xlu0 %v6862_v28, %s6323_s13  ;;  %v1838_v28 = vsel %vm1829_vm5, %v1805_v8, %v5446_v6  ;;  %v1905_v30 = vsel %vm1895_vm7, %v1872_v43, %v5467_v24  ;;  %v1940_v3 = vsel %vm1928_vm8, %v1907_v61, %v5482_v33  ;;  %v465_v43 = vld [vmem:[#allocation2 + $0xa8] sm:$0xff]  ;;  %v464_v33 = vld [vmem:[#allocation2 + $0x98] sm:$0xff] }
 0x101   : > { %v5490_v0 = vpop.permute.xlu1 %5489  ;;  %v1871_v38 = vsel %vm1862_vm6, %v1838_v28, %v5456_v20  ;;  %v1938_v16 = vsel %vm1928_vm8, %v1905_v30, %v5477_v29  ;;  %v641_v28 = vld [vmem:[#allocation2 + $0x182] sm:$0xff]  ;;  %v463_v30 = vld [vmem:[#allocation2 + $0x90] sm:$0xff] }
 0x102   : > { %v5485_v26 = vpop.permute.xlu0 %5484  ;;  %v1904_v40 = vsel %vm1895_vm7, %v1871_v38, %v5466_v60  ;;  %v5492_v31 = vunpack.i.h.bf16 %v5490_v0  ;;  %v5491_v50 = vunpack.i.l.bf16 %v5490_v0  ;;  %v609_v60 = vld [vmem:[#allocation2 + $0x181] sm:$0xff]  ;;  %v7084_v48 = vpack.i.bf16 %v642_v32, %v641_v28 }
 0x103   : > { %5779 = vrot.lane.b32.xlu1 %v6968_v1, %s6324_s14  ;;  %v5487_v36 = vunpack.i.h.bf16 %v5485_v26  ;;  %v5486_v37 = vunpack.i.l.bf16 %v5485_v26  ;;  %v610_v26 = vld [vmem:[#allocation2 + $0x189] sm:$0xff] }
 0x104   : > { %5774 = vrot.lane.b32.xlu0 %v6920_v25, %s6324_s14  ;;  %v1937_v25 = vsel %vm1928_vm8, %v1904_v40, %v5476_v34  ;;  %v1973_v6 = vsel %vm1961_vm9, %v1940_v3, %v5492_v31  ;;  %v7070_v34 = vpack.i.bf16 %v578_v23, %v577_v21 }
 0x105   : > { %v7006_v12 = vpop.permute.xlu1 %5499  ;;  %v1970_v53 = vsel %vm1961_vm9, %v1937_v25, %v5486_v37  ;;  %v1971_v54 = vsel %vm1961_vm9, %v1938_v16, %v5487_v36  ;;  %v7074_v36 = vld [vmem:[#allocation2 + $0x1a0] sm:$0xff]  ;;  %v7082_v16 = vpack.i.bf16 %v610_v26, %v609_v60 }
 0x106   : > { %v5495_v45 = vpop.permute.xlu0 %5494  ;;  %v5502_v37 = vunpack.i.h.bf16 %v7006_v12  ;;  %v5501_v38 = vunpack.i.l.bf16 %v7006_v12  ;;  %v5878_v12 = vpack.i.bf16 %v7074_v36, %v7072_v35  ;;  %v3014_v36 = vld [vmem:[#allocation2 + $0x1] ss:$2 sm:$0xff] }
 0x107   : > { %v5497_v51 = vunpack.i.h.bf16 %v5495_v45  ;;  %v5496_v47 = vunpack.i.l.bf16 %v5495_v45  ;;  %5789 = vrot.lane.b32.xlu1 %v6970_v4, %s6325_s15 }
 0x108   : > { %5784 = vrot.lane.b32.xlu0 %v6942_v41, %s6325_s15  ;;  %v1939_v41 = vsel %vm1928_vm8, %v1906_v62, %v5481_v9  ;;  %v1776_v55 = vsel %vm340_vm0, %v463_v30, %v5501_v38 }
 0x109   : > { %v2003_v57 = vsel %vm1994_vm10, %v1970_v53, %v5496_v47  ;;  %v2004_v58 = vsel %vm1994_vm10, %v1971_v54, %v5497_v51  ;;  %v7024_v59 = vpop.permute.xlu1 %5509  ;;  %v1972_v27 = vsel %vm1961_vm9, %v1939_v41, %v5491_v50  ;;  %v1777_v54 = vsel %vm340_vm0, %v464_v33, %v5502_v37 }
 0x10a   : > { %v5505_v63 = vpop.permute.xlu0 %5504  ;;  %v2031_v42 = vpack.c.bf16 %v2004_v58, %v2003_v57  ;;  %v5512_v15 = vunpack.i.h.bf16 %v7024_v59  ;;  %v5511_v29 = vunpack.i.l.bf16 %v7024_v59 }
 0x10b   : > { %v5507_v22 = vunpack.i.h.bf16 %v5505_v63  ;;  %v5506_v5 = vunpack.i.l.bf16 %v5505_v63  ;;  %5799 = vrot.lane.b32.xlu1 %v6972_v2, %s6326_s18 }
 0x10c   : > { %5794 = vrot.lane.b32.xlu0 %v6960_v52, %s6326_s18  ;;  %5167 = vmatprep.mubr.msk.bf16.mxu0 %vm2063_vm11, %v2031_v42  ;;  %v735_v52 = vld [vmem:[#allocation2 + $0x172] sm:$0xff]  ;;  %v1779_v31 = vsel %vm340_vm0, %v466_v44, %v5512_v15 }
 0x10d   : > { %v2006_v11 = vsel %vm1994_vm10, %v1973_v6, %v5507_v22  ;;  %v2005_v13 = vsel %vm1994_vm10, %v1972_v27, %v5506_v5  ;;  %v5520_v14 = vpop.permute.xlu1 %5519  ;;  %v7052_v19 = vpack.i.bf16 %v735_v52, %v734_v7 }
 0x10e   : > { %v5515_v17 = vpop.permute.xlu0 %5514  ;;  %v2032_v18 = vpack.c.bf16 %v2006_v11, %v2005_v13  ;;  %v5522_v39 = vunpack.i.h.bf16 %v5520_v14  ;;  %v5521_v40 = vunpack.i.l.bf16 %v5520_v14 }
 0x10f   : > { %5809 = vrot.lane.b32.xlu1 %v7028_v49, %s6327_s23  ;;  %v5517_v9 = vunpack.i.h.bf16 %v5515_v17  ;;  %v5516_v45 = vunpack.i.l.bf16 %v5515_v17 }
 0x110   : > { %5804 = vrot.lane.b32.xlu0 %v6968_v1, %s6327_s23  ;;  %5168 = vmatmul.mubr.msk.bf16.gmra.mrb[8].mxu0 %vm2063_vm11, %v2032_v18  ;;  %v1812_v57 = vsel %vm1796_vm4, %v1779_v31, %v5522_v39 }
 0x111   : > { %v5530_v10 = vpop.permute.xlu1 %5529  ;;  %v1810_v58 = vsel %vm1796_vm4, %v1777_v54, %v5517_v9  ;;  %v1809_v59 = vsel %vm1796_vm4, %v1776_v55, %v5516_v45  ;;  %v738_v54 = vld [vmem:[#allocation2 + $0x19a] sm:$0xff]  ;;  %v739_v55 = vld [vmem:[#allocation2 + $0x1a2] sm:$0xff] }
 0x112   : > { %v7046_v8 = vpop.permute.xlu0 %5524  ;;  %v5532_v51 = vunpack.i.h.bf16 %v5530_v10  ;;  %v5531_v47 = vunpack.i.l.bf16 %v5530_v10  ;;  %v5898_v35 = vpack.i.bf16 %v739_v55, %v738_v54 }
 0x113   : > { %5819 = vrot.lane.b32.xlu1 %v6968_v1, %s6321_s11  ;;  %v5527_v50 = vunpack.i.h.bf16 %v7046_v8  ;;  %v5526_v53 = vunpack.i.l.bf16 %v7046_v8 }
 0x114   : > { %5814 = vrot.lane.b32.xlu0 %v6970_v4, %s6328_s24  ;;  %v1845_v41 = vsel %vm1829_vm5, %v1812_v57, %v5532_v51 }
 0x115   : > { %v7054_v20 = vpop.permute.xlu1 %5539  ;;  %v1843_v27 = vsel %vm1829_vm5, %v1810_v58, %v5527_v50 }
 0x116   : > { %v7056_v0 = vpop.permute.xlu0 %5534  ;;  %v5542_v13 = vunpack.i.h.bf16 %v7054_v20  ;;  %v5541_v14 = vunpack.i.l.bf16 %v7054_v20 }
 0x117   : > { %5829 = vrot.lane.b32.xlu1 %v7028_v49, %s6321_s11  ;;  %v5537_v62 = vunpack.i.h.bf16 %v7056_v0  ;;  %v5536_v61 = vunpack.i.l.bf16 %v7056_v0 }
 0x118   : > { %5824 = vrot.lane.b32.xlu0 %v7052_v19, %s6328_s24  ;;  %v1878_v39 = vsel %vm1862_vm6, %v1845_v41, %v5542_v13  ;;  %v3030_v41 = vld [vmem:[#allocation2 + $0x2] ss:$2 sm:$0xff]  ;;  %v3063_v13 = vld [vmem:[#allocation2 + $0x49] ss:$2 sm:$0xff] }
 0x119   : > { %v7062_v24 = vpop.permute.xlu1 %5549  ;;  %v1876_v7 = vsel %vm1862_vm6, %v1843_v27, %v5537_v62 }
 0x11a   : > { %v7064_v1 = vpop.permute.xlu0 %5544  ;;  %v5552_v52 = vunpack.i.h.bf16 %v7062_v24  ;;  %v5551_v8 = vunpack.i.l.bf16 %v7062_v24  ;;  %v706_v24 = vld [vmem:[#allocation2 + $0x199] sm:$0xff] }
 0x11b   : > { %5839 = vrot.lane.b32.xlu1 %v7052_v19, %s6322_s12  ;;  %v5547_v3 = vunpack.i.h.bf16 %v7064_v1  ;;  %v5546_v22 = vunpack.i.l.bf16 %v7064_v1 }
 0x11c   : > { %5834 = vrot.lane.b32.xlu0 %v6970_v4, %s6322_s12  ;;  %v1778_v4 = vsel %vm340_vm0, %v465_v43, %v5511_v29  ;;  %v707_v29 = vld [vmem:[#allocation2 + $0x1a1] sm:$0xff]  ;;  %v1911_v45 = vsel %vm1895_vm7, %v1878_v39, %v5552_v52 }
 0x11d   : > { %v7080_v25 = vpop.permute.xlu1 %5559  ;;  %v1811_v56 = vsel %vm1796_vm4, %v1778_v4, %v5521_v40  ;;  %v1909_v23 = vsel %vm1895_vm7, %v1876_v7, %v5547_v3  ;;  %v3032_v3 = vld [vmem:[#allocation2 + $0x32] ss:$2 sm:$0xff] }
 0x11e   : > { %v5555_v46 = vpop.permute.xlu0 %5554  ;;  %v1844_v42 = vsel %vm1829_vm5, %v1811_v56, %v5531_v47  ;;  %v5562_v20 = vunpack.i.h.bf16 %v7080_v25  ;;  %v5561_v1 = vunpack.i.l.bf16 %v7080_v25  ;;  %v5888_v47 = vpack.i.bf16 %v707_v29, %v706_v24  ;;  %v7179_v7 = vld [vmem:[#allocation2 + $0x30] ss:$2 sm:$0xff]  ;;  %v7181_v52 = vld [vmem:[#allocation2 + $0x60] ss:$2 sm:$0xff] }
 0x11f   : > { %5849 = vrot.lane.b32.xlu1 %v7070_v34, %s6323_s13  ;;  %v5557_v6 = vunpack.i.h.bf16 %v5555_v46  ;;  %v5556_v11 = vunpack.i.l.bf16 %v5555_v46  ;;  %v1877_v44 = vsel %vm1862_vm6, %v1844_v42, %v5541_v14  ;;  %v7173_v14 = vld [vmem:[#allocation2 + $0x1a] ss:$2 sm:$0xff] }
 0x120   : > { %5844 = vrot.lane.b32.xlu0 %v6972_v2, %s6323_s13  ;;  %v1842_v2 = vsel %vm1829_vm5, %v1809_v59, %v5526_v53  ;;  %v1910_v9 = vsel %vm1895_vm7, %v1877_v44, %v5551_v8 }
 0x121   : > { %v5570_v63 = vpop.permute.xlu1 %5569  ;;  %v1875_v10 = vsel %vm1862_vm6, %v1842_v2, %v5536_v61  ;;  %v1942_v26 = vsel %vm1928_vm8, %v1909_v23, %v5557_v6  ;;  %v1943_v46 = vsel %vm1928_vm8, %v1910_v9, %v5561_v1  ;;  %v3047_v2 = vld [vmem:[#allocation2 + $0x48] ss:$2 sm:$0xff]  ;;  %v469_v23 = vld [vmem:[#allocation2 + $0xd8] sm:$0xff] }
 0x122   : > { %v5565_v5 = vpop.permute.xlu0 %5564  ;;  %v1908_v21 = vsel %vm1895_vm7, %v1875_v10, %v5546_v22  ;;  %v5572_v32 = vunpack.i.h.bf16 %v5570_v63  ;;  %v5571_v37 = vunpack.i.l.bf16 %v5570_v63  ;;  %v7177_v10 = vld [vmem:[#allocation2 + $0x4a] ss:$2 sm:$0xff] }
 0x123   : > { %5859 = vrot.lane.b32.xlu1 %v7082_v16, %s6324_s14  ;;  %v5567_v17 = vunpack.i.h.bf16 %v5565_v5  ;;  %v5566_v18 = vunpack.i.l.bf16 %v5565_v5  ;;  %v3045_v5 = vld [vmem:[#allocation2 + $0x18] ss:$2 sm:$0xff] }
 0x124   : > { %5854 = vrot.lane.b32.xlu0 %v7028_v49, %s6324_s14  ;;  %v1941_v49 = vsel %vm1928_vm8, %v1908_v21, %v5556_v11  ;;  %v1976_v50 = vsel %vm1961_vm9, %v1943_v46, %v5571_v37  ;;  %v3061_v11 = vld [vmem:[#allocation2 + $0x19] ss:$2 sm:$0xff] }
 0x125   : > { %v7120_v0 = vpop.permute.xlu1 %5579  ;;  %v1974_v38 = vsel %vm1961_vm9, %v1941_v49, %v5566_v18  ;;  %v1975_v43 = vsel %vm1961_vm9, %v1942_v26, %v5567_v17  ;;  %v5923_v18 = vpack.i.bf16 %v3047_v2, %v3045_v5  ;;  %v467_v49 = vld [vmem:[#allocation2 + $0xc0] sm:$0xff]  ;;  %v468_v26 = vld [vmem:[#allocation2 + $0xc8] sm:$0xff]  ;;  %v5933_v29 = vpack.i.bf16 %v3063_v13, %v3061_v11 }
 0x126   : > { %v5575_v60 = vpop.permute.xlu0 %5574  ;;  %v5582_v8 = vunpack.i.h.bf16 %v7120_v0  ;;  %v5581_v21 = vunpack.i.l.bf16 %v7120_v0  ;;  %v5953_v0 = vpack.i.bf16 %v7181_v52, %v7179_v7 }
 0x127   : > { %v5577_v28 = vunpack.i.h.bf16 %v5575_v60  ;;  %v5576_v15 = vunpack.i.l.bf16 %v5575_v60  ;;  %5869 = vrot.lane.b32.xlu1 %v7084_v48, %s6325_s15 }
 0x128   : > { %5864 = vrot.lane.b32.xlu0 %v7052_v19, %s6325_s15  ;;  %v1944_v19 = vsel %vm1928_vm8, %v1911_v45, %v5562_v20  ;;  %v470_v20 = vld [vmem:[#allocation2 + $0xe0] sm:$0xff]  ;;  %v1780_v9 = vsel %vm340_vm0, %v467_v49, %v5581_v21 }
 0x129   : > { %v2007_v40 = vsel %vm1994_vm10, %v1974_v38, %v5576_v15  ;;  %v2008_v30 = vsel %vm1994_vm10, %v1975_v43, %v5577_v28  ;;  %v7138_v33 = vpop.permute.xlu1 %5589  ;;  %v1977_v53 = vsel %vm1961_vm9, %v1944_v19, %v5572_v32  ;;  %v5943_v43 = vpack.i.bf16 %v7177_v10, %v7173_v14  ;;  %v3108_v10 = vld [vmem:[#allocation2 + $0x31] ss:$2 sm:$0xff]  ;;  %v3018_v49 = vld [vmem:[#allocation2 + $0x61] ss:$2 sm:$0xff] }
 0x12a   : > { %v5585_v25 = vpop.permute.xlu0 %5584  ;;  %v2033_v51 = vpack.c.bf16 %v2008_v30, %v2007_v40  ;;  %v5591_v17 = vunpack.i.l.bf16 %v7138_v33 }
 0x12b   : > { %v5587_v31 = vunpack.i.h.bf16 %v5585_v25  ;;  %v5586_v4 = vunpack.i.l.bf16 %v5585_v25  ;;  %5879 = vrot.lane.b32.xlu1 %v5878_v12, %s6326_s18  ;;  %v3016_v12 = vld [vmem:[#allocation2 + $0x31] ss:$2 sm:$0xff] }
 0x12c   : > { %5874 = vrot.lane.b32.xlu0 %v7070_v34, %s6326_s18  ;;  %5171 = vmatprep.mubr.msk.bf16.mxu0 %vm2063_vm11, %v2033_v51  ;;  %v5903_v63 = vpack.i.bf16 %v3016_v12, %v3014_v36  ;;  %v1782_v39 = vsel %vm340_vm0, %v469_v23, %v5591_v17 }
 0x12d   : > { %v2010_v56 = vsel %vm1994_vm10, %v1977_v53, %v5587_v31  ;;  %v2009_v57 = vsel %vm1994_vm10, %v1976_v50, %v5586_v4  ;;  %v5600_v58 = vpop.permute.xlu1 %5599 }
 0x12e   : > { %v5595_v59 = vpop.permute.xlu0 %5594  ;;  %v2034_v62 = vpack.c.bf16 %v2010_v56, %v2009_v57  ;;  %v5602_v1 = vunpack.i.h.bf16 %v5600_v58  ;;  %v5601_v60 = vunpack.i.l.bf16 %v5600_v58 }
 0x12f   : > { %5889 = vrot.lane.b32.xlu1 %v5888_v47, %s6327_s23  ;;  %v5597_v28 = vunpack.i.h.bf16 %v5595_v59  ;;  %v5596_v15 = vunpack.i.l.bf16 %v5595_v59 }
 0x130   : > { %5884 = vrot.lane.b32.xlu0 %v7082_v16, %s6327_s23  ;;  %5172 = vmatmul.mubr.msk.bf16.gmra.mrb[12].mxu0 %vm2063_vm11, %v2034_v62  ;;  %v5913_v16 = vpack.i.bf16 %v3032_v3, %v3030_v41  ;;  %v1815_v45 = vsel %vm1796_vm4, %v1782_v39, %v5601_v60  ;;  %v3110_v60 = vld [vmem:[#allocation2 + $0x61] ss:$2 sm:$0xff] }
 0x131   : > { %v5610_v34 = vpop.permute.xlu1 %5609  ;;  %v1813_v47 = vsel %vm1796_vm4, %v1780_v9, %v5596_v15  ;;  %v5963_v9 = vpack.i.bf16 %v3110_v60, %v3108_v10  ;;  %v3096_v60 = vld [vmem:[#allocation2 + $0x90] ss:$2 sm:$0xff] }
 0x132   : > { %v7159_v61 = vpop.permute.xlu0 %5604  ;;  %v5612_v32 = vunpack.i.h.bf16 %v5610_v34  ;;  %v5611_v37 = vunpack.i.l.bf16 %v5610_v34 }
 0x133   : > { %5899 = vrot.lane.b32.xlu1 %v5898_v35, %s6328_s24  ;;  %v5607_v40 = vunpack.i.h.bf16 %v7159_v61  ;;  %v5606_v30 = vunpack.i.l.bf16 %v7159_v61 }
 0x134   : > { %5894 = vrot.lane.b32.xlu0 %v7084_v48, %s6328_s24  ;;  %v5592_v48 = vunpack.i.h.bf16 %v7138_v33  ;;  %v1781_v33 = vsel %vm340_vm0, %v468_v26, %v5582_v8  ;;  %v1848_v4 = vsel %vm1829_vm5, %v1815_v45, %v5611_v37  ;;  %v3020_v26 = vld [vmem:[#allocation2 + $0x91] ss:$2 sm:$0xff]  ;;  %v3034_v37 = vld [vmem:[#allocation2 + $0x62] ss:$2 sm:$0xff] }
 0x135   : > { %v7164_v42 = vpop.permute.xlu1 %5619  ;;  %v1814_v51 = vsel %vm1796_vm4, %v1781_v33, %v5597_v28  ;;  %v1846_v56 = vsel %vm1829_vm5, %v1813_v47, %v5606_v30  ;;  %v3124_v47 = vld [vmem:[#allocation2 + $0x32] ss:$2 sm:$0xff] }
 0x136   : > { %v7166_v22 = vpop.permute.xlu0 %5614  ;;  %v1783_v44 = vsel %vm340_vm0, %v470_v20, %v5592_v48  ;;  %v1847_v57 = vsel %vm1829_vm5, %v1814_v51, %v5607_v40  ;;  %v5622_v62 = vunpack.i.h.bf16 %v7164_v42  ;;  %v5621_v35 = vunpack.i.l.bf16 %v7164_v42 }
 0x137   : > { %v1816_v25 = vsel %vm1796_vm4, %v1783_v44, %v5602_v1  ;;  %v5617_v46 = vunpack.i.h.bf16 %v7166_v22  ;;  %v5616_v19 = vunpack.i.l.bf16 %v7166_v22 }
 0x138   : > { %5904 = vrot.lane.b32.xlu0 %v5903_v63, %s6321_s11  ;;  %v1849_v50 = vsel %vm1829_vm5, %v1816_v25, %v5612_v32  ;;  %v1881_v8 = vsel %vm1862_vm6, %v1848_v4, %v5621_v35  ;;  %v5908_v32 = vpack.i.bf16 %v3020_v26, %v3018_v49  ;;  %v3067_v35 = vld [vmem:[#allocation2 + $0xa9] ss:$2 sm:$0xff]  ;;  %v3098_v49 = vld [vmem:[#allocation2 + $0xc0] ss:$2 sm:$0xff] }
 0x139   : > { %v7169_v27 = vpop.permute.xlu1 %5629  ;;  %v1879_v12 = vsel %vm1862_vm6, %v1846_v56, %v5616_v19  ;;  %v1880_v61 = vsel %vm1862_vm6, %v1847_v57, %v5617_v46  ;;  %v1882_v21 = vsel %vm1862_vm6, %v1849_v50, %v5622_v62  ;;  %v3126_v46 = vld [vmem:[#allocation2 + $0x62] ss:$2 sm:$0xff]  ;;  %v3024_v50 = vld [vmem:[#allocation2 + $0xf1] ss:$2 sm:$0xff] }
 0x13a   : > { %v7171_v6 = vpop.permute.xlu0 %5624  ;;  %v5632_v63 = vunpack.i.h.bf16 %v7169_v27  ;;  %v5631_v41 = vunpack.i.l.bf16 %v7169_v27  ;;  %5909 = vrot.lane.b32.xlu1 %v5908_v32, %s6321_s11  ;;  %v5973_v7 = vpack.i.bf16 %v3126_v46, %v3124_v47  ;;  %v3065_v62 = vld [vmem:[#allocation2 + $0x79] ss:$2 sm:$0xff] }
 0x13b   : > { %v5627_v53 = vunpack.i.h.bf16 %v7171_v6  ;;  %v5626_v54 = vunpack.i.l.bf16 %v7171_v6 }
 0x13c   : > { %5914 = vrot.lane.b32.xlu0 %v5913_v16, %s6322_s12  ;;  %v1914_v28 = vsel %vm1895_vm7, %v1881_v8, %v5631_v41  ;;  %v1915_v15 = vsel %vm1895_vm7, %v1882_v21, %v5632_v63 }
 0x13d   : > { %v7186_v24 = vpop.permute.xlu1 %5639  ;;  %v1912_v22 = vsel %vm1895_vm7, %v1879_v12, %v5626_v54  ;;  %v1913_v16 = vsel %vm1895_vm7, %v1880_v61, %v5627_v53  ;;  %v3049_v54 = vld [vmem:[#allocation2 + $0x78] ss:$2 sm:$0xff] }
 0x13e   : > { %v5635_v38 = vpop.permute.xlu0 %5634  ;;  %v5642_v42 = vunpack.i.h.bf16 %v7186_v24  ;;  %v5641_v5 = vunpack.i.l.bf16 %v7186_v24  ;;  %v472_v61 = vld [vmem:[#allocation2 + $0xf8] sm:$0xff] }
 0x13f   : > { %v5637_v58 = vunpack.i.h.bf16 %v5635_v38  ;;  %v5636_v59 = vunpack.i.l.bf16 %v5635_v38  ;;  %v3036_v38 = vld [vmem:[#allocation2 + $0x92] ss:$2 sm:$0xff] }
 0x140   : > { %5924 = vrot.lane.b32.xlu0 %v5923_v18, %s6323_s13  ;;  %v1948_v44 = vsel %vm1928_vm8, %v1915_v15, %v5642_v42  ;;  %v5918_v19 = vpack.i.bf16 %v3036_v38, %v3034_v37  ;;  %v3083_v42 = vld [vmem:[#allocation2 + $0xaa] ss:$2 sm:$0xff] }
 0x141   : > { %v5650_v31 = vpop.permute.xlu1 %5649  ;;  %v1945_v6 = vsel %vm1928_vm8, %v1912_v22, %v5636_v59  ;;  %v1946_v11 = vsel %vm1928_vm8, %v1913_v16, %v5637_v58  ;;  %v3081_v16 = vld [vmem:[#allocation2 + $0x7a] ss:$2 sm:$0xff] }
 0x142   : > { %v5645_v55 = vpop.permute.xlu0 %5644  ;;  %v5652_v48 = vunpack.i.h.bf16 %v5650_v31  ;;  %v5651_v17 = vunpack.i.l.bf16 %v5650_v31  ;;  %5919 = vrot.lane.b32.xlu1 %v5918_v19, %s6322_s12 }
 0x143   : > { %v5647_v34 = vunpack.i.h.bf16 %v5645_v55  ;;  %v5646_v36 = vunpack.i.l.bf16 %v5645_v55  ;;  %v3051_v55 = vld [vmem:[#allocation2 + $0xa8] ss:$2 sm:$0xff] }
 0x144   : > { %5934 = vrot.lane.b32.xlu0 %v5933_v29, %s6324_s14  ;;  %v1981_v33 = vsel %vm1961_vm9, %v1948_v44, %v5652_v48  ;;  %v5928_v56 = vpack.i.bf16 %v3051_v55, %v3049_v54 }
 0x145   : > { %v7218_v3 = vpop.permute.xlu1 %5659  ;;  %v1978_v27 = vsel %vm1961_vm9, %v1945_v6, %v5646_v36  ;;  %v1979_v18 = vsel %vm1961_vm9, %v1946_v11, %v5647_v34  ;;  %v5938_v34 = vpack.i.bf16 %v3067_v35, %v3065_v62  ;;  %v5948_v11 = vpack.i.bf16 %v3083_v42, %v3081_v16 }
 0x146   : > { %v5655_v2 = vpop.permute.xlu0 %5654  ;;  %5929 = vrot.lane.b32.xlu1 %v5928_v56, %s6323_s13  ;;  %v5662_v36 = vunpack.i.h.bf16 %v7218_v3  ;;  %v5661_v63 = vunpack.i.l.bf16 %v7218_v3 }
 0x147   : > { %v5657_v13 = vunpack.i.h.bf16 %v5655_v2  ;;  %v5656_v14 = vunpack.i.l.bf16 %v5655_v2  ;;  %v474_v2 = vld [vmem:[#allocation2 + $0x110] sm:$0xff] }
 0x148   : > { %5944 = vrot.lane.b32.xlu0 %v5943_v43, %s6325_s15  ;;  %v1947_v43 = vsel %vm1928_vm8, %v1914_v28, %v5641_v5  ;;  %v471_v5 = vld [vmem:[#allocation2 + $0xf0] sm:$0xff] }
 0x149   : > { %v2011_v23 = vsel %vm1994_vm10, %v1978_v27, %v5656_v14  ;;  %v2012_v20 = vsel %vm1994_vm10, %v1979_v18, %v5657_v13  ;;  %v7233_v1 = vpop.permute.xlu1 %5669  ;;  %v1980_v30 = vsel %vm1961_vm9, %v1947_v43, %v5651_v17  ;;  %v473_v13 = vld [vmem:[#allocation2 + $0x108] sm:$0xff]  ;;  %v1785_v17 = vsel %vm340_vm0, %v472_v61, %v5662_v36 }
 0x14a   : > { %v5665_v24 = vpop.permute.xlu0 %5664  ;;  %v2035_v29 = vpack.c.bf16 %v2012_v20, %v2011_v23  ;;  %5939 = vrot.lane.b32.xlu1 %v5938_v34, %s6324_s14  ;;  %v5672_v41 = vunpack.i.h.bf16 %v7233_v1  ;;  %v5671_v6 = vunpack.i.l.bf16 %v7233_v1  ;;  %v1784_v8 = vsel %vm340_vm0, %v471_v5, %v5661_v63 }
 0x14b   : > { %v5667_v39 = vunpack.i.h.bf16 %v5665_v24  ;;  %v5666_v40 = vunpack.i.l.bf16 %v5665_v24  ;;  %v5958_v24 = vpack.i.bf16 %v3098_v49, %v3096_v60 }
 0x14c   : > { %5175 = vmatprep.mubr.msk.bf16.mxu0 %vm2063_vm11, %v2035_v29  ;;  %5954 = vrot.lane.b32.xlu0 %v5953_v0, %s6326_s18  ;;  %v3022_v0 = vld [vmem:[#allocation2 + $0xc1] ss:$2 sm:$0xff]  ;;  %v1787_v21 = vsel %vm340_vm0, %v474_v2, %v5672_v41  ;;  %v1786_v26 = vsel %vm340_vm0, %v473_v13, %v5671_v6  ;;  %v3128_v2 = vld [vmem:[#allocation2 + $0x92] ss:$2 sm:$0xff]  ;;  %v3130_v6 = vld [vmem:[#allocation2 + $0xc2] ss:$2 sm:$0xff] }
 0x14d   : > { %v2014_v45 = vsel %vm1994_vm10, %v1981_v33, %v5667_v39  ;;  %v2013_v25 = vsel %vm1994_vm10, %v1980_v30, %v5666_v40  ;;  %v7248_v51 = vpop.permute.xlu1 %5679  ;;  %v5983_v57 = vpack.i.bf16 %v3024_v50, %v3022_v0  ;;  %v3112_v50 = vld [vmem:[#allocation2 + $0x91] ss:$2 sm:$0xff] }
 0x14e   : > { %v5675_v31 = vpop.permute.xlu0 %5674  ;;  %v2036_v4 = vpack.c.bf16 %v2014_v45, %v2013_v25  ;;  %v5682_v14 = vunpack.i.h.bf16 %v7248_v51  ;;  %v5681_v48 = vunpack.i.l.bf16 %v7248_v51  ;;  %5949 = vrot.lane.b32.xlu1 %v5948_v11, %s6325_s15 }
 0x14f   : > { %v5677_v27 = vunpack.i.h.bf16 %v5675_v31  ;;  %v5676_v18 = vunpack.i.l.bf16 %v5675_v31 }
 0x150   : > { %5176 = vmatmul.mubr.msk.bf16.gmra.mrb[16].mxu0 %vm2063_vm11, %v2036_v4  ;;  %5964 = vrot.lane.b32.xlu0 %v5963_v9, %s6327_s23  ;;  %v1819_v29 = vsel %vm1796_vm4, %v1786_v26, %v5681_v48  ;;  %v1820_v32 = vsel %vm1796_vm4, %v1787_v21, %v5682_v14 }
 0x151   : > { %v5690_v52 = vpop.permute.xlu1 %5689  ;;  %v1818_v43 = vsel %vm1796_vm4, %v1785_v17, %v5677_v27  ;;  %v1817_v44 = vsel %vm1796_vm4, %v1784_v8, %v5676_v18  ;;  %v5978_v17 = vpack.i.bf16 %v3130_v6, %v3128_v2  ;;  %v3026_v27 = vld [vmem:[#allocation2 + $0x121] ss:$2 sm:$0xff]  ;;  %v3028_v18 = vld [vmem:[#allocation2 + $0x151] ss:$2 sm:$0xff] }
 0x152   : > { %v7254_v53 = vpop.permute.xlu0 %5684  ;;  %v5691_v3 = vunpack.i.l.bf16 %v5690_v52  ;;  %v5692_v23 = vunpack.i.h.bf16 %v5690_v52  ;;  %5959 = vrot.lane.b32.xlu1 %v5958_v24, %s6326_s18  ;;  %v5988_v60 = vpack.i.bf16 %v3028_v18, %v3026_v27 }
 0x153   : > { %v5686_v20 = vunpack.i.l.bf16 %v7254_v53  ;;  %v5687_v28 = vunpack.i.h.bf16 %v7254_v53  ;;  %v3114_v53 = vld [vmem:[#allocation2 + $0xc1] ss:$2 sm:$0xff] }
 0x154   : > { %5974 = vrot.lane.b32.xlu0 %v5973_v7, %s6328_s24  ;;  %v1852_v39 = vsel %vm1829_vm5, %v1819_v29, %v5691_v3  ;;  %v1853_v33 = vsel %vm1829_vm5, %v1820_v32, %v5692_v23 }
 0x155   : > { %v5700_v58 = vpop.permute.xlu1 %5699  ;;  %v1850_v9 = vsel %vm1829_vm5, %v1817_v44, %v5686_v20  ;;  %v1851_v47 = vsel %vm1829_vm5, %v1818_v43, %v5687_v28 }
 0x156   : > { %v7258_v59 = vpop.permute.xlu0 %5694  ;;  %v5701_v15 = vunpack.i.l.bf16 %v5700_v58  ;;  %v5702_v37 = vunpack.i.h.bf16 %v5700_v58  ;;  %v5968_v58 = vpack.i.bf16 %v3114_v53, %v3112_v50  ;;  %v6306_v50 = vld [vmem:[#allocation2 + $0x140] sm:$0xff] }
 0x157   : > { %v5696_v38 = vunpack.i.l.bf16 %v7258_v59  ;;  %v5697_v40 = vunpack.i.h.bf16 %v7258_v59 }
 0x158   : > { %5984 = vrot.lane.b32.xlu0 %v5983_v57, %s6321_s11  ;;  %v1885_v46 = vsel %vm1862_vm6, %v1852_v39, %v5701_v15  ;;  %v1886_v4 = vsel %vm1862_vm6, %v1853_v33, %v5702_v37  ;;  %5969 = vrot.lane.b32.xlu1 %v5968_v58, %s6327_s23 }
 0x159   : > { %v7262_v12 = vpop.permute.xlu1 %5709  ;;  %v1883_v7 = vsel %vm1862_vm6, %v1850_v9, %v5696_v38  ;;  %v1884_v54 = vsel %vm1862_vm6, %v1851_v47, %v5697_v40  ;;  %v475_v47 = vld [vmem:[#allocation2 + $0x120] sm:$0xff] }
 0x15a   : > { %v5705_v22 = vpop.permute.xlu0 %5704  ;;  %v5712_v55 = vunpack.i.h.bf16 %v7262_v12  ;;  %v5711_v56 = vunpack.i.l.bf16 %v7262_v12 }
 0x15b   : > { %v5707_v45 = vunpack.i.h.bf16 %v5705_v22  ;;  %v5706_v25 = vunpack.i.l.bf16 %v5705_v22 }
 0x15c   : > { %v1918_v11 = vsel %vm1895_vm7, %v1885_v46, %v5711_v56  ;;  %v1919_v3 = vsel %vm1895_vm7, %v1886_v4, %v5712_v55  ;;  %5979 = vrot.lane.b32.xlu1 %v5978_v17, %s6328_s24  ;;  %v476_v46 = vld [vmem:[#allocation2 + $0x128] sm:$0xff] }
 0x15d   : > { %v7271_v10 = vpop.permute.xlu1 %5719  ;;  %v1916_v59 = vsel %vm1895_vm7, %v1883_v7, %v5706_v25  ;;  %v1917_v62 = vsel %vm1895_vm7, %v1884_v54, %v5707_v45  ;;  %v6307_v54 = vld [vmem:[#allocation2 + $0x138] sm:$0xff] }
 0x15e   : > { %v5715_v1 = vpop.permute.xlu0 %5714  ;;  %v5722_v35 = vunpack.i.h.bf16 %v7271_v10  ;;  %v5721_v34 = vunpack.i.l.bf16 %v7271_v10 }
 0x15f   : > { %v5717_v19 = vunpack.i.h.bf16 %v5715_v1  ;;  %v5716_v31 = vunpack.i.l.bf16 %v5715_v1 }
 0x160   : > { %v1951_v10 = vsel %vm1928_vm8, %v1918_v11, %v5721_v34  ;;  %v1952_v23 = vsel %vm1928_vm8, %v1919_v3, %v5722_v35  ;;  %5989 = vrot.lane.b32.xlu1 %v5988_v60, %s6321_s11 }
 0x161   : > { %v5730_v30 = vpop.permute.xlu1 %5729  ;;  %v1949_v61 = vsel %vm1928_vm8, %v1916_v59, %v5716_v31  ;;  %v1950_v63 = vsel %vm1928_vm8, %v1917_v62, %v5717_v19 }
 0x162   : > { %v5725_v51 = vpop.permute.xlu0 %5724  ;;  %v5732_v12 = vunpack.i.h.bf16 %v5730_v30  ;;  %v5731_v16 = vunpack.i.l.bf16 %v5730_v30 }
 0x163   : > { %v5727_v52 = vunpack.i.h.bf16 %v5725_v51  ;;  %v5726_v0 = vunpack.i.l.bf16 %v5725_v51 }
 0x164   : > { %v1984_v49 = vsel %vm1961_vm9, %v1951_v10, %v5731_v16  ;;  %v1985_v26 = vsel %vm1961_vm9, %v1952_v23, %v5732_v12 }
 0x165   : > { %v7296_v57 = vpop.permute.xlu1 %5739  ;;  %v1982_v42 = vsel %vm1961_vm9, %v1949_v61, %v5726_v0  ;;  %v1983_v5 = vsel %vm1961_vm9, %v1950_v63, %v5727_v52 }
 0x166   : > { %v5735_v36 = vpop.permute.xlu0 %5734  ;;  %v5742_v9 = vunpack.i.h.bf16 %v7296_v57  ;;  %v5741_v45 = vunpack.i.l.bf16 %v7296_v57 }
 0x167   : > { %v5737_v41 = vunpack.i.h.bf16 %v5735_v36  ;;  %v5736_v22 = vunpack.i.l.bf16 %v5735_v36 }
 0x168   : > { %v1789_v57 = vsel %vm340_vm0, %v476_v46, %v5742_v9  ;;  %v1788_v59 = vsel %vm340_vm0, %v475_v47, %v5741_v45 }
 0x169   : > { %v2015_v13 = vsel %vm1994_vm10, %v1982_v42, %v5736_v22  ;;  %v2016_v14 = vsel %vm1994_vm10, %v1983_v5, %v5737_v41  ;;  %v5750_v48 = vpop.permute.xlu1 %5749 }
 0x16a   : > { %v2037_v8 = vpack.c.bf16 %v2016_v14, %v2015_v13  ;;  %v5745_v21 = vpop.permute.xlu0 %5744  ;;  %v5752_v30 = vunpack.i.h.bf16 %v5750_v48  ;;  %v5751_v33 = vunpack.i.l.bf16 %v5750_v48 }
 0x16b   : > { %v5747_v20 = vunpack.i.h.bf16 %v5745_v21  ;;  %v5746_v1 = vunpack.i.l.bf16 %v5745_v21 }
 0x16c   : > { %5179 = vmatprep.mubr.msk.bf16.mxu0 %vm2063_vm11, %v2037_v8  ;;  %v1791_v53 = vsel %vm340_vm0, %v6306_v50, %v5752_v30  ;;  %v1790_v55 = vsel %vm340_vm0, %v6307_v54, %v5751_v33 }
 0x16d   : > { %v2018_v28 = vsel %vm1994_vm10, %v1985_v26, %v5747_v20  ;;  %v2017_v15 = vsel %vm1994_vm10, %v1984_v49, %v5746_v1  ;;  %v5760_v24 = vpop.permute.xlu1 %5759 }
 0x16e   : > { %v2038_v29 = vpack.c.bf16 %v2018_v28, %v2017_v15  ;;  %v5755_v32 = vpop.permute.xlu0 %5754  ;;  %v5762_v25 = vunpack.i.h.bf16 %v5760_v24  ;;  %v5761_v51 = vunpack.i.l.bf16 %v5760_v24 }
 0x16f   : > { %v5757_v19 = vunpack.i.h.bf16 %v5755_v32  ;;  %v5756_v31 = vunpack.i.l.bf16 %v5755_v32 }
 0x170   : > { %5180 = vmatmul.mubr.msk.bf16.gmra.mrb[20].mxu0 %vm2063_vm11, %v2038_v29  ;;  %v1823_v62 = vsel %vm1796_vm4, %v1790_v55, %v5761_v51  ;;  %v1824_v35 = vsel %vm1796_vm4, %v1791_v53, %v5762_v25 }
 0x171   : > { %v5770_v37 = vpop.permute.xlu1 %5769  ;;  %v1822_v34 = vsel %vm1796_vm4, %v1789_v57, %v5757_v19  ;;  %v1821_v36 = vsel %vm1796_vm4, %v1788_v59, %v5756_v31 }
 0x172   : > { %v5765_v38 = vpop.permute.xlu0 %5764  ;;  %v5772_v7 = vunpack.i.h.bf16 %v5770_v37  ;;  %v5771_v52 = vunpack.i.l.bf16 %v5770_v37 }
 0x173   : > { %v5767_v56 = vunpack.i.h.bf16 %v5765_v38  ;;  %v5766_v58 = vunpack.i.l.bf16 %v5765_v38 }
 0x174   : > { %v1856_v22 = vsel %vm1829_vm5, %v1823_v62, %v5771_v52  ;;  %v1857_v12 = vsel %vm1829_vm5, %v1824_v35, %v5772_v7 }
 0x175   : > { %v7321_v43 = vpop.permute.xlu1 %5779  ;;  %v1854_v2 = vsel %vm1829_vm5, %v1821_v36, %v5766_v58  ;;  %v1855_v6 = vsel %vm1829_vm5, %v1822_v34, %v5767_v56 }
 0x176   : > { %v5775_v44 = vpop.permute.xlu0 %5774  ;;  %v5782_v14 = vunpack.i.h.bf16 %v7321_v43  ;;  %v5781_v48 = vunpack.i.l.bf16 %v7321_v43 }
 0x177   : > { %v5777_v61 = vunpack.i.h.bf16 %v5775_v44  ;;  %v5776_v63 = vunpack.i.l.bf16 %v5775_v44 }
 0x178   : > { %v1889_v43 = vsel %vm1862_vm6, %v1856_v22, %v5781_v48  ;;  %v1890_v44 = vsel %vm1862_vm6, %v1857_v12, %v5782_v14  ;;  %v6308_v22 = vld [vmem:[#allocation2 + $0x158] sm:$0xff] }
 0x179   : > { %v7323_v39 = vpop.permute.xlu1 %5789  ;;  %v1887_v18 = vsel %vm1862_vm6, %v1854_v2, %v5776_v63  ;;  %v1888_v3 = vsel %vm1862_vm6, %v1855_v6, %v5777_v61  ;;  %v6310_v6 = vld [vmem:[#allocation2 + $0x170] sm:$0xff] }
 0x17a   : > { %v5785_v40 = vpop.permute.xlu0 %5784  ;;  %v5792_v10 = vunpack.i.h.bf16 %v7323_v39  ;;  %v5791_v8 = vunpack.i.l.bf16 %v7323_v39 }
 0x17b   : > { %v5787_v16 = vunpack.i.h.bf16 %v5785_v40  ;;  %v5786_v42 = vunpack.i.l.bf16 %v5785_v40 }
 0x17c   : > { %v1922_v33 = vsel %vm1895_vm7, %v1889_v43, %v5791_v8  ;;  %v1923_v9 = vsel %vm1895_vm7, %v1890_v44, %v5792_v10 }
 0x17d   : > { %v5800_v4 = vpop.permute.xlu1 %5799  ;;  %v1920_v23 = vsel %vm1895_vm7, %v1887_v18, %v5786_v42  ;;  %v1921_v20 = vsel %vm1895_vm7, %v1888_v3, %v5787_v16 }
 0x17e   : > { %v5795_v0 = vpop.permute.xlu0 %5794  ;;  %v5802_v1 = vunpack.i.h.bf16 %v5800_v4  ;;  %v5801_v60 = vunpack.i.l.bf16 %v5800_v4 }
 0x17f   : > { %v5797_v11 = vunpack.i.h.bf16 %v5795_v0  ;;  %v5796_v13 = vunpack.i.l.bf16 %v5795_v0 }
 0x180   : > { %v1955_v51 = vsel %vm1928_vm8, %v1922_v33, %v5801_v60  ;;  %v1956_v47 = vsel %vm1928_vm8, %v1923_v9, %v5802_v1 }
 0x181   : > { %v5810_v41 = vpop.permute.xlu1 %5809  ;;  %v1953_v26 = vsel %vm1928_vm8, %v1920_v23, %v5796_v13  ;;  %v1954_v28 = vsel %vm1928_vm8, %v1921_v20, %v5797_v11  ;;  %v6311_v13 = vld [vmem:[#allocation2 + $0x168] sm:$0xff] }
 0x182   : > { %v5805_v5 = vpop.permute.xlu0 %5804  ;;  %v5812_v29 = vunpack.i.h.bf16 %v5810_v41  ;;  %v5811_v32 = vunpack.i.l.bf16 %v5810_v41 }
 0x183   : > { %v5807_v17 = vunpack.i.h.bf16 %v5805_v5  ;;  %v5806_v27 = vunpack.i.l.bf16 %v5805_v5  ;;  %v6309_v5 = vld [vmem:[#allocation2 + $0x150] sm:$0xff] }
 0x184   : > { %v1988_v31 = vsel %vm1961_vm9, %v1955_v51, %v5811_v32  ;;  %v1989_v4 = vsel %vm1961_vm9, %v1956_v47, %v5812_v29 }
 0x185   : > { %v5820_v21 = vpop.permute.xlu1 %5819  ;;  %v1986_v37 = vsel %vm1961_vm9, %v1953_v26, %v5806_v27  ;;  %v1987_v38 = vsel %vm1961_vm9, %v1954_v28, %v5807_v17 }
 0x186   : > { %v5815_v49 = vpop.permute.xlu0 %5814  ;;  %v5822_v58 = vunpack.i.h.bf16 %v5820_v21  ;;  %v5821_v59 = vunpack.i.l.bf16 %v5820_v21 }
 0x187   : > { %v5817_v15 = vunpack.i.h.bf16 %v5815_v49  ;;  %v5816_v24 = vunpack.i.l.bf16 %v5815_v49 }
 0x188   : > { %v1793_v12 = vsel %vm340_vm0, %v6308_v22, %v5822_v58  ;;  %v1792_v2 = vsel %vm340_vm0, %v6309_v5, %v5821_v59  ;;  %v2321_v59 = vld [vmem:[%s7379_s30 + $0x8] sm:$0xff] }
 0x189   : > { %v2019_v39 = vsel %vm1994_vm10, %v1986_v37, %v5816_v24  ;;  %v2020_v40 = vsel %vm1994_vm10, %v1987_v38, %v5817_v15  ;;  %v5830_v30 = vpop.permute.xlu1 %5829 }
 0x18a   : > { %v2039_v45 = vpack.c.bf16 %v2020_v40, %v2019_v39  ;;  %v5825_v25 = vpop.permute.xlu0 %5824  ;;  %v5832_v62 = vunpack.i.h.bf16 %v5830_v30  ;;  %v5831_v35 = vunpack.i.l.bf16 %v5830_v30 }
 0x18b   : > { %v5827_v46 = vunpack.i.h.bf16 %v5825_v25  ;;  %v5826_v19 = vunpack.i.l.bf16 %v5825_v25 }
 0x18c   : > { %5183 = vmatprep.mubr.msk.bf16.mxu0 %vm2063_vm11, %v2039_v45  ;;  %v1795_v11 = vsel %vm340_vm0, %v6310_v6, %v5832_v62  ;;  %v1794_v14 = vsel %vm340_vm0, %v6311_v13, %v5831_v35  ;;  %v2322_v45 = vld [vmem:[%s7379_s30 + $0x10] sm:$0xff] }
 0x18d   : > { %v2022_v7 = vsel %vm1994_vm10, %v1989_v4, %v5827_v46  ;;  %v2021_v52 = vsel %vm1994_vm10, %v1988_v31, %v5826_v19  ;;  %v5840_v0 = vpop.permute.xlu1 %5839  ;;  %v2320_v31 = vld [vmem:[%s7379_s30] sm:$0xff] }
 0x18e   : > { %v2040_v50 = vpack.c.bf16 %v2022_v7, %v2021_v52  ;;  %v5835_v53 = vpop.permute.xlu0 %5834  ;;  %v5841_v34 = vunpack.i.l.bf16 %v5840_v0  ;;  %v5842_v36 = vunpack.i.h.bf16 %v5840_v0 }
 0x18f   : > { %v5837_v61 = vunpack.i.h.bf16 %v5835_v53  ;;  %v5836_v63 = vunpack.i.l.bf16 %v5835_v53  ;;  %v2323_v53 = vld [vmem:[%s7379_s30 + $0x18] sm:$0xff] }
 0x190   : > { %5184 = vmatmul.mubr.msk.bf16.gmra.mrb[24].mxu0 %vm2063_vm11, %v2040_v50  ;;  %v1827_v17 = vsel %vm1796_vm4, %v1794_v14, %v5841_v34  ;;  %v1828_v10 = vsel %vm1796_vm4, %v1795_v11, %v5842_v36 }
 0x191   : > { %v5850_v54 = vpop.permute.xlu1 %5849  ;;  %v1826_v8 = vsel %vm1796_vm4, %v1793_v12, %v5837_v61  ;;  %v1825_v21 = vsel %vm1796_vm4, %v1792_v2, %v5836_v63 }
 0x192   : > { %v5845_v55 = vpop.permute.xlu0 %5844  ;;  %v5851_v16 = vunpack.i.l.bf16 %v5850_v54  ;;  %v5852_v48 = vunpack.i.h.bf16 %v5850_v54 }
 0x193   : > { %v5847_v27 = vunpack.i.h.bf16 %v5845_v55  ;;  %v5846_v18 = vunpack.i.l.bf16 %v5845_v55 }
 0x194   : > { %v1860_v1 = vsel %vm1829_vm5, %v1827_v17, %v5851_v16  ;;  %v1861_v15 = vsel %vm1829_vm5, %v1828_v10, %v5852_v48 }
 0x195   : > { %v5860_v56 = vpop.permute.xlu1 %5859  ;;  %v1858_v37 = vsel %vm1829_vm5, %v1825_v21, %v5846_v18  ;;  %v1859_v38 = vsel %vm1829_vm5, %v1826_v8, %v5847_v27 }
 0x196   : > { %v5855_v57 = vpop.permute.xlu0 %5854  ;;  %v5861_v3 = vunpack.i.l.bf16 %v5860_v56  ;;  %v5862_v23 = vunpack.i.h.bf16 %v5860_v56 }
 0x197   : > { %v5857_v60 = vunpack.i.h.bf16 %v5855_v57  ;;  %v5856_v49 = vunpack.i.l.bf16 %v5855_v57 }
 0x198   : > { %v1893_v43 = vsel %vm1862_vm6, %v1860_v1, %v5861_v3  ;;  %v1894_v39 = vsel %vm1862_vm6, %v1861_v15, %v5862_v23  ;;  %v2998_v23 = vld [vmem:[#allocation2] ss:$2 sm:$0xff] }
 0x199   : > { %v5870_v41 = vpop.permute.xlu1 %5869  ;;  %v1891_v25 = vsel %vm1862_vm6, %v1858_v37, %v5856_v49  ;;  %v1892_v51 = vsel %vm1862_vm6, %v1859_v38, %v5857_v60  ;;  %v2433_v49 = vld [vmem:[#allocation3 + $0x1] ss:$2 sm:$0xff]  ;;  %v2449_v38 = vld [vmem:[#allocation3 + $0x2] ss:$2 sm:$0xff] }
 0x19a   : > { %v5865_v42 = vpop.permute.xlu0 %5864  ;;  %v5871_v26 = vunpack.i.l.bf16 %v5870_v41  ;;  %v5872_v24 = vunpack.i.h.bf16 %v5870_v41 }
 0x19b   : > { %v5867_v29 = vunpack.i.h.bf16 %v5865_v42  ;;  %v5866_v32 = vunpack.i.l.bf16 %v5865_v42 }
 0x19c   : > { %v1926_v47 = vsel %vm1895_vm7, %v1893_v43, %v5871_v26  ;;  %v1927_v4 = vsel %vm1895_vm7, %v1894_v39, %v5872_v24 }
 0x19d   : > { %v5880_v20 = vpop.permute.xlu1 %5879  ;;  %v1924_v7 = vsel %vm1895_vm7, %v1891_v25, %v5866_v32  ;;  %v1925_v52 = vsel %vm1895_vm7, %v1892_v51, %v5867_v29 }
 0x19e   : > { %v5875_v28 = vpop.permute.xlu0 %5874  ;;  %v5881_v44 = vunpack.i.l.bf16 %v5880_v20  ;;  %v5882_v40 = vunpack.i.h.bf16 %v5880_v20  ;;  %v3000_v20 = vld [vmem:[#allocation2 + $0x30] ss:$2 sm:$0xff] }
 0x19f   : > { %v5877_v30 = vunpack.i.h.bf16 %v5875_v28  ;;  %v5876_v33 = vunpack.i.l.bf16 %v5875_v28 }
 0x1a0   : > { %v1959_v54 = vsel %vm1928_vm8, %v1926_v47, %v5881_v44  ;;  %v1960_v62 = vsel %vm1928_vm8, %v1927_v4, %v5882_v40 }
 0x1a1   : > { %v5890_v9 = vpop.permute.xlu1 %5889  ;;  %v1957_v35 = vsel %vm1928_vm8, %v1924_v7, %v5876_v33  ;;  %v1958_v34 = vsel %vm1928_vm8, %v1925_v52, %v5877_v30 }
 0x1a2   : > { %v5891_v46 = vunpack.i.l.bf16 %v5890_v9  ;;  %v5885_v19 = vpop.permute.xlu0 %5884  ;;  %v5892_v0 = vunpack.i.h.bf16 %v5890_v9 }
 0x1a3   : > { %v5161_v50 = vpop.f32.mrb[0].mxu0  ;;  %v5887_v55 = vunpack.i.h.bf16 %v5885_v19  ;;  %v5886_v56 = vunpack.i.l.bf16 %v5885_v19 }
 0x1a4   : > { %v2354_v58 = vsub.f32 %v2322_v45, %v5161_v50  ;;  %v2150_v57 = vpop.f32.mrb[1].mxu0  ;;  %v1992_v41 = vsel %vm1961_vm9, %v1959_v54, %v5891_v46  ;;  %v1993_v2 = vsel %vm1961_vm9, %v1960_v62, %v5892_v0  ;;  %v2324_v62 = vld [vmem:[%s7379_s30 + $0x20] sm:$0xff] }
 0x1a5   : > { %v2352_v36 = vsub.f32 %v2320_v31, %v2150_v57  ;;  %v5162_v61 = vpop.f32.mrb[2].mxu0  ;;  %v5900_v63 = vpop.permute.xlu1 %5899  ;;  %v1990_v14 = vsel %vm1961_vm9, %v1957_v35, %v5886_v56  ;;  %v1991_v48 = vsel %vm1961_vm9, %v1958_v34, %v5887_v55  ;;  %v2326_v56 = vld [vmem:[%s7379_s30 + $0x30] sm:$0xff] }
 0x1a6   : > { %2387 = vst.msk [vmem:[#allocation3 + $0x31] sm:$0xff] %vm340_vm0, %v2354_v58  ;;  %v2355_v22 = vsub.f32 %v2323_v53, %v5162_v61  ;;  %v5902_v12 = vunpack.i.h.bf16 %v5900_v63  ;;  %v5901_v16 = vunpack.i.l.bf16 %v5900_v63  ;;  %v5895_v42 = vpop.permute.xlu0 %5894  ;;  %v2153_v5 = vpop.f32.mrb[3].mxu0  ;;  %v2327_v61 = vld [vmem:[%s7379_s30 + $0x38] sm:$0xff] }
 0x1a7   : > { %2385 = vst.msk [vmem:[#allocation3 + $0x19] sm:$0xff] %vm340_vm0, %v2352_v36  ;;  %v5897_v6 = vunpack.i.h.bf16 %v5895_v42  ;;  %v5896_v11 = vunpack.i.l.bf16 %v5895_v42  ;;  %v2353_v13 = vsub.f32 %v2321_v59, %v2153_v5  ;;  %v2325_v5 = vld [vmem:[%s7379_s30 + $0x28] sm:$0xff] }
 0x1a8   : > { %2388 = vst.msk [vmem:[#allocation3 + $0x39] sm:$0xff] %vm340_vm0, %v2355_v22  ;;  %v2025_v17 = vsel %vm1994_vm10, %v1992_v41, %v5901_v16  ;;  %v2026_v27 = vsel %vm1994_vm10, %v1993_v2, %v5902_v12  ;;  %v3004_v22 = vld [vmem:[#allocation2 + $0x90] ss:$2 sm:$0xff]  ;;  %v3002_v2 = vld [vmem:[#allocation2 + $0x60] ss:$2 sm:$0xff] }
 0x1a9   : > { %v2042_v18 = vpack.c.bf16 %v2026_v27, %v2025_v17  ;;  %v2023_v3 = vsel %vm1994_vm10, %v1990_v14, %v5896_v11  ;;  %v2024_v10 = vsel %vm1994_vm10, %v1991_v48, %v5897_v6  ;;  %2386 = vst.msk [vmem:[#allocation3 + $0x21] sm:$0xff] %vm340_vm0, %v2353_v13 }
 0x1aa   : > { %v2041_v8 = vpack.c.bf16 %v2024_v10, %v2023_v3  ;;  %v5905_v21 = vpop.permute.xlu0 %5904 }
 0x1ab   : > { %v5907_v1 = vunpack.i.h.bf16 %v5905_v21  ;;  %v5906_v60 = vunpack.i.l.bf16 %v5905_v21 }
 0x1ac   : > { %5187 = vmatprep.mubr.msk.bf16.mxu0 %vm2063_vm11, %v2041_v8  ;;  %v5910_v59 = vpop.permute.xlu1 %5909 }
 0x1ad   : > { %5188 = vmatmul.mubr.msk.bf16.gmra.mrb[28].mxu0 %vm2063_vm11, %v2042_v18  ;;  %v3396_v26 = vsel %vm340_vm0, %v3000_v20, %v5907_v1  ;;  %v3395_v28 = vsel %vm340_vm0, %v2998_v23, %v5906_v60  ;;  %v5912_v34 = vunpack.i.h.bf16 %v5910_v59  ;;  %v5911_v12 = vunpack.i.l.bf16 %v5910_v59 }
 0x1ae   : > { %v5915_v15 = vpop.permute.xlu0 %5914 }
 0x1af   : > { %v2435_v24 = vld [vmem:[#allocation3 + $0x31] ss:$2 sm:$0xff]  ;;  %v5917_v29 = vunpack.i.h.bf16 %v5915_v15  ;;  %v5916_v32 = vunpack.i.l.bf16 %v5915_v15  ;;  %v2451_v43 = vld [vmem:[#allocation3 + $0x32] ss:$2 sm:$0xff]  ;;  %v3398_v18 = vsel %vm340_vm0, %v3004_v22, %v5912_v34  ;;  %v3397_v21 = vsel %vm340_vm0, %v3002_v2, %v5911_v12 }
 0x1b0   : > { %v5993_v37 = vpack.i.bf16 %v2435_v24, %v2433_v49  ;;  %v5998_v9 = vpack.i.bf16 %v2451_v43, %v2449_v38  ;;  %v2512_v43 = vld [vmem:[#allocation3 + $0x30] ss:$2 sm:$0xff]  ;;  %v2480_v22 = vld [vmem:[#allocation3 + $0x19] ss:$2 sm:$0xff] }
 0x1b1   : > { %v3403_v44 = vsel %vm1796_vm4, %v3395_v28, %v5916_v32  ;;  %v3404_v39 = vsel %vm1796_vm4, %v3396_v26, %v5917_v29  ;;  %v2464_v59 = vld [vmem:[#allocation3 + $0x18] ss:$2 sm:$0xff] }
 0x1b2   : > { %5994 = vrot.lane.b32.xlu0 %v5993_v37, %s6321_s11  ;;  %v5925_v40 = vpop.permute.xlu0 %5924  ;;  %v2330_v2 = vld [vmem:[%s7379_s30 + $0x50] sm:$0xff] }
 0x1b3   : > { %v5927_v30 = vunpack.i.h.bf16 %v5925_v40  ;;  %v5926_v33 = vunpack.i.l.bf16 %v5925_v40 }
 0x1b4   : > { %v5920_v23 = vpop.permute.xlu1 %5919 }
 0x1b5   : > { %v3411_v45 = vsel %vm1829_vm5, %v3403_v44, %v5926_v33  ;;  %v3412_v25 = vsel %vm1829_vm5, %v3404_v39, %v5927_v30  ;;  %v5922_v20 = vunpack.i.h.bf16 %v5920_v23  ;;  %v5921_v1 = vunpack.i.l.bf16 %v5920_v23 }
 0x1b6   : > { %5999 = vrot.lane.b32.xlu0 %v5998_v9, %s6322_s12  ;;  %v5935_v51 = vpop.permute.xlu0 %5934 }
 0x1b7   : > { %v5937_v47 = vunpack.i.h.bf16 %v5935_v51  ;;  %v5936_v46 = vunpack.i.l.bf16 %v5935_v51  ;;  %v3405_v28 = vsel %vm1796_vm4, %v3397_v21, %v5921_v1  ;;  %v3406_v15 = vsel %vm1796_vm4, %v3398_v18, %v5922_v20  ;;  %v2329_v21 = vld [vmem:[%s7379_s30 + $0x48] sm:$0xff] }
 0x1b8   : > { %v5930_v24 = vpop.permute.xlu1 %5929 }
 0x1b9   : > { %v3419_v19 = vsel %vm1862_vm6, %v3411_v45, %v5936_v46  ;;  %v3420_v31 = vsel %vm1862_vm6, %v3412_v25, %v5937_v47  ;;  %v5932_v29 = vunpack.i.h.bf16 %v5930_v24  ;;  %v5931_v32 = vunpack.i.l.bf16 %v5930_v24  ;;  %v2528_v25 = vld [vmem:[#allocation3 + $0x31] ss:$2 sm:$0xff] }
 0x1ba   : > { %v5945_v4 = vpop.permute.xlu0 %5944 }
 0x1bb   : > { %v5947_v7 = vunpack.i.h.bf16 %v5945_v4  ;;  %v5946_v52 = vunpack.i.l.bf16 %v5945_v4  ;;  %v3413_v37 = vsel %vm1829_vm5, %v3405_v28, %v5931_v32  ;;  %v3414_v38 = vsel %vm1829_vm5, %v3406_v15, %v5932_v29 }
 0x1bc   : > { %v5940_v39 = vpop.permute.xlu1 %5939 }
 0x1bd   : > { %v3427_v0 = vsel %vm1895_vm7, %v3419_v19, %v5946_v52  ;;  %v3428_v50 = vsel %vm1895_vm7, %v3420_v31, %v5947_v7  ;;  %v5942_v30 = vunpack.i.h.bf16 %v5940_v39  ;;  %v5941_v9 = vunpack.i.l.bf16 %v5940_v39  ;;  %v2332_v39 = vld [vmem:[%s7379_s30 + $0x60] sm:$0xff] }
 0x1be   : > { %v5955_v53 = vpop.permute.xlu0 %5954 }
 0x1bf   : > { %v5957_v54 = vunpack.i.h.bf16 %v5955_v53  ;;  %v5956_v55 = vunpack.i.l.bf16 %v5955_v53  ;;  %v3422_v45 = vsel %vm1862_vm6, %v3414_v38, %v5942_v30  ;;  %v3421_v51 = vsel %vm1862_vm6, %v3413_v37, %v5941_v9  ;;  %v2335_v30 = vld [vmem:[%s7379_s30 + $0x78] sm:$0xff] }
 0x1c0   : > { %v5950_v47 = vpop.permute.xlu1 %5949 }
 0x1c1   : > { %v3435_v58 = vsel %vm1928_vm8, %v3427_v0, %v5956_v55  ;;  %v3436_v57 = vsel %vm1928_vm8, %v3428_v50, %v5957_v54  ;;  %v5952_v19 = vunpack.i.h.bf16 %v5950_v47  ;;  %v5951_v31 = vunpack.i.l.bf16 %v5950_v47  ;;  %v2544_v0 = vld [vmem:[#allocation3 + $0x32] ss:$2 sm:$0xff] }
 0x1c2   : > { %v5965_v35 = vpop.permute.xlu0 %5964 }
 0x1c3   : > { %v5165_v36 = vpop.f32.mrb[4].mxu0  ;;  %v5967_v63 = vunpack.i.h.bf16 %v5965_v35  ;;  %v5966_v41 = vunpack.i.l.bf16 %v5965_v35  ;;  %v3429_v7 = vsel %vm1895_vm7, %v3421_v51, %v5951_v31  ;;  %v3430_v52 = vsel %vm1895_vm7, %v3422_v45, %v5952_v19  ;;  %v2333_v45 = vld [vmem:[%s7379_s30 + $0x68] sm:$0xff] }
 0x1c4   : > { %v2358_v16 = vsub.f32 %v2326_v56, %v5165_v36  ;;  %v2166_v42 = vpop.f32.mrb[5].mxu0  ;;  %v5960_v50 = vpop.permute.xlu1 %5959 }
 0x1c5   : > { %v2356_v6 = vsub.f32 %v2324_v62, %v2166_v42  ;;  %v5166_v11 = vpop.f32.mrb[6].mxu0  ;;  %v3443_v13 = vsel %vm1961_vm9, %v3435_v58, %v5966_v41  ;;  %v3444_v14 = vsel %vm1961_vm9, %v3436_v57, %v5967_v63  ;;  %v5962_v54 = vunpack.i.h.bf16 %v5960_v50 }
 0x1c6   : > { %2391 = vst.msk [vmem:[#allocation3 + $0x61] sm:$0xff] %vm340_vm0, %v2358_v16  ;;  %v2359_v48 = vsub.f32 %v2327_v61, %v5166_v11  ;;  %v2169_v17 = vpop.f32.mrb[7].mxu0  ;;  %v5975_v27 = vpop.permute.xlu0 %5974  ;;  %v5961_v55 = vunpack.i.l.bf16 %v5960_v50  ;;  %v2328_v11 = vld [vmem:[%s7379_s30 + $0x40] sm:$0xff] }
 0x1c7   : > { %2389 = vst.msk [vmem:[#allocation3 + $0x49] sm:$0xff] %vm340_vm0, %v2356_v6  ;;  %v2357_v3 = vsub.f32 %v2325_v5, %v2169_v17  ;;  %v5977_v10 = vunpack.i.h.bf16 %v5975_v27  ;;  %v5976_v8 = vunpack.i.l.bf16 %v5975_v27  ;;  %v3438_v57 = vsel %vm1928_vm8, %v3430_v52, %v5962_v54  ;;  %v2331_v17 = vld [vmem:[%s7379_s30 + $0x58] sm:$0xff]  ;;  %v6226_v54 = vld [vmem:[%s8124_s4] sm:$0xff]  }
 0x1c8   : > { %2392 = vst.msk [vmem:[#allocation3 + $0x69] sm:$0xff] %vm340_vm0, %v2359_v48  ;;  %v3437_v58 = vsel %vm1928_vm8, %v3429_v7, %v5961_v55  ;;  %v2496_v27 = vld [vmem:[#allocation3 + $0x1a] ss:$2 sm:$0xff]  ;;  %5191 = vmatprep.subr.bf16.mxu1 %v6226_v54 }
 0x1c9   : > { %2390 = vst.msk [vmem:[#allocation3 + $0x51] sm:$0xff] %vm340_vm0, %v2357_v3  ;;  %v7441_v60 = vsel %vm1994_vm10, %v3443_v13, %v5976_v8  ;;  %v7444_v49 = vsel %vm1994_vm10, %v3444_v14, %v5977_v10  ;;  %5192 = vmatpush3.bf16.msra.mxu1 %v6226_v54 }
 0x1ca   : > { %v3459_v26 = vpack.c.bf16 %v7444_v49, %v7441_v60  ;;  %v5970_v62 = vpop.permute.xlu1 %5969  ;;  %v6240_v60 = vld [vmem:[%s8125_s5 + $0x48] sm:$0xff]  }
 0x1cb   : > { %v5972_v34 = vunpack.i.h.bf16 %v5970_v62  ;;  %v5971_v36 = vunpack.i.l.bf16 %v5970_v62 }
 0x1cd   : > { %v3445_v63 = vsel %vm1961_vm9, %v3437_v58, %v5971_v36  ;;  %v3446_v41 = vsel %vm1961_vm9, %v3438_v57, %v5972_v34  ;;  %v6227_v57 = vld [vmem:[%s8124_s4 + $0x8] sm:$0xff]  }
 0x1ce   : > { %v5980_v12 = vpop.permute.xlu1 %5979  ;;  %5193 = vmatprep.subr.bf16.mxu1 %v6227_v57 }
 0x1cf   : > { %v2514_v44 = vld [vmem:[#allocation3 + $0x60] ss:$2 sm:$0xff]  ;;  %v2530_v33 = vld [vmem:[#allocation3 + $0x61] ss:$2 sm:$0xff]  ;;  %v5982_v42 = vunpack.i.h.bf16 %v5980_v12  ;;  %v5981_v5 = vunpack.i.l.bf16 %v5980_v12  ;;  %5194 = vmatpush3.bf16.msra.mxu1 %v6227_v57 }
 0x1d0   : > { %v6003_v40 = vpack.i.bf16 %v2514_v44, %v2512_v43  ;;  %v6008_v46 = vpack.i.bf16 %v2530_v33, %v2528_v25  ;;  %v2546_v4 = vld [vmem:[#allocation3 + $0x62] ss:$2 sm:$0xff]  ;;  %v2482_v61 = vld [vmem:[#allocation3 + $0x49] ss:$2 sm:$0xff] }
 0x1d1   : > { %v6013_v53 = vpack.i.bf16 %v2546_v4, %v2544_v0  ;;  %v2466_v56 = vld [vmem:[#allocation3 + $0x48] ss:$2 sm:$0xff]  ;;  %v6023_v16 = vpack.i.bf16 %v2482_v61, %v2480_v22  ;;  %v7468_v13 = vsel %vm1994_vm10, %v3445_v63, %v5981_v5  ;;  %v7471_v14 = vsel %vm1994_vm10, %v3446_v41, %v5982_v42  ;;  %v2437_v24 = vld [vmem:[#allocation3 + $0x61] ss:$2 sm:$0xff] }
 0x1d2   : > { %6004 = vrot.lane.b32.xlu0 %v6003_v40, %s6326_s18  ;;  %v6018_v35 = vpack.i.bf16 %v2466_v56, %v2464_v59  ;;  %v2498_v6 = vld [vmem:[#allocation3 + $0x4a] ss:$2 sm:$0xff]  ;;  %v3460_v18 = vpack.c.bf16 %v7471_v14, %v7468_v13  ;;  %v2334_v44 = vld [vmem:[%s7379_s30 + $0x70] sm:$0xff] }
 0x1d3   : > { %v6028_v8 = vpack.i.bf16 %v2498_v6, %v2496_v27  ;;  %v2453_v38 = vld [vmem:[#allocation3 + $0x62] ss:$2 sm:$0xff] }
 0x1d4   : > { %v2336_v42 = vld [vmem:[%s7379_s30 + $0x80] sm:$0xff]  ;;  %v3012_v14 = vld [vmem:[#allocation2 + $0x150] ss:$2 sm:$0xff] }
 0x1d5   : > { %v3010_v13 = vld [vmem:[#allocation2 + $0x120] ss:$2 sm:$0xff] }
 0x1d6   : > { %6009 = vrot.lane.b32.xlu0 %v6008_v46, %s6327_s23 }
 0x1da   : > { %6014 = vrot.lane.b32.xlu0 %v6013_v53, %s6328_s24 }
 0x1de   : > { %6019 = vrot.lane.b32.xlu0 %v6018_v35, %s6323_s13  ;;  %v6228_v35 = vld [vmem:[%s8124_s4 + $0x10] ss:$0 sps:$4 sm:$0x33]  }
 0x1df   : > { %5244 = vmatprep.subr.msk.bf16.mxu1 %vm2112_vm3, %v6228_v35  ;;  %v2923_v36 = vsel %vm2112_vm3, %v6228_v35, 0 }
 0x1e0   : > { %5196 = vmatpush3.bf16.msra.mxu1 %v2923_v36  ;;  %v2419_v36 = vld [vmem:[#allocation3 + $0x30] ss:$2 sm:$0xff] }
 0x1e2   : > { %6024 = vrot.lane.b32.xlu0 %v6023_v16, %s6324_s14  ;;  %v2338_v16 = vld [vmem:[%s7379_s30 + $0x90] sm:$0xff] }
 0x1e3   : > { %v5169_v48 = vpop.f32.mrb[8].mxu0 }
 0x1e4   : > { %v2362_v3 = vsub.f32 %v2330_v2, %v5169_v48  ;;  %v2182_v10 = vpop.f32.mrb[9].mxu0  ;;  %v2339_v2 = vld [vmem:[%s7379_s30 + $0x98] sm:$0xff]  ;;  %v2337_v48 = vld [vmem:[%s7379_s30 + $0x88] sm:$0xff] }
 0x1e5   : > { %v2360_v23 = vsub.f32 %v2328_v11, %v2182_v10  ;;  %v5170_v20 = vpop.f32.mrb[10].mxu0 }
 0x1e6   : > { %2395 = vst.msk [vmem:[#allocation3 + $0x91] sm:$0xff] %vm340_vm0, %v2362_v3  ;;  %v2363_v1 = vsub.f32 %v2331_v17, %v5170_v20  ;;  %6029 = vrot.lane.b32.xlu0 %v6028_v8, %s6325_s15  ;;  %v2185_v28 = vpop.f32.mrb[11].mxu0 }
 0x1e7   : > { %2393 = vst.msk [vmem:[#allocation3 + $0x79] sm:$0xff] %vm340_vm0, %v2360_v23  ;;  %v2361_v15 = vsub.f32 %v2329_v21, %v2185_v28 }
 0x1e8   : > { %2396 = vst.msk [vmem:[#allocation3 + $0x99] sm:$0xff] %vm340_vm0, %v2363_v1 }
 0x1e9   : > { %2394 = vst.msk [vmem:[#allocation3 + $0x81] sm:$0xff] %vm340_vm0, %v2361_v15 }
 0x1ef   : > { %v2439_v29 = vld [vmem:[#allocation3 + $0x91] ss:$2 sm:$0xff]  ;;  %v2455_v37 = vld [vmem:[#allocation3 + $0x92] ss:$2 sm:$0xff] }
 0x1f0   : > { %v6033_v32 = vpack.i.bf16 %v2439_v29, %v2437_v24  ;;  %v6038_v43 = vpack.i.bf16 %v2455_v37, %v2453_v38  ;;  %v2548_v31 = vld [vmem:[#allocation3 + $0x92] ss:$2 sm:$0xff]  ;;  %v2532_v55 = vld [vmem:[#allocation3 + $0x91] ss:$2 sm:$0xff]  ;;  %v7519_v24 = vpop.permute.xlu0 %5984 }
 0x1f1   : > { %v2516_v7 = vld [vmem:[#allocation3 + $0x90] ss:$2 sm:$0xff]  ;;  %v2484_v61 = vld [vmem:[#allocation3 + $0x79] ss:$2 sm:$0xff] }
 0x1f2   : > { %6034 = vrot.lane.b32.xlu1 %v6033_v32, %s6321_s11  ;;  %v2468_v59 = vld [vmem:[#allocation3 + $0x78] ss:$2 sm:$0xff]  ;;  %v2340_v38 = vld [vmem:[%s7379_s30 + $0xa0] sm:$0xff] }
 0x1f3   : > { %v2500_v22 = vld [vmem:[#allocation3 + $0x7a] ss:$2 sm:$0xff] }
 0x1f4   : > { %v2342_v37 = vld [vmem:[%s7379_s30 + $0xb0] sm:$0xff] }
 0x1f6   : > { %6039 = vrot.lane.b32.xlu1 %v6038_v43, %s6322_s12 }
 0x203   : > { %v5173_v40 = vpop.f32.mrb[12].mxu0 }
 0x204   : > { %v2366_v33 = vsub.f32 %v2334_v44, %v5173_v40  ;;  %v2198_v9 = vpop.f32.mrb[13].mxu0  ;;  %v2343_v44 = vld [vmem:[%s7379_s30 + $0xb8] sm:$0xff] }
 0x205   : > { %v2364_v25 = vsub.f32 %v2332_v39, %v2198_v9  ;;  %v5174_v51 = vpop.f32.mrb[14].mxu0 }
 0x206   : > { %2399 = vst.msk [vmem:[#allocation3 + $0xc1] sm:$0xff] %vm340_vm0, %v2366_v33  ;;  %v2367_v47 = vsub.f32 %v2335_v30, %v5174_v51  ;;  %v2201_v46 = vpop.f32.mrb[15].mxu0  ;;  %v2341_v33 = vld [vmem:[%s7379_s30 + $0xa8] sm:$0xff] }
 0x207   : > { %2397 = vst.msk [vmem:[#allocation3 + $0xa9] sm:$0xff] %vm340_vm0, %v2364_v25  ;;  %v2365_v19 = vsub.f32 %v2333_v45, %v2201_v46 }
 0x208   : > { %2400 = vst.msk [vmem:[#allocation3 + $0xc9] sm:$0xff] %vm340_vm0, %v2367_v47 }
 0x209   : > { %2398 = vst.msk [vmem:[#allocation3 + $0xb1] sm:$0xff] %vm340_vm0, %v2365_v19 }
 0x20f   : > { %v2550_v4 = vld [vmem:[#allocation3 + $0xc2] ss:$2 sm:$0xff]  ;;  %v2534_v53 = vld [vmem:[#allocation3 + $0xc1] ss:$2 sm:$0xff] }
 0x210   : > { %v2518_v52 = vld [vmem:[#allocation3 + $0xc0] ss:$2 sm:$0xff]  ;;  %v6053_v0 = vpack.i.bf16 %v2550_v4, %v2548_v31  ;;  %v6048_v56 = vpack.i.bf16 %v2534_v53, %v2532_v55  ;;  %v2486_v34 = vld [vmem:[#allocation3 + $0xa9] ss:$2 sm:$0xff] }
 0x211   : > { %v6043_v50 = vpack.i.bf16 %v2518_v52, %v2516_v7  ;;  %v2470_v58 = vld [vmem:[#allocation3 + $0xa8] ss:$2 sm:$0xff]  ;;  %v6063_v63 = vpack.i.bf16 %v2486_v34, %v2484_v61  ;;  %v2441_v20 = vld [vmem:[#allocation3 + $0xc1] ss:$2 sm:$0xff] }
 0x212   : > { %6054 = vrot.lane.b32.xlu0 %v6053_v0, %s6328_s24  ;;  %v6058_v62 = vpack.i.bf16 %v2470_v58, %v2468_v59  ;;  %v2502_v41 = vld [vmem:[#allocation3 + $0xaa] ss:$2 sm:$0xff] }
 0x213   : > { %6044 = vrot.lane.b32.xlu1 %v6043_v50, %s6326_s18  ;;  %v6068_v12 = vpack.i.bf16 %v2502_v41, %v2500_v22  ;;  %v2457_v21 = vld [vmem:[#allocation3 + $0xc2] ss:$2 sm:$0xff] }
 0x214   : > { %v2417_v55 = vld [vmem:[#allocation3] ss:$2 sm:$0xff] }
 0x217   : > { %6049 = vrot.lane.b32.xlu1 %v6048_v56, %s6327_s23 }
 0x21b   : > { %6059 = vrot.lane.b32.xlu1 %v6058_v62, %s6323_s13 }
 0x21f   : > { %6064 = vrot.lane.b32.xlu1 %v6063_v63, %s6324_s14 }
 0x223   : > { %6069 = vrot.lane.b32.xlu1 %v6068_v12, %s6325_s15  ;;  %v5177_v5 = vpop.f32.mrb[16].mxu0 }
 0x224   : > { %v2370_v6 = vsub.f32 %v2338_v16, %v5177_v5  ;;  %v2214_v11 = vpop.f32.mrb[17].mxu0  ;;  %v5995_v29 = vpop.permute.xlu0 %5994 }
 0x225   : > { %v2368_v17 = vsub.f32 %v2336_v42, %v2214_v11  ;;  %v5178_v27 = vpop.f32.mrb[18].mxu0  ;;  %v5997_v50 = vunpack.i.h.bf16 %v5995_v29  ;;  %v5996_v53 = vunpack.i.l.bf16 %v5995_v29 }
 0x226   : > { %2403 = vst.msk [vmem:[#allocation3 + $0xf1] sm:$0xff] %vm340_vm0, %v2370_v6  ;;  %v2371_v3 = vsub.f32 %v2339_v2, %v5178_v27  ;;  %v2217_v10 = vpop.f32.mrb[19].mxu0 }
 0x227   : > { %2401 = vst.msk [vmem:[#allocation3 + $0xd9] sm:$0xff] %vm340_vm0, %v2368_v17  ;;  %v2369_v8 = vsub.f32 %v2337_v48, %v2217_v10  ;;  %v2815_v41 = vsel %vm340_vm0, %v2417_v55, %v5996_v53  ;;  %v2816_v22 = vsel %vm340_vm0, %v2419_v36, %v5997_v50 }
 0x228   : > { %2404 = vst.msk [vmem:[#allocation3 + $0xf9] sm:$0xff] %vm340_vm0, %v2371_v3  ;;  %v6000_v32 = vpop.permute.xlu0 %5999 }
 0x229   : > { %2402 = vst.msk [vmem:[#allocation3 + $0xe1] sm:$0xff] %vm340_vm0, %v2369_v8  ;;  %v6002_v56 = vunpack.i.h.bf16 %v6000_v32  ;;  %v6001_v58 = vunpack.i.l.bf16 %v6000_v32 }
 0x22b   : > { %v2823_v16 = vsel %vm1796_vm4, %v2815_v41, %v6001_v58  ;;  %v2824_v42 = vsel %vm1796_vm4, %v2816_v22, %v6002_v56  ;;  %v3085_v22 = vld [vmem:[#allocation2 + $0xda] ss:$2 sm:$0xff] }
 0x22f   : > { %v2459_v23 = vld [vmem:[#allocation3 + $0xf2] ss:$2 sm:$0xff]  ;;  %v2443_v1 = vld [vmem:[#allocation3 + $0xf1] ss:$2 sm:$0xff] }
 0x230   : > { %v6078_v28 = vpack.i.bf16 %v2459_v23, %v2457_v21  ;;  %v6073_v15 = vpack.i.bf16 %v2443_v1, %v2441_v20  ;;  %v2520_v31 = vld [vmem:[#allocation3 + $0xf0] ss:$2 sm:$0xff]  ;;  %v2536_v54 = vld [vmem:[#allocation3 + $0xf1] ss:$2 sm:$0xff] }
 0x231   : > { %v2552_v12 = vld [vmem:[#allocation3 + $0xf2] ss:$2 sm:$0xff] }
 0x232   : > { %6079 = vrot.lane.b32.xlu0 %v6078_v28, %s6322_s12  ;;  %6074 = vrot.lane.b32.xlu1 %v6073_v15, %s6321_s11  ;;  %v2472_v29 = vld [vmem:[#allocation3 + $0xd8] ss:$2 sm:$0xff] }
 0x243   : > { %v5181_v43 = vpop.f32.mrb[20].mxu0 }
 0x244   : > { %v2374_v39 = vsub.f32 %v2342_v37, %v5181_v43  ;;  %v7524_v40 = vpop.permute.xlu0 %6004  ;;  %v2230_v30 = vpop.f32.mrb[21].mxu0 }
 0x245   : > { %v2372_v9 = vsub.f32 %v2340_v38, %v2230_v30  ;;  %v5182_v45 = vpop.f32.mrb[22].mxu0  ;;  %v6007_v5 = vunpack.i.h.bf16 %v7524_v40  ;;  %v6006_v10 = vunpack.i.l.bf16 %v7524_v40 }
 0x246   : > { %2407 = vst.msk [vmem:[#allocation3 + $0x121] sm:$0xff] %vm340_vm0, %v2374_v39  ;;  %v2375_v25 = vsub.f32 %v2343_v44, %v5182_v45  ;;  %v2233_v51 = vpop.f32.mrb[23].mxu0  ;;  %v2488_v45 = vld [vmem:[#allocation3 + $0xd9] ss:$2 sm:$0xff] }
 0x247   : > { %2405 = vst.msk [vmem:[#allocation3 + $0x109] sm:$0xff] %vm340_vm0, %v2372_v9  ;;  %v2373_v47 = vsub.f32 %v2341_v33, %v2233_v51  ;;  %v2346_v51 = vld [vmem:[%s7379_s30 + $0xd0] sm:$0xff] }
 0x248   : > { %2408 = vst.msk [vmem:[#allocation3 + $0x129] sm:$0xff] %vm340_vm0, %v2375_v25  ;;  %v6010_v46 = vpop.permute.xlu0 %6009 }
 0x249   : > { %2406 = vst.msk [vmem:[#allocation3 + $0x111] sm:$0xff] %vm340_vm0, %v2373_v47  ;;  %v6012_v8 = vunpack.i.h.bf16 %v6010_v46  ;;  %v6011_v20 = vunpack.i.l.bf16 %v6010_v46  ;;  %v2344_v46 = vld [vmem:[%s7379_s30 + $0xc0] sm:$0xff] }
 0x24c   : > { %v6015_v19 = vpop.permute.xlu0 %6014 }
 0x24d   : > { %v6017_v1 = vunpack.i.h.bf16 %v6015_v19  ;;  %v6016_v32 = vunpack.i.l.bf16 %v6015_v19  ;;  %v3038_v19 = vld [vmem:[#allocation2 + $0xc2] ss:$2 sm:$0xff] }
 0x24f   : > { %v2522_v4 = vld [vmem:[#allocation3 + $0x120] ss:$2 sm:$0xff]  ;;  %v2538_v0 = vld [vmem:[#allocation3 + $0x121] ss:$2 sm:$0xff] }
 0x250   : > { %v6020_v7 = vpop.permute.xlu0 %6019  ;;  %v6083_v52 = vpack.i.bf16 %v2522_v4, %v2520_v31  ;;  %v6088_v59 = vpack.i.bf16 %v2538_v0, %v2536_v54  ;;  %v2554_v34 = vld [vmem:[#allocation3 + $0x122] ss:$2 sm:$0xff]  ;;  %v2490_v40 = vld [vmem:[#allocation3 + $0x109] ss:$2 sm:$0xff]  ;;  %v2345_v54 = vld [vmem:[%s7379_s30 + $0xc8] sm:$0xff] }
 0x251   : > { %v6022_v62 = vunpack.i.h.bf16 %v6020_v7  ;;  %v6021_v35 = vunpack.i.l.bf16 %v6020_v7  ;;  %v6093_v6 = vpack.i.bf16 %v2554_v34, %v2552_v12  ;;  %v2474_v3 = vld [vmem:[#allocation3 + $0x108] ss:$2 sm:$0xff]  ;;  %v6103_v25 = vpack.i.bf16 %v2490_v40, %v2488_v45  ;;  %v3055_v34 = vld [vmem:[#allocation2 + $0x108] ss:$2 sm:$0xff]  ;;  %v2445_v12 = vld [vmem:[#allocation3 + $0x121] ss:$2 sm:$0xff] }
 0x252   : > { %6084 = vrot.lane.b32.xlu0 %v6083_v52, %s6326_s18  ;;  %v6098_v37 = vpack.i.bf16 %v2474_v3, %v2472_v29  ;;  %v2506_v47 = vld [vmem:[#allocation3 + $0x10a] ss:$2 sm:$0xff]  ;;  %v2504_v7 = vld [vmem:[#allocation3 + $0xda] ss:$2 sm:$0xff] }
 0x253   : > { %v2832_v11 = vsel %vm1829_vm5, %v2824_v42, %v6022_v62  ;;  %v2831_v48 = vsel %vm1829_vm5, %v2823_v16, %v6021_v35  ;;  %v2347_v4 = vld [vmem:[%s7379_s30 + $0xd8] sm:$0xff]  ;;  %v6108_v53 = vpack.i.bf16 %v2506_v47, %v2504_v7  ;;  %v2349_v40 = vld [vmem:[%s7379_s30 + $0xe8] sm:$0xff] }
 0x254   : > { %v6025_v57 = vpop.permute.xlu0 %6024  ;;  %v3040_v52 = vld [vmem:[#allocation2 + $0xf2] ss:$2 sm:$0xff] }
 0x255   : > { %v6027_v61 = vunpack.i.h.bf16 %v6025_v57  ;;  %v6026_v63 = vunpack.i.l.bf16 %v6025_v57  ;;  %v3053_v35 = vld [vmem:[#allocation2 + $0xd8] ss:$2 sm:$0xff] }
 0x256   : > { %6089 = vrot.lane.b32.xlu0 %v6088_v59, %s6327_s23  ;;  %v6113_v59 = vpack.i.bf16 %v3040_v52, %v3038_v19  ;;  %v6163_v36 = vpack.i.bf16 %v3055_v34, %v3053_v35  ;;  %v3087_v42 = vld [vmem:[#allocation2 + $0x10a] ss:$2 sm:$0xff] }
 0x257   : > { %v2839_v21 = vsel %vm1862_vm6, %v2831_v48, %v6026_v63  ;;  %v2840_v23 = vsel %vm1862_vm6, %v2832_v11, %v6027_v61  ;;  %v3069_v61 = vld [vmem:[#allocation2 + $0xd9] ss:$2 sm:$0xff]  ;;  %v3071_v63 = vld [vmem:[#allocation2 + $0x109] ss:$2 sm:$0xff]  ;;  %v2461_v11 = vld [vmem:[#allocation3 + $0x122] ss:$2 sm:$0xff] }
 0x258   : > { %v6030_v2 = vpop.permute.xlu0 %6029  ;;  %v6173_v41 = vpack.i.bf16 %v3071_v63, %v3069_v61  ;;  %v3100_v48 = vld [vmem:[#allocation2 + $0xf0] ss:$2 sm:$0xff]  ;;  %v2423_v35 = vld [vmem:[#allocation3 + $0x90] ss:$2 sm:$0xff] }
 0x259   : > { %v6032_v17 = vunpack.i.h.bf16 %v6030_v2  ;;  %v6031_v27 = vunpack.i.l.bf16 %v6030_v2 }
 0x25a   : > { %6094 = vrot.lane.b32.xlu0 %v6093_v6, %s6328_s24  ;;  %v6183_v6 = vpack.i.bf16 %v3087_v42, %v3085_v22 }
 0x25b   : > { %v2847_v28 = vsel %vm1895_vm7, %v2839_v21, %v6031_v27  ;;  %v2848_v15 = vsel %vm1895_vm7, %v2840_v23, %v6032_v17  ;;  %v3102_v17 = vld [vmem:[#allocation2 + $0x120] ss:$2 sm:$0xff]  ;;  %v7568_v27 = vpop.permute.xlu1 %5989  ;;  %v3118_v21 = vld [vmem:[#allocation2 + $0x121] ss:$2 sm:$0xff] }
 0x25c   : > { %v2855_v38 = vsel %vm1928_vm8, %v2847_v28, %v6006_v10  ;;  %v2856_v43 = vsel %vm1928_vm8, %v2848_v15, %v6007_v5  ;;  %v6193_v10 = vpack.i.bf16 %v3102_v17, %v3100_v48  ;;  %v3134_v28 = vld [vmem:[#allocation2 + $0x122] ss:$2 sm:$0xff] }
 0x25d   : > { %v2863_v44 = vsel %vm1961_vm9, %v2855_v38, %v6011_v20  ;;  %v2864_v39 = vsel %vm1961_vm9, %v2856_v43, %v6012_v8  ;;  %v3116_v8 = vld [vmem:[#allocation2 + $0xf1] ss:$2 sm:$0xff] }
 0x25e   : > { %6099 = vrot.lane.b32.xlu0 %v6098_v37, %s6323_s13  ;;  %v2871_v30 = vsel %vm1994_vm10, %v2863_v44, %v6016_v32  ;;  %v2872_v33 = vsel %vm1994_vm10, %v2864_v39, %v6017_v1  ;;  %v6203_v20 = vpack.i.bf16 %v3118_v21, %v3116_v8  ;;  %v3132_v1 = vld [vmem:[#allocation2 + $0xf2] ss:$2 sm:$0xff] }
 0x25f   : > { %v2879_v9 = vpack.c.bf16 %v2872_v33, %v2871_v30  ;;  %v2350_v15 = vld [vmem:[%s7379_s30 + $0xf0] sm:$0xff]  ;;  %v6213_v29 = vpack.i.bf16 %v3134_v28, %v3132_v1  ;;  %v2348_v32 = vld [vmem:[%s7379_s30 + $0xe0] sm:$0xff]  ;;  %v2351_v43 = vld [vmem:[%s7379_s30 + $0xf8] sm:$0xff] }
 0x261   : > { %5197 = vmatprep.mubr.msk.bf16.mxu1 %vm2063_vm11, %v2879_v9 }
 0x262   : > { %6104 = vrot.lane.b32.xlu0 %v6103_v25, %s6324_s14 }
 0x263   : > { %v5185_v31 = vpop.f32.mrb[24].mxu0 }
 0x264   : > { %v2378_v0 = vsub.f32 %v2346_v51, %v5185_v31  ;;  %v2246_v50 = vpop.f32.mrb[25].mxu0  ;;  %v6035_v23 = vpop.permute.xlu1 %6034 }
 0x265   : > { %v2376_v55 = vsub.f32 %v2344_v46, %v2246_v50  ;;  %v5186_v56 = vpop.f32.mrb[26].mxu0  ;;  %v6037_v52 = vunpack.i.h.bf16 %v6035_v23 }
 0x266   : > { %2411 = vst.msk [vmem:[#allocation3 + $0x151] sm:$0xff] %vm340_vm0, %v2378_v0  ;;  %v2379_v58 = vsub.f32 %v2347_v4, %v5186_v56  ;;  %6109 = vrot.lane.b32.xlu0 %v6108_v53, %s6325_s15  ;;  %v2249_v57 = vpop.f32.mrb[27].mxu0  ;;  %v6036_v0 = vunpack.i.l.bf16 %v6035_v23 }
 0x267   : > { %2409 = vst.msk [vmem:[#allocation3 + $0x139] sm:$0xff] %vm340_vm0, %v2376_v55  ;;  %v2377_v62 = vsub.f32 %v2345_v54, %v2249_v57  ;;  %v2818_v63 = vsel %vm340_vm0, %v2423_v35, %v6037_v52 }
 0x268   : > { %2412 = vst.msk [vmem:[#allocation3 + $0x159] sm:$0xff] %vm340_vm0, %v2379_v58  ;;  %v6040_v37 = vpop.permute.xlu1 %6039 }
 0x269   : > { %2410 = vst.msk [vmem:[#allocation3 + $0x141] sm:$0xff] %vm340_vm0, %v2377_v62  ;;  %v6042_v50 = vunpack.i.h.bf16 %v6040_v37  ;;  %v6041_v53 = vunpack.i.l.bf16 %v6040_v37  ;;  %v2421_v62 = vld [vmem:[#allocation3 + $0x60] ss:$2 sm:$0xff] }
 0x26a   : > { %6114 = vrot.lane.b32.xlu0 %v6113_v59, %s6322_s12  ;;  %v2817_v61 = vsel %vm340_vm0, %v2421_v62, %v6036_v0  ;;  %v3091_v62 = vld [vmem:[#allocation2 + $0x16a] ss:$2 sm:$0xff] }
 0x26b   : > { %v2825_v22 = vsel %vm1796_vm4, %v2817_v61, %v6041_v53  ;;  %v3059_v53 = vld [vmem:[#allocation2 + $0x168] ss:$2 sm:$0xff] }
 0x26e   : > { %6164 = vrot.lane.b32.xlu0 %v6163_v36, %s6323_s13 }
 0x26f   : > { %v2447_v16 = vld [vmem:[#allocation3 + $0x151] ss:$2 sm:$0xff]  ;;  %v2463_v2 = vld [vmem:[#allocation3 + $0x152] ss:$2 sm:$0xff] }
 0x270   : > { %v6118_v5 = vpack.i.bf16 %v2447_v16, %v2445_v12  ;;  %v6123_v3 = vpack.i.bf16 %v2463_v2, %v2461_v11  ;;  %v2524_v19 = vld [vmem:[#allocation3 + $0x150] ss:$2 sm:$0xff]  ;;  %v2540_v55 = vld [vmem:[#allocation3 + $0x151] ss:$2 sm:$0xff]  ;;  %v2826_v12 = vsel %vm1796_vm4, %v2818_v63, %v6042_v50  ;;  %v3120_v63 = vld [vmem:[#allocation2 + $0x151] ss:$2 sm:$0xff] }
 0x271   : > { %v3057_v50 = vld [vmem:[#allocation2 + $0x138] ss:$2 sm:$0xff] }
 0x272   : > { %6174 = vrot.lane.b32.xlu0 %v6173_v41, %s6324_s14  ;;  %6119 = vrot.lane.b32.xlu1 %v6118_v5, %s6321_s11  ;;  %v2556_v41 = vld [vmem:[#allocation3 + $0x152] ss:$2 sm:$0xff] }
 0x276   : > { %6184 = vrot.lane.b32.xlu0 %v6183_v6, %s6325_s15  ;;  %6124 = vrot.lane.b32.xlu1 %v6123_v3, %s6322_s12 }
 0x27a   : > { %6194 = vrot.lane.b32.xlu0 %v6193_v10, %s6326_s18 }
 0x27e   : > { %6204 = vrot.lane.b32.xlu0 %v6203_v20, %s6327_s23 }
 0x280   : > { %v5189_v38 = vpop.f32.mrb[28].mxu0 }
 0x281   : > { %v2382_v44 = vsub.f32 %v2350_v15, %v5189_v38  ;;  %v2262_v39 = vpop.f32.mrb[29].mxu0  ;;  %v2476_v38 = vld [vmem:[#allocation3 + $0x138] ss:$2 sm:$0xff] }
 0x282   : > { %v2380_v30 = vsub.f32 %v2348_v32, %v2262_v39  ;;  %6214 = vrot.lane.b32.xlu0 %v6213_v29, %s6328_s24  ;;  %v5190_v33 = vpop.f32.mrb[30].mxu0 }
 0x283   : > { %2415 = vst.msk [vmem:[#allocation3 + $0x181] sm:$0xff] %vm340_vm0, %v2382_v44  ;;  %v2383_v9 = vsub.f32 %v2351_v43, %v5190_v33  ;;  %v2265_v45 = vpop.f32.mrb[31].mxu0 }
 0x284   : > { %2413 = vst.msk [vmem:[#allocation3 + $0x169] sm:$0xff] %vm340_vm0, %v2380_v30  ;;  %v2381_v25 = vsub.f32 %v2349_v40, %v2265_v45  ;;  %v6055_v5 = vpop.permute.xlu0 %6054  ;;  %v6229_v40 = vld [vmem:[%s8123_s3] sm:$0xff]  }
 0x285   : > { %v6045_v51 = vpop.permute.xlu1 %6044  ;;  %2416 = vst.msk [vmem:[#allocation3 + $0x189] sm:$0xff] %vm340_vm0, %v2383_v9  ;;  %v6057_v15 = vunpack.i.h.bf16 %v6055_v5  ;;  %v6056_v29 = vunpack.i.l.bf16 %v6055_v5  ;;  %5205 = vmatprep.subr.bf16.mxu1 %v6229_v40 }
 0x286   : > { %2414 = vst.msk [vmem:[#allocation3 + $0x171] sm:$0xff] %vm340_vm0, %v2381_v25  ;;  %v6047_v17 = vunpack.i.h.bf16 %v6045_v51  ;;  %v6046_v3 = vunpack.i.l.bf16 %v6045_v51  ;;  %v2492_v25 = vld [vmem:[#allocation3 + $0x139] ss:$2 sm:$0xff] }
 0x287   : > { %v6230_v51 = vld [vmem:[%s8123_s3 + $0x8] sm:$0xff]  }
 0x289   : > { %v6050_v47 = vpop.permute.xlu1 %6049 }
 0x28a   : > { %v6052_v23 = vunpack.i.h.bf16 %v6050_v47  ;;  %v6051_v20 = vunpack.i.l.bf16 %v6050_v47 }
 0x28c   : > { %v2526_v31 = vld [vmem:[#allocation3 + $0x180] ss:$2 sm:$0xff]  ;;  %v2542_v7 = vld [vmem:[#allocation3 + $0x181] ss:$2 sm:$0xff] }
 0x28d   : > { %v6060_v46 = vpop.permute.xlu1 %6059  ;;  %v6128_v4 = vpack.i.bf16 %v2526_v31, %v2524_v19  ;;  %v6133_v57 = vpack.i.bf16 %v2542_v7, %v2540_v55  ;;  %v2558_v59 = vld [vmem:[#allocation3 + $0x182] ss:$2 sm:$0xff]  ;;  %v2494_v9 = vld [vmem:[#allocation3 + $0x169] ss:$2 sm:$0xff]  ;;  %v3042_v19 = vld [vmem:[#allocation2 + $0x122] ss:$2 sm:$0xff]  ;;  %v6168_v55 = vpack.i.bf16 %v3059_v53, %v3057_v50 }
 0x28e   : > { %v6062_v56 = vunpack.i.h.bf16 %v6060_v46  ;;  %v6061_v58 = vunpack.i.l.bf16 %v6060_v46  ;;  %v6138_v42 = vpack.i.bf16 %v2558_v59, %v2556_v41  ;;  %v2478_v21 = vld [vmem:[#allocation3 + $0x168] ss:$2 sm:$0xff]  ;;  %v6148_v47 = vpack.i.bf16 %v2494_v9, %v2492_v25  ;;  %v6231_v7 = vld [vmem:[%s8123_s3 + $0x10] ss:$0 sps:$4 sm:$0x33]  }
 0x28f   : > { %6129 = vrot.lane.b32.xlu1 %v6128_v4, %s6326_s18  ;;  %v6143_v43 = vpack.i.bf16 %v2478_v21, %v2476_v38  ;;  %v2510_v46 = vld [vmem:[#allocation3 + $0x16a] ss:$2 sm:$0xff]  ;;  %v2508_v4 = vld [vmem:[#allocation3 + $0x13a] ss:$2 sm:$0xff]  ;;  %v3122_v41 = vld [vmem:[#allocation2 + $0x181] ss:$2 sm:$0xff] }
 0x290   : > { %v2834_v2 = vsel %vm1829_vm5, %v2826_v12, %v6062_v56  ;;  %v2833_v6 = vsel %vm1829_vm5, %v2825_v22, %v6061_v58  ;;  %v3044_v31 = vld [vmem:[#allocation2 + $0x152] ss:$2 sm:$0xff]  ;;  %v6153_v52 = vpack.i.bf16 %v2510_v46, %v2508_v4  ;;  %v3073_v56 = vld [vmem:[#allocation2 + $0x139] ss:$2 sm:$0xff]  ;;  %v3075_v58 = vld [vmem:[#allocation2 + $0x169] ss:$2 sm:$0xff]  ;;  %v6208_v22 = vpack.i.bf16 %v3122_v41, %v3120_v63 }
 0x291   : > { %v6065_v54 = vpop.permute.xlu1 %6064  ;;  %v6158_v0 = vpack.i.bf16 %v3044_v31, %v3042_v19  ;;  %v3089_v59 = vld [vmem:[#allocation2 + $0x13a] ss:$2 sm:$0xff]  ;;  %v6236_v63 = vld [vmem:[%s8125_s5 + $0xd0] sm:$0xff]  }
 0x292   : > { %v6067_v34 = vunpack.i.h.bf16 %v6065_v54  ;;  %v6066_v36 = vunpack.i.l.bf16 %v6065_v54  ;;  %v3496_v54 = vsel %vm2112_vm3, %v6231_v7, 0  ;;  %v6188_v35 = vpack.i.bf16 %v3091_v62, %v3089_v59  ;;  %v3136_v12 = vld [vmem:[#allocation2 + $0x152] ss:$2 sm:$0xff]  ;;  %v6234_v62 = vld [vmem:[%s8125_s5 + $0xc8] sm:$0xff]  }
 0x293   : > { %6134 = vrot.lane.b32.xlu1 %v6133_v57, %s6327_s23  ;;  %v6178_v57 = vpack.i.bf16 %v3075_v58, %v3073_v56  ;;  %v6233_v59 = vld [vmem:[%s8125_s5 + $0x80] sm:$0xff]  }
 0x294   : > { %v2841_v10 = vsel %vm1862_vm6, %v2833_v6, %v6066_v36  ;;  %v2842_v8 = vsel %vm1862_vm6, %v2834_v2, %v6067_v34  ;;  %v3104_v34 = vld [vmem:[#allocation2 + $0x150] ss:$2 sm:$0xff]  ;;  %v3106_v36 = vld [vmem:[#allocation2 + $0x180] ss:$2 sm:$0xff] }
 0x295   : > { %v6070_v16 = vpop.permute.xlu1 %6069  ;;  %v6198_v61 = vpack.i.bf16 %v3106_v36, %v3104_v34  ;;  %v6238_v36 = vld [vmem:[%s8125_s5 + $0x40] sm:$0xff]  }
 0x296   : > { %v6072_v11 = vunpack.i.h.bf16 %v6070_v16  ;;  %v6071_v48 = vunpack.i.l.bf16 %v6070_v16  ;;  %v3138_v16 = vld [vmem:[#allocation2 + $0x182] ss:$2 sm:$0xff] }
 0x297   : > { %6139 = vrot.lane.b32.xlu1 %v6138_v42, %s6328_s24  ;;  %v6218_v42 = vpack.i.bf16 %v3138_v16, %v3136_v12  ;;  %v6237_v12 = vld [vmem:[%s8125_s5 + $0x90] sm:$0xff]   ;;  %v6241_v16 = vld [vmem:[%s8125_s5 + $0xd8] sm:$0xff]  }
 0x298   : > { %v2849_v1 = vsel %vm1895_vm7, %v2841_v10, %v6071_v48  ;;  %v2850_v28 = vsel %vm1895_vm7, %v2842_v8, %v6072_v11 }
 0x299   : > { %v2857_v32 = vsel %vm1928_vm8, %v2849_v1, %v6046_v3  ;;  %v2858_v37 = vsel %vm1928_vm8, %v2850_v28, %v6047_v17 }
 0x29a   : > { %v2865_v44 = vsel %vm1961_vm9, %v2857_v32, %v6051_v20  ;;  %v2866_v39 = vsel %vm1961_vm9, %v2858_v37, %v6052_v23  ;;  %v2425_v23 = vld [vmem:[#allocation3 + $0xc0] ss:$2 sm:$0xff]  ;;  %v2427_v20 = vld [vmem:[#allocation3 + $0xf0] ss:$2 sm:$0xff] }
 0x29b   : > { %v2873_v30 = vsel %vm1994_vm10, %v2865_v44, %v6056_v29  ;;  %v2874_v33 = vsel %vm1994_vm10, %v2866_v39, %v6057_v15  ;;  %6144 = vrot.lane.b32.xlu1 %v6143_v43, %s6323_s13 }
 0x29c   : > { %v2880_v45 = vpack.c.bf16 %v2874_v33, %v2873_v30 }
 0x29e   : > { %5198 = vmatmul.mubr.msk.bf16.vlgmr.msra.gmra.mrb[0].mxu1 %vm2063_vm11, %v2880_v45 }
 0x29f   : > { %5206 = vmatpush3.bf16.msra.mxu1 %v6229_v40  ;;  %6149 = vrot.lane.b32.xlu1 %v6148_v47, %s6324_s14 }
 0x2a0   : > { %5207 = vmatprep.subr.bf16.mxu1 %v6230_v51 }
 0x2a3   : > { %5208 = vmatpush3.bf16.msra.mxu1 %v6230_v51  ;;  %6154 = vrot.lane.b32.xlu1 %v6153_v52, %s6325_s15 }
 0x2a4   : > { %5245 = vmatprep.subr.msk.bf16.mxu1 %vm2112_vm3, %v6231_v7  ;;  %v6080_v5 = vpop.permute.xlu0 %6079  ;;  %v6075_v48 = vpop.permute.xlu1 %6074 }
 0x2a5   : > { %v6077_v3 = vunpack.i.h.bf16 %v6075_v48  ;;  %v6076_v10 = vunpack.i.l.bf16 %v6075_v48  ;;  %v6082_v8 = vunpack.i.h.bf16 %v6080_v5  ;;  %v6081_v21 = vunpack.i.l.bf16 %v6080_v5  ;;  %v6243_v5 = vld [vmem:[%s8125_s5 + $0x98] sm:$0xff]  }
 0x2a7   : > { %5210 = vmatpush3.bf16.msra.mxu1 %v3496_v54  ;;  %6159 = vrot.lane.b32.xlu1 %v6158_v0, %s6322_s12  ;;  %v2819_v28 = vsel %vm340_vm0, %v2425_v23, %v6076_v10  ;;  %v2820_v15 = vsel %vm340_vm0, %v2427_v20, %v6077_v3  ;;  %v5987_v3 = vunpack.i.h.bf16 %v7519_v24  ;;  %v5986_v10 = vunpack.i.l.bf16 %v7519_v24  ;;  %v3008_v23 = vld [vmem:[#allocation2 + $0xf0] ss:$2 sm:$0xff] }
 0x2a8   : > { %v2827_v43 = vsel %vm1796_vm4, %v2819_v28, %v6081_v21  ;;  %v2828_v44 = vsel %vm1796_vm4, %v2820_v15, %v6082_v8  ;;  %4981 = vmatprep.subr.bf16.mxu1 %v6238_v36  ;;  %v3006_v21 = vld [vmem:[#allocation2 + $0xc0] ss:$2 sm:$0xff] }
 0x2ab   : > { %6169 = vrot.lane.b32.xlu1 %v6168_v55, %s6323_s13 }
 0x2af   : > { %6179 = vrot.lane.b32.xlu1 %v6178_v57, %s6324_s14  ;;  %v6232_v57 = vld [vmem:[%s8125_s5 + $0xc0] sm:$0xff]  }
 0x2b0   : > { %5021 = vmatprep.subr.bf16.mxu0 %v6232_v57 }
 0x2b1   : > { %5022 = vmatpush3.bf16.msra.mxu0 %v6233_v59 }
 0x2b2   : > { %5023 = vmatprep.subr.bf16.mxu0 %v6234_v62 }
 0x2b3   : > { %6189 = vrot.lane.b32.xlu1 %v6188_v35, %s6325_s15 }
 0x2b7   : > { %6199 = vrot.lane.b32.xlu1 %v6198_v61, %s6326_s18  ;;  %v6235_v61 = vld [vmem:[%s8125_s5 + $0x88] sm:$0xff]  }
 0x2b8   : > { %5024 = vmatpush3.bf16.msra.mxu0 %v6235_v61 }
 0x2b9   : > { %5025 = vmatprep.subr.bf16.mxu0 %v6236_v63 }
 0x2bb   : > { %6209 = vrot.lane.b32.xlu1 %v6208_v22, %s6327_s23 }
 0x2bc   : > { %5026 = vmatpush3.bf16.msra.mxu0 %v6237_v12 }
 0x2bd   : > { %5027 = vmatprep.subr.bf16.mxu0 %v6241_v16 }
 0x2bf   : > { %6219 = vrot.lane.b32.xlu1 %v6218_v42, %s6328_s24 }
 0x2c0   : > { %5028 = vmatpush3.bf16.msra.mxu0 %v6243_v5 }
 0x2c4   : > { %v6085_v2 = vpop.permute.xlu0 %6084 }
 0x2c5   : > { %v6087_v45 = vunpack.i.h.bf16 %v6085_v2  ;;  %v6086_v25 = vunpack.i.l.bf16 %v6085_v2 }
 0x2c8   : > { %v6090_v6 = vpop.permute.xlu0 %6089 }
 0x2c9   : > { %v6092_v46 = vunpack.i.h.bf16 %v6090_v6  ;;  %v6091_v19 = vunpack.i.l.bf16 %v6090_v6 }
 0x2cc   : > { %v6095_v11 = vpop.permute.xlu0 %6094 }
 0x2cd   : > { %v6097_v7 = vunpack.i.h.bf16 %v6095_v11  ;;  %v6096_v52 = vunpack.i.l.bf16 %v6095_v11 }
 0x2d0   : > { %v6100_v17 = vpop.permute.xlu0 %6099 }
 0x2d1   : > { %v6102_v29 = vunpack.i.h.bf16 %v6100_v17  ;;  %v6101_v32 = vunpack.i.l.bf16 %v6100_v17 }
 0x2d3   : > { %v2836_v40 = vsel %vm1829_vm5, %v2828_v44, %v6102_v29  ;;  %v2835_v30 = vsel %vm1829_vm5, %v2827_v43, %v6101_v32  ;;  %v3400_v43 = vsel %vm340_vm0, %v3008_v23, %v5987_v3  ;;  %v3399_v44 = vsel %vm340_vm0, %v3006_v21, %v5986_v10 }
 0x2d4   : > { %v6105_v1 = vpop.permute.xlu0 %6104 }
 0x2d5   : > { %v6107_v37 = vunpack.i.h.bf16 %v6105_v1  ;;  %v6106_v38 = vunpack.i.l.bf16 %v6105_v1 }
 0x2d7   : > { %v2843_v51 = vsel %vm1862_vm6, %v2835_v30, %v6106_v38  ;;  %v2844_v47 = vsel %vm1862_vm6, %v2836_v40, %v6107_v37  ;;  %v2431_v40 = vld [vmem:[#allocation3 + $0x150] ss:$2 sm:$0xff] }
 0x2d8   : > { %v6110_v39 = vpop.permute.xlu0 %6109 }
 0x2d9   : > { %v6112_v33 = vunpack.i.h.bf16 %v6110_v39  ;;  %v6111_v9 = vunpack.i.l.bf16 %v6110_v39  ;;  %v2429_v39 = vld [vmem:[#allocation3 + $0x120] ss:$2 sm:$0xff] }
 0x2db   : > { %v2851_v31 = vsel %vm1895_vm7, %v2843_v51, %v6111_v9  ;;  %v2852_v4 = vsel %vm1895_vm7, %v2844_v47, %v6112_v33 }
 0x2dc   : > { %v2859_v0 = vsel %vm1928_vm8, %v2851_v31, %v6086_v25  ;;  %v2860_v50 = vsel %vm1928_vm8, %v2852_v4, %v6087_v45  ;;  %v7650_v35 = vpop.permute.xlu0 %6114 }
 0x2dd   : > { %v2867_v53 = vsel %vm1961_vm9, %v2859_v0, %v6091_v19  ;;  %v2868_v54 = vsel %vm1961_vm9, %v2860_v50, %v6092_v46  ;;  %v6117_v20 = vunpack.i.h.bf16 %v7650_v35  ;;  %v6116_v9 = vunpack.i.l.bf16 %v7650_v35 }
 0x2de   : > { %v2875_v55 = vsel %vm1994_vm10, %v2867_v53, %v6096_v52  ;;  %v2876_v56 = vsel %vm1994_vm10, %v2868_v54, %v6097_v7 }
 0x2df   : > { %v2881_v58 = vpack.c.bf16 %v2876_v56, %v2875_v55  ;;  %v3408_v33 = vsel %vm1796_vm4, %v3400_v43, %v6117_v20  ;;  %v3407_v3 = vsel %vm1796_vm4, %v3399_v44, %v6116_v9  ;;  %v6239_v9 = vld [vmem:[%s8125_s5] sm:$0xff]  }
 0x2e0   : > { %v7661_v41 = vpop.permute.xlu0 %6164 }
 0x2e1   : > { %5201 = vmatprep.mubr.msk.bf16.mxu1 %vm2063_vm11, %v2881_v58  ;;  %v6167_v51 = vunpack.i.h.bf16 %v7661_v41  ;;  %v6166_v47 = vunpack.i.l.bf16 %v7661_v41 }
 0x2e3   : > { %v3415_v23 = vsel %vm1829_vm5, %v3407_v3, %v6166_v47  ;;  %v3416_v20 = vsel %vm1829_vm5, %v3408_v33, %v6167_v51  ;;  %v5992_v51 = vunpack.i.h.bf16 %v7568_v27  ;;  %v5991_v47 = vunpack.i.l.bf16 %v7568_v27 }
 0x2e4   : > { %v6120_v34 = vpop.permute.xlu1 %6119  ;;  %v7672_v2 = vpop.permute.xlu0 %6174 }
 0x2e5   : > { %v6122_v1 = vunpack.i.h.bf16 %v6120_v34  ;;  %v6121_v28 = vunpack.i.l.bf16 %v6120_v34  ;;  %v6177_v41 = vunpack.i.h.bf16 %v7672_v2  ;;  %v3401_v27 = vsel %vm340_vm0, %v3010_v13, %v5991_v47  ;;  %v3613_v13 = vld [vmem:[#allocation4 + $0x1] sm:$0xff] }
 0x2e7   : > { %v2821_v45 = vsel %vm340_vm0, %v2429_v39, %v6121_v28  ;;  %v2822_v25 = vsel %vm340_vm0, %v2431_v40, %v6122_v1 }
 0x2e8   : > { %v6125_v22 = vpop.permute.xlu1 %6124  ;;  %v7674_v11 = vpop.permute.xlu0 %6184 }
 0x2e9   : > { %v6127_v15 = vunpack.i.h.bf16 %v6125_v22  ;;  %v6126_v29 = vunpack.i.l.bf16 %v6125_v22  ;;  %v6176_v22 = vunpack.i.l.bf16 %v7672_v2  ;;  %v6186_v5 = vunpack.i.l.bf16 %v7674_v11 }
 0x2eb   : > { %v2829_v46 = vsel %vm1796_vm4, %v2821_v45, %v6126_v29  ;;  %v2830_v19 = vsel %vm1796_vm4, %v2822_v25, %v6127_v15  ;;  %v3424_v29 = vsel %vm1862_vm6, %v3416_v20, %v6177_v41  ;;  %v6242_v45 = vld [vmem:[%s8125_s5 + $0x8] sm:$0xff]   ;;  %v6244_v25 = vld [vmem:[%s8125_s5 + $0x50] sm:$0xff]  }
 0x2ec   : > { %v7678_v8 = vpop.permute.xlu0 %6194 }
 0x2ed   : > { %v6197_v10 = vunpack.i.h.bf16 %v7678_v8  ;;  %v6196_v21 = vunpack.i.l.bf16 %v7678_v8 }
 0x2f0   : > { %v6205_v31 = vpop.permute.xlu0 %6204 }
 0x2f1   : > { %v6207_v1 = vunpack.i.h.bf16 %v6205_v31  ;;  %v6206_v28 = vunpack.i.l.bf16 %v6205_v31 }
 0x301   : > { %v6130_v42 = vpop.permute.xlu1 %6129 }
 0x302   : > { %v6132_v53 = vunpack.i.h.bf16 %v6130_v42  ;;  %v6131_v54 = vunpack.i.l.bf16 %v6130_v42  ;;  %v6187_v42 = vunpack.i.h.bf16 %v7674_v11  ;;  %v3423_v11 = vsel %vm1862_vm6, %v3415_v23, %v6176_v22 }
 0x304   : > { %v3432_v8 = vsel %vm1895_vm7, %v3424_v29, %v6187_v42  ;;  %v6249_v29 = vld [vmem:[%s8125_s5 + $0xa0] sm:$0xff]  }
 0x305   : > { %v6135_v6 = vpop.permute.xlu1 %6134  ;;  %v3440_v44 = vsel %vm1928_vm8, %v3432_v8, %v6197_v10  ;;  %v6253_v8 = vld [vmem:[%s8125_s5 + $0xe8] sm:$0xff]  }
 0x306   : > { %v6137_v58 = vunpack.i.h.bf16 %v6135_v6  ;;  %v6136_v57 = vunpack.i.l.bf16 %v6135_v6  ;;  %v6215_v6 = vpop.permute.xlu0 %6214  ;;  %v3448_v40 = vsel %vm1961_vm9, %v3440_v44, %v6207_v1  ;;  %v6246_v1 = vld [vmem:[%s8125_s5 + $0x58] sm:$0xff]   ;;  %v6255_v44 = vld [vmem:[%s8125_s5 + $0xa8] sm:$0xff]  }
 0x309   : > { %v6140_v48 = vpop.permute.xlu1 %6139 }
 0x30a   : > { %v6142_v35 = vunpack.i.h.bf16 %v6140_v48  ;;  %v6141_v34 = vunpack.i.l.bf16 %v6140_v48 }
 0x30d   : > { %v6145_v17 = vpop.permute.xlu1 %6144 }
 0x30e   : > { %v6147_v37 = vunpack.i.h.bf16 %v6145_v17  ;;  %v6146_v38 = vunpack.i.l.bf16 %v6145_v17 }
 0x310   : > { %v2838_v7 = vsel %vm1829_vm5, %v2830_v19, %v6147_v37  ;;  %v2837_v52 = vsel %vm1829_vm5, %v2829_v46, %v6146_v38  ;;  %v6216_v37 = vunpack.i.l.bf16 %v6215_v6  ;;  %v3431_v38 = vsel %vm1895_vm7, %v3423_v11, %v6186_v5  ;;  %v6247_v11 = vld [vmem:[%s8125_s5 + $0xe0] sm:$0xff]  }
 0x311   : > { %v6150_v32 = vpop.permute.xlu1 %6149  ;;  %v3439_v43 = vsel %vm1928_vm8, %v3431_v38, %v6196_v21  ;;  %5029 = vmatprep.subr.bf16.mxu0 %v6247_v11  ;;  %v6252_v38 = vld [vmem:[%s8125_s5 + $0x68] sm:$0xff]   ;;  %v6276_v11 = vld [vmem:[%s8125_s5 + $0x190] sm:$0xff]  }
 0x312   : > { %v6152_v24 = vunpack.i.h.bf16 %v6150_v32  ;;  %v6151_v30 = vunpack.i.l.bf16 %v6150_v32  ;;  %v6217_v32 = vunpack.i.h.bf16 %v6215_v6  ;;  %v3447_v39 = vsel %vm1961_vm9, %v3439_v43, %v6206_v28  ;;  %5030 = vmatpush3.bf16.msra.mxu0 %v6249_v29  ;;  %v6254_v43 = vld [vmem:[%s8125_s5 + $0x28] sm:$0xff]  }
 0x313   : > { %5031 = vmatprep.subr.bf16.mxu0 %v6253_v8 }
 0x314   : > { %v2845_v55 = vsel %vm1862_vm6, %v2837_v52, %v6151_v30  ;;  %v2846_v56 = vsel %vm1862_vm6, %v2838_v7, %v6152_v24  ;;  %v3455_v30 = vsel %vm1994_vm10, %v3447_v39, %v6216_v37  ;;  %v3456_v33 = vsel %vm1994_vm10, %v3448_v40, %v6217_v32  ;;  %v6245_v7 = vld [vmem:[%s8125_s5 + $0x10] sm:$0xff]   ;;  %v6250_v32 = vld [vmem:[%s8125_s5 + $0x60] sm:$0xff]  }
 0x315   : > { %v6155_v4 = vpop.permute.xlu1 %6154  ;;  %v3461_v49 = vpack.c.bf16 %v3456_v33, %v3455_v30  ;;  %v6251_v37 = vld [vmem:[%s8125_s5 + $0x20] sm:$0xff]   ;;  %v6256_v39 = vld [vmem:[%s8125_s5 + $0x70] sm:$0xff]   ;;  %v6260_v33 = vld [vmem:[%s8125_s5 + $0x78] sm:$0xff]  }
 0x316   : > { %v6157_v0 = vunpack.i.h.bf16 %v6155_v4  ;;  %v6156_v50 = vunpack.i.l.bf16 %v6155_v4  ;;  %v6257_v40 = vld [vmem:[%s8125_s5 + $0x30] sm:$0xff]   ;;  %5032 = vmatpush3.bf16.msra.mxu0 %v6255_v44  ;;  %v6279_v44 = vld [vmem:[%s8125_s5 + $0x160] sm:$0xff]  }
 0x317   : > { %v6259_v30 = vld [vmem:[%s8125_s5 + $0xb0] sm:$0xff]  }
 0x318   : > { %v2853_v59 = vsel %vm1895_vm7, %v2845_v55, %v6156_v50  ;;  %v2854_v62 = vsel %vm1895_vm7, %v2846_v56, %v6157_v0  ;;  %v3402_v50 = vsel %vm340_vm0, %v3012_v14, %v5992_v51 }
 0x319   : > { %v2861_v36 = vsel %vm1928_vm8, %v2853_v59, %v6131_v54  ;;  %v2862_v61 = vsel %vm1928_vm8, %v2854_v62, %v6132_v53  ;;  %v7699_v63 = vpop.permute.xlu1 %6159 }
 0x31a   : > { %v2869_v12 = vsel %vm1961_vm9, %v2861_v36, %v6136_v57  ;;  %v2870_v16 = vsel %vm1961_vm9, %v2862_v61, %v6137_v58  ;;  %v6161_v19 = vunpack.i.l.bf16 %v7699_v63 }
 0x31b   : > { %v2877_v48 = vsel %vm1994_vm10, %v2869_v12, %v6141_v34  ;;  %v2878_v17 = vsel %vm1994_vm10, %v2870_v16, %v6142_v35 }
 0x31c   : > { %v2882_v2 = vpack.c.bf16 %v2878_v17, %v2877_v48  ;;  %v3409_v58 = vsel %vm1796_vm4, %v3401_v27, %v6161_v19 }
 0x31d   : > { %v6170_v15 = vpop.permute.xlu1 %6169 }
 0x31e   : > { %5202 = vmatmul.mubr.msk.bf16.gmra.mrb[4].mxu1 %vm2063_vm11, %v2882_v2  ;;  %v6172_v31 = vunpack.i.h.bf16 %v6170_v15  ;;  %v6171_v4 = vunpack.i.l.bf16 %v6170_v15  ;;  %v6248_v15 = vld [vmem:[%s8125_s5 + $0x18] sm:$0xff]  }
 0x31f   : > { %5211 = vmatprep.mubr.msk.bf16.mxu1 %vm2063_vm11, %v3459_v26 }
 0x320   : > { %v3417_v62 = vsel %vm1829_vm5, %v3409_v58, %v6171_v4  ;;  %v6267_v58 = vld [vmem:[%s8125_s5 + $0x148] sm:$0xff]  }
 0x321   : > { %v6180_v24 = vpop.permute.xlu1 %6179 }
 0x322   : > { %v6182_v52 = vunpack.i.h.bf16 %v6180_v24  ;;  %v6181_v0 = vunpack.i.l.bf16 %v6180_v24  ;;  %v6258_v24 = vld [vmem:[%s8125_s5 + $0xf0] sm:$0xff]  }
 0x323   : > { %5033 = vmatprep.subr.bf16.mxu0 %v6258_v24 }
 0x324   : > { %v3425_v61 = vsel %vm1862_vm6, %v3417_v62, %v6181_v0  ;;  %5034 = vmatpush3.bf16.msra.mxu0 %v6259_v30  ;;  %v6281_v30 = vld [vmem:[%s8125_s5 + $0x120] sm:$0xff]  }
 0x325   : > { %v6190_v26 = vpop.permute.xlu1 %6189 }
 0x326   : > { %5212 = vmatmul.mubr.msk.bf16.vlgmr.msra.gmra.mrb[8].mxu1 %vm2063_vm11, %v3460_v18  ;;  %v6162_v18 = vunpack.i.h.bf16 %v7699_v63  ;;  %v6192_v53 = vunpack.i.h.bf16 %v6190_v26  ;;  %v6191_v54 = vunpack.i.l.bf16 %v6190_v26  ;;  %v6264_v26 = vld [vmem:[%s8125_s5 + $0x140] sm:$0xff]  }
 0x327   : > { %5215 = vmatprep.mubr.msk.bf16.mxu1 %vm2063_vm11, %v3461_v49  ;;  %4982 = vmatpush3.bf16.msra.mxu1 %v6239_v9  ;;  %v6262_v9 = vld [vmem:[%s8125_s5 + $0xf8] sm:$0xff]  }
 0x328   : > { %4983 = vmatprep.subr.bf16.mxu1 %v6240_v60  ;;  %v3410_v56 = vsel %vm1796_vm4, %v3402_v50, %v6162_v18  ;;  %v3433_v41 = vsel %vm1895_vm7, %v3425_v61, %v6191_v54  ;;  %v6261_v60 = vld [vmem:[%s8125_s5 + $0x38] sm:$0xff]   ;;  %5035 = vmatprep.subr.bf16.mxu0 %v6262_v9  ;;  %v3605_v50 = vld [vmem:[#allocation4] sm:$0xff]  ;;  %v6269_v61 = vld [vmem:[%s8125_s5 + $0x108] sm:$0xff]  }
 0x329   : > { %v6200_v46 = vpop.permute.xlu1 %6199  ;;  %v3418_v35 = vsel %vm1829_vm5, %v3410_v56, %v6172_v31  ;;  %v6263_v49 = vld [vmem:[%s8125_s5 + $0xb8] sm:$0xff]  }
 0x32a   : > { %v6202_v57 = vunpack.i.h.bf16 %v6200_v46  ;;  %v6201_v59 = vunpack.i.l.bf16 %v6200_v46  ;;  %v3426_v63 = vsel %vm1862_vm6, %v3418_v35, %v6182_v52  ;;  %5036 = vmatpush3.bf16.msra.mxu0 %v6263_v49  ;;  %v6268_v35 = vld [vmem:[%s8125_s5 + $0x180] sm:$0xff]  }
 0x32b   : > { %4984 = vmatpush3.bf16.msra.mxu1 %v6242_v45  ;;  %v3434_v22 = vsel %vm1895_vm7, %v3426_v63, %v6192_v53  ;;  %v6266_v45 = vld [vmem:[%s8125_s5 + $0x1c0] sm:$0xff]   ;;  %v6270_v63 = vld [vmem:[%s8125_s5 + $0x1c8] sm:$0xff]  }
 0x32c   : > { %4985 = vmatprep.subr.bf16.mxu1 %v6244_v25  ;;  %v3441_v16 = vsel %vm1928_vm8, %v3433_v41, %v6201_v59  ;;  %v3442_v42 = vsel %vm1928_vm8, %v3434_v22, %v6202_v57  ;;  %5101 = vmatprep.subr.bf16.mxu0 %v6266_v45  ;;  %v6265_v53 = vld [vmem:[%s8125_s5 + $0x100] sm:$0xff]   ;;  %v6271_v22 = vld [vmem:[%s8125_s5 + $0x150] sm:$0xff]  }
 0x32d   : > { %v6210_v55 = vpop.permute.xlu1 %6209 }
 0x32e   : > { %v6212_v34 = vunpack.i.h.bf16 %v6210_v55  ;;  %v6211_v36 = vunpack.i.l.bf16 %v6210_v55  ;;  %v3621_v55 = vld [vmem:[#allocation4 + $0x2] sm:$0xff] }
 0x32f   : > { %4986 = vmatpush3.bf16.msra.mxu1 %v6245_v7 }
 0x330   : > { %v3449_v48 = vsel %vm1961_vm9, %v3441_v16, %v6211_v36  ;;  %v3450_v17 = vsel %vm1961_vm9, %v3442_v42, %v6212_v34  ;;  %4987 = vmatprep.subr.bf16.mxu1 %v6246_v1  ;;  %v6273_v42 = vld [vmem:[%s8125_s5 + $0x110] sm:$0xff]  }
 0x331   : > { %v6220_v12 = vpop.permute.xlu1 %6219 }
 0x332   : > { %v6222_v5 = vunpack.i.h.bf16 %v6220_v12  ;;  %v6221_v6 = vunpack.i.l.bf16 %v6220_v12  ;;  %v6272_v12 = vld [vmem:[%s8125_s5 + $0x188] sm:$0xff]  }
 0x333   : > { %4988 = vmatpush3.bf16.msra.mxu1 %v6248_v15 }
 0x334   : > { %v3457_v3 = vsel %vm1994_vm10, %v3449_v48, %v6221_v6  ;;  %v3458_v10 = vsel %vm1994_vm10, %v3450_v17, %v6222_v5  ;;  %4989 = vmatprep.subr.bf16.mxu1 %v6250_v32  ;;  %v6274_v5 = vld [vmem:[%s8125_s5 + $0x1d0] sm:$0xff]  }
 0x335   : > { %v3462_v21 = vpack.c.bf16 %v3458_v10, %v3457_v3  ;;  %v6275_v3 = vld [vmem:[%s8125_s5 + $0x158] sm:$0xff]  }
 0x337   : > { %5216 = vmatmul.mubr.msk.bf16.gmra.mrb[12].mxu1 %vm2063_vm11, %v3462_v21 }
 0x338   : > { %4990 = vmatpush3.bf16.msra.mxu1 %v6251_v37  ;;  %v6277_v37 = vld [vmem:[%s8125_s5 + $0x118] sm:$0xff]  }
 0x339   : > { %4991 = vmatprep.subr.bf16.mxu1 %v6252_v38  ;;  %v6278_v38 = vld [vmem:[%s8125_s5 + $0x1d8] sm:$0xff]  }
 0x33c   : > { %4992 = vmatpush3.bf16.msra.mxu1 %v6254_v43 }
 0x33d   : > { %4993 = vmatprep.subr.bf16.mxu1 %v6256_v39  ;;  %v6280_v39 = vld [vmem:[%s8125_s5 + $0x198] sm:$0xff]  }
 0x340   : > { %4994 = vmatpush3.bf16.msra.mxu1 %v6257_v40  ;;  %v6282_v40 = vld [vmem:[%s8125_s5 + $0x1e0] sm:$0xff]  }
 0x341   : > { %4995 = vmatprep.subr.bf16.mxu1 %v6260_v33 }
 0x344   : > { %4996 = vmatpush3.bf16.msra.mxu1 %v6261_v60  ;;  %v6283_v60 = vld [vmem:[%s8125_s5 + $0x168] sm:$0xff]  }
 0x345   : > { %5061 = vmatprep.subr.bf16.mxu1 %v6264_v26 }
 0x371   : > { %v7770_v2 = vpop.f32.mrb[0].mxu1 }
 0x372   : > { %v7772_v23 = vpop.f32.mrb[1].mxu1 }
 0x373   : > { %v7774_v20 = vpop.f32.mrb[2].mxu1 }
 0x374   : > { %v7779_v28 = vpop.f32.mrb[3].mxu1 }
 0x3f1   : > { %v7838_v25 = vpop.f32.mrb[4].mxu1 }
 0x3f2   : > { %v7840_v51 = vpop.f32.mrb[5].mxu1 }
 0x3f3   : > { %v7842_v47 = vpop.f32.mrb[6].mxu1 }
 0x3f4   : > { %v7844_v46 = vpop.f32.mrb[7].mxu1 }
 0x3f9   : > { %v7854_v14 = vpop.f32.mrb[8].mxu1 }
 0x3fa   : > { %3565 = vst [vmem:[%s7852_s16 + $0x10] sm:$0xff] %v7854_v14  ;;  %3599 = vst [vmem:[#allocation4 + $0x31] sm:$0xff] %v7854_v14  ;;  %v7859_v18 = vpop.f32.mrb[9].mxu1 }
 0x3fb   : > { %3563 = vst [vmem:[%s7852_s16] sm:$0xff] %v7859_v18  ;;  %3597 = vst [vmem:[#allocation4 + $0x11] sm:$0xff] %v7859_v18  ;;  %v7864_v19 = vpop.f32.mrb[10].mxu1  ;;  %v3679_v31 = vpack.c.bf16 %v7859_v18, %v3613_v13 }
 0x3fc   : > { %3566 = vst [vmem:[%s7852_s16 + $0x18] sm:$0xff] %v7864_v19  ;;  %3600 = vst [vmem:[#allocation4 + $0x41] sm:$0xff] %v7864_v19  ;;  %v7870_v4 = vpop.f32.mrb[11].mxu1  ;;  %v3691_v7 = vpack.c.bf16 %v7864_v19, %v7854_v14 }
 0x3fd   : > { %3564 = vst [vmem:[%s7852_s16 + $0x8] sm:$0xff] %v7870_v4  ;;  %3598 = vst [vmem:[#allocation4 + $0x21] sm:$0xff] %v7870_v4  ;;  %4322 = vmatprep.mubr.bf16.mxu1 %v3679_v31  ;;  %v7879_v52 = vpack.c.bf16 %v7854_v14, %v7870_v4  ;;  %v3682_v0 = vpack.c.bf16 %v7870_v4, %v7859_v18  ;;  %v6284_v31 = vld [vmem:[%s8125_s5 + $0x1a0] sm:$0xff]  }
 0x3fe   : > { %v6300_v4 = vld [vmem:[%s8125_s5 + $0x220] sm:$0xff]  }
 0x401   : > { %v3631_v36 = vld [vmem:[#allocation4 + $0x30] sm:$0xff] }
 0x402   : > { %v3606_v27 = vld [vmem:[#allocation4 + $0x10] sm:$0xff] }
 0x403   : > { %v3678_v54 = vpack.c.bf16 %v3606_v27, %v3605_v50  ;;  %v7886_v56 = vld [vmem:[#allocation4 + $0x12] sm:$0xff]  ;;  %v7891_v59 = vld [vmem:[#allocation4 + $0x40] sm:$0xff] }
 0x404   : > { %v3630_v57 = vld [vmem:[#allocation4 + $0x20] sm:$0xff]  ;;  %v3680_v34 = vpack.c.bf16 %v7886_v56, %v3621_v55  ;;  %v3690_v41 = vpack.c.bf16 %v7891_v59, %v3631_v36  ;;  %v7946_v15 = vld [vmem:[#allocation4 + $0x32] sm:$0xff] }
 0x405   : > { %4323 = vmatmul.mubr.bf16.vlgmr.msra.gmra.mrb[16].mxu1 %v3678_v54  ;;  %v3681_v62 = vpack.c.bf16 %v3630_v57, %v3606_v27  ;;  %v7924_v48 = vpack.c.bf16 %v3631_v36, %v3630_v57  ;;  %v7926_v17 = vld [vmem:[#allocation4 + $0x22] sm:$0xff]  ;;  %v6291_v36 = vld [vmem:[%s8125_s5 + $0x178] sm:$0xff]  }
 0x406   : > { %4330 = vmatprep.mubr.bf16.mxu1 %v7879_v52  ;;  %5062 = vmatpush3.bf16.msra.mxu1 %v6265_v53  ;;  %v7958_v32 = vpack.c.bf16 %v7946_v15, %v7926_v17  ;;  %v3625_v13 = vld [vmem:[#allocation4 + $0x42] sm:$0xff] }
 0x407   : > { %4387 = vmatprep.mubr.bf16.mxu0 %v3681_v62  ;;  %5063 = vmatprep.subr.bf16.mxu1 %v6267_v58  ;;  %v6285_v53 = vld [vmem:[%s8125_s5 + $0x128] sm:$0xff]   ;;  %v6287_v58 = vld [vmem:[%s8125_s5 + $0x170] sm:$0xff]  }
 0x408   : > { %4388 = vmatmul.mubr.bf16.vlgmr.msra.gmra.mrb[32].mxu0 %v3680_v34  ;;  %v6286_v54 = vld [vmem:[%s8125_s5 + $0x1e8] sm:$0xff]   ;;  %v6290_v34 = vld [vmem:[%s8125_s5 + $0x1f0] sm:$0xff]  }
 0x409   : > { %4395 = vmatprep.mubr.bf16.mxu0 %v3690_v41  ;;  %5102 = vmatpush3.bf16.msra.mxu0 %v6268_v35  ;;  %v6288_v57 = vld [vmem:[%s8125_s5 + $0x1a8] sm:$0xff]   ;;  %v6292_v41 = vld [vmem:[%s8125_s5 + $0x1b0] sm:$0xff]  }
 0x40a   : > { %v7911_v16 = vpop.f32.mrb[12].mxu1  ;;  %5064 = vmatpush3.bf16.msra.mxu1 %v6269_v61  ;;  %5103 = vmatprep.subr.bf16.mxu0 %v6270_v63  ;;  %v3683_v61 = vpack.c.bf16 %v7926_v17, %v7886_v56  ;;  %v6296_v56 = vld [vmem:[%s8125_s5 + $0x200] sm:$0xff]   ;;  %v6297_v17 = vld [vmem:[%s8125_s5 + $0x208] sm:$0xff]  }
 0x40b   : > { %3569 = vst [vmem:[%s7852_s16 + $0x30] sm:$0xff] %v7911_v16  ;;  %3603 = vst [vmem:[#allocation4 + $0x71] sm:$0xff] %v7911_v16  ;;  %v7922_v6 = vpop.f32.mrb[13].mxu1  ;;  %5065 = vmatprep.subr.bf16.mxu1 %v6271_v22 }
 0x40c   : > { %3567 = vst [vmem:[%s7852_s16 + $0x20] sm:$0xff] %v7922_v6  ;;  %3601 = vst [vmem:[#allocation4 + $0x51] sm:$0xff] %v7922_v6  ;;  %v7934_v10 = vpop.f32.mrb[14].mxu1  ;;  %v7938_v21 = vpack.c.bf16 %v7922_v6, %v7864_v19  ;;  %v3669_v19 = vld [vmem:[#allocation4 + $0x91] sm:$0xff] }
 0x40d   : > { %3570 = vst [vmem:[%s7852_s16 + $0x38] sm:$0xff] %v7934_v10  ;;  %3604 = vst [vmem:[#allocation4 + $0x81] sm:$0xff] %v7934_v10  ;;  %v7943_v1 = vpop.f32.mrb[15].mxu1  ;;  %4331 = vmatmul.mubr.bf16.gmra.mrb[20].mxu1 %v7924_v48  ;;  %5104 = vmatpush3.bf16.msra.mxu0 %v6272_v12  ;;  %v3709_v29 = vpack.c.bf16 %v7934_v10, %v7911_v16  ;;  %v6293_v12 = vld [vmem:[%s8125_s5 + $0x138] sm:$0xff]  }
 0x40e   : > { %3568 = vst [vmem:[%s7852_s16 + $0x28] sm:$0xff] %v7943_v1  ;;  %3602 = vst [vmem:[#allocation4 + $0x61] sm:$0xff] %v7943_v1  ;;  %5066 = vmatpush3.bf16.msra.mxu1 %v6273_v42  ;;  %5105 = vmatprep.subr.bf16.mxu0 %v6274_v5  ;;  %v7968_v8 = vpack.c.bf16 %v7911_v16, %v7943_v1  ;;  %v3700_v43 = vpack.c.bf16 %v7943_v1, %v7922_v6  ;;  %v6294_v42 = vld [vmem:[%s8125_s5 + $0x1f8] sm:$0xff]  }
 0x40f   : > { %5067 = vmatprep.subr.bf16.mxu1 %v6275_v3  ;;  %4338 = vmatprep.mubr.bf16.mxu1 %v7938_v21  ;;  %v6295_v5 = vld [vmem:[%s8125_s5 + $0x1b8] sm:$0xff]   ;;  %v3692_v3 = vpack.c.bf16 %v3625_v13, %v7946_v15 }
 0x410   : > { %4396 = vmatmul.mubr.bf16.gmra.mrb[36].mxu0 %v7958_v32  ;;  %v6299_v15 = vld [vmem:[%s8125_s5 + $0x218] sm:$0xff]  }
 0x411   : > { %5106 = vmatpush3.bf16.msra.mxu0 %v6276_v11  ;;  %v3661_v11 = vld [vmem:[#allocation4 + $0x90] sm:$0xff] }
 0x412   : > { %5068 = vmatpush3.bf16.msra.mxu1 %v6277_v37  ;;  %5107 = vmatprep.subr.bf16.mxu0 %v6278_v38  ;;  %v3635_v27 = vld [vmem:[#allocation4 + $0x70] sm:$0xff]  ;;  %v6303_v37 = vld [vmem:[%s8125_s5 + $0x238] sm:$0xff]  }
 0x413   : > { %5069 = vmatprep.subr.bf16.mxu1 %v6279_v44  ;;  %v3610_v24 = vld [vmem:[#allocation4 + $0x50] sm:$0xff] }
 0x414   : > { %v7987_v33 = vpack.c.bf16 %v3610_v24, %v7891_v59  ;;  %v7989_v9 = vld [vmem:[#allocation4 + $0x52] sm:$0xff]  ;;  %v7994_v26 = vld [vmem:[#allocation4 + $0x80] sm:$0xff] }
 0x415   : > { %5108 = vmatpush3.bf16.msra.mxu0 %v6280_v39  ;;  %v3634_v49 = vld [vmem:[#allocation4 + $0x60] sm:$0xff]  ;;  %v8002_v50 = vpack.c.bf16 %v7989_v9, %v3625_v13  ;;  %v3708_v55 = vpack.c.bf16 %v7994_v26, %v3635_v27  ;;  %v6289_v59 = vld [vmem:[%s8125_s5 + $0x130] sm:$0xff]   ;;  %v3711_v6 = vpack.c.bf16 %v3661_v11, %v7994_v26 }
 0x416   : > { %4339 = vmatmul.mubr.bf16.gmra.mrb[24].mxu1 %v7987_v33  ;;  %v3699_v45 = vpack.c.bf16 %v3634_v49, %v3610_v24  ;;  %5109 = vmatprep.subr.bf16.mxu0 %v6282_v40  ;;  %v3705_v62 = vpack.c.bf16 %v3635_v27, %v3634_v49  ;;  %v3627_v35 = vld [vmem:[#allocation4 + $0x62] sm:$0xff]  ;;  %v3628_v63 = vld [vmem:[#allocation4 + $0x72] sm:$0xff] }
 0x417   : > { %5070 = vmatpush3.bf16.msra.mxu1 %v6281_v30  ;;  %4346 = vmatprep.mubr.bf16.mxu1 %v7968_v8  ;;  %v3707_v22 = vpack.c.bf16 %v3628_v63, %v3627_v35  ;;  %v3701_v18 = vpack.c.bf16 %v3627_v35, %v7989_v9  ;;  %v3677_v1 = vld [vmem:[#allocation4 + $0x92] sm:$0xff] }
 0x418   : > { %4403 = vmatprep.mubr.bf16.mxu0 %v3699_v45  ;;  %5071 = vmatprep.subr.bf16.mxu1 %v6283_v60 }
 0x419   : > { %4404 = vmatmul.mubr.bf16.gmra.mrb[40].mxu0 %v8002_v50 }
 0x41a   : > { %4411 = vmatprep.mubr.bf16.mxu0 %v3708_v55  ;;  %5110 = vmatpush3.bf16.msra.mxu0 %v6284_v31 }
 0x41b   : > { %5072 = vmatpush3.bf16.msra.mxu1 %v6285_v53  ;;  %5111 = vmatprep.subr.bf16.mxu0 %v6286_v54 }
 0x41c   : > { %5073 = vmatprep.subr.bf16.mxu1 %v6287_v58 }
 0x41e   : > { %5112 = vmatpush3.bf16.msra.mxu0 %v6288_v57  ;;  %4347 = vmatmul.mubr.bf16.gmra.mrb[28].mxu1 %v3705_v62 }
 0x41f   : > { %5074 = vmatpush3.bf16.msra.mxu1 %v6289_v59  ;;  %4452 = vmatprep.mubr.bf16.mxu1 %v3683_v61 }
 0x420   : > { %5113 = vmatprep.subr.bf16.mxu0 %v6290_v34  ;;  %5075 = vmatprep.subr.bf16.mxu1 %v6291_v36 }
 0x421   : > { %4412 = vmatmul.mubr.bf16.gmra.mrb[44].mxu0 %v3707_v22 }
 0x422   : > { %5114 = vmatpush3.bf16.msra.mxu0 %v6292_v41  ;;  %4517 = vmatprep.mubr.bf16.mxu0 %v7879_v52  ;;  %v6298_v52 = vld [vmem:[%s8125_s5 + $0x210] sm:$0xff]  }
 0x423   : > { %5076 = vmatpush3.bf16.msra.mxu1 %v6293_v12  ;;  %5115 = vmatprep.subr.bf16.mxu0 %v6294_v42 }
 0x424   : > { %5219 = vmatprep.subr.bf16.mxu1 %v6296_v56 }
 0x426   : > { %5116 = vmatpush3.bf16.msra.mxu0 %v6295_v5  ;;  %4453 = vmatmul.mubr.bf16.vlgmr.msra.gmra.mrb[32].mxu1 %v3682_v0  ;;  %v3652_v0 = vld [vmem:[#allocation4 + $0x82] sm:$0xff] }
 0x427   : > { %5220 = vmatpush3.bf16.msra.mxu1 %v6296_v56  ;;  %4460 = vmatprep.mubr.bf16.mxu1 %v3692_v3  ;;  %v3710_v14 = vpack.c.bf16 %v3652_v0, %v3628_v63  ;;  %v3713_v38 = vpack.c.bf16 %v3677_v1, %v3652_v0 }
 0x428   : > { %5221 = vmatprep.subr.bf16.mxu1 %v6297_v17 }
 0x429   : > { %4518 = vmatmul.mubr.bf16.vlgmr.msra.gmra.mrb[48].mxu0 %v7924_v48  ;;  %v6301_v48 = vld [vmem:[%s8125_s5 + $0x228] sm:$0xff]  }
 0x42a   : > { %4525 = vmatprep.mubr.bf16.mxu0 %v7938_v21  ;;  %v6302_v21 = vld [vmem:[%s8125_s5 + $0x230] sm:$0xff]  }
 0x42b   : > { %5222 = vmatpush3.bf16.msra.mxu1 %v6297_v17 }
 0x42c   : > { %5223 = vmatprep.subr.bf16.mxu1 %v6298_v52 }
 0x42e   : > { %4461 = vmatmul.mubr.bf16.gmra.mrb[36].mxu1 %v3691_v7  ;;  %v3712_v7 = vpack.c.bf16 %v3669_v19, %v7934_v10 }
 0x42f   : > { %5224 = vmatpush3.bf16.msra.mxu1 %v6298_v52  ;;  %4468 = vmatprep.mubr.bf16.mxu1 %v3701_v18 }
 0x430   : > { %5225 = vmatprep.subr.bf16.mxu1 %v6299_v15 }
 0x431   : > { %4526 = vmatmul.mubr.bf16.gmra.mrb[52].mxu0 %v7987_v33 }
 0x432   : > { %4533 = vmatprep.mubr.bf16.mxu0 %v7968_v8 }
 0x433   : > { %5226 = vmatpush3.bf16.msra.mxu1 %v6299_v15 }
 0x434   : > { %5227 = vmatprep.subr.bf16.mxu1 %v6300_v4 }
 0x436   : > { %4469 = vmatmul.mubr.bf16.gmra.mrb[40].mxu1 %v3700_v43 }
 0x437   : > { %5228 = vmatpush3.bf16.msra.mxu1 %v6300_v4  ;;  %4476 = vmatprep.mubr.bf16.mxu1 %v3710_v14 }
 0x438   : > { %5229 = vmatprep.subr.bf16.mxu1 %v6301_v48 }
 0x439   : > { %4534 = vmatmul.mubr.bf16.gmra.mrb[56].mxu0 %v3705_v62 }
 0x43a   : > { %4541 = vmatprep.mubr.bf16.mxu0 %v3712_v7 }
 0x43b   : > { %5230 = vmatpush3.bf16.msra.mxu1 %v6301_v48 }
 0x43c   : > { %5231 = vmatprep.subr.bf16.mxu1 %v6302_v21 }
 0x43e   : > { %4477 = vmatmul.mubr.bf16.gmra.mrb[44].mxu1 %v3709_v29 }
 0x43f   : > { %5232 = vmatpush3.bf16.msra.mxu1 %v6302_v21  ;;  %5235 = vmatprep.mubr.bf16.mxu1 %v7958_v32 }
 0x440   : > { %5233 = vmatprep.subr.bf16.mxu1 %v6303_v37 }
 0x441   : > { %4542 = vmatmul.mubr.bf16.gmra.mrb[60].mxu0 %v3711_v6 }
 0x443   : > { %5234 = vmatpush3.bf16.msra.mxu1 %v6303_v37 }
 0x446   : > { %5236 = vmatmul.mubr.bf16.vlgmr.msra.gmra.mrb[48].mxu1 %v8002_v50 }
 0x447   : > { %5239 = vmatprep.mubr.bf16.mxu1 %v3707_v22 }
 0x44e   : > { %5240 = vmatmul.mubr.bf16.gmra.mrb[52].mxu1 %v3713_v38 }
 0x4d8   : > { %v4997_v8 = vpop.f32.mrb[16].mxu1 }
 0x4d9   : > { %v4998_v43 = vpop.f32.mrb[17].mxu1 }
 0x4da   : > { %v4999_v44 = vadd.f32 %v4998_v43, %v4997_v8  ;;  %v5000_v39 = vpop.f32.mrb[18].mxu1 }
 0x4db   : > { %v5037_v16 = vpop.f32.mrb[32].mxu0  ;;  %v5001_v10 = vpop.f32.mrb[19].mxu1 }
 0x4dc   : > { %v5002_v29 = vadd.f32 %v5001_v10, %v5000_v39  ;;  %v5038_v40 = vpop.f32.mrb[33].mxu0 }
 0x4dd   : > { %v5039_v32 = vadd.f32 %v5038_v40, %v5037_v16  ;;  %v5040_v24 = vpop.f32.mrb[34].mxu0 }
 0x4de   : > { %v5041_v30 = vpop.f32.mrb[35].mxu0 }
 0x4df   : > { %v4390_v33 = vadd.f32 %v5039_v32, %v4999_v44  ;;  %v5042_v9 = vadd.f32 %v5041_v30, %v5040_v24 }
 0x4e0   : > { %v5003_v60 = vpop.f32.mrb[20].mxu1 }
 0x4e1   : > { %v4393_v49 = vadd.f32 %v5042_v9, %v5002_v29  ;;  %v5004_v26 = vpop.f32.mrb[21].mxu1 }
 0x4e2   : > { %v5005_v45 = vadd.f32 %v5004_v26, %v5003_v60  ;;  %v5006_v13 = vpop.f32.mrb[22].mxu1 }
 0x4e3   : > { %v5043_v31 = vpop.f32.mrb[36].mxu0  ;;  %v5007_v50 = vpop.f32.mrb[23].mxu1 }
 0x4e4   : > { %v5008_v27 = vadd.f32 %v5007_v50, %v5006_v13  ;;  %v5044_v53 = vpop.f32.mrb[37].mxu0 }
 0x4e5   : > { %v5045_v54 = vadd.f32 %v5044_v53, %v5043_v31  ;;  %v5046_v55 = vpop.f32.mrb[38].mxu0 }
 0x4e6   : > { %v5047_v58 = vpop.f32.mrb[39].mxu0 }
 0x4e7   : > { %v4398_v57 = vadd.f32 %v5045_v54, %v5005_v45  ;;  %v5048_v59 = vadd.f32 %v5047_v58, %v5046_v55 }
 0x4e9   : > { %v4401_v62 = vadd.f32 %v5048_v59, %v5008_v27  ;;  %v5009_v35 = vpop.f32.mrb[24].mxu1 }
 0x4ea   : > { %v5010_v34 = vpop.f32.mrb[25].mxu1 }
 0x4eb   : > { %v5011_v36 = vadd.f32 %v5010_v34, %v5009_v35  ;;  %v5012_v61 = vpop.f32.mrb[26].mxu1 }
 0x4ec   : > { %v5049_v63 = vpop.f32.mrb[40].mxu0  ;;  %v5013_v41 = vpop.f32.mrb[27].mxu1 }
 0x4ed   : > { %v5014_v22 = vadd.f32 %v5013_v41, %v5012_v61  ;;  %v5050_v12 = vpop.f32.mrb[41].mxu0 }
 0x4ee   : > { %v5051_v42 = vadd.f32 %v5050_v12, %v5049_v63  ;;  %v5052_v56 = vpop.f32.mrb[42].mxu0 }
 0x4ef   : > { %v5053_v5 = vpop.f32.mrb[43].mxu0 }
 0x4f0   : > { %v4406_v17 = vadd.f32 %v5051_v42, %v5011_v36  ;;  %v5054_v3 = vadd.f32 %v5053_v5, %v5052_v56 }
 0x4f1   : > { %v5015_v52 = vpop.f32.mrb[28].mxu1 }
 0x4f2   : > { %v4409_v15 = vadd.f32 %v5054_v3, %v5014_v22  ;;  %v5016_v18 = vpop.f32.mrb[29].mxu1 }
 0x4f3   : > { %v5017_v4 = vadd.f32 %v5016_v18, %v5015_v52  ;;  %v5018_v0 = vpop.f32.mrb[30].mxu1 }
 0x4f4   : > { %v5055_v48 = vpop.f32.mrb[44].mxu0  ;;  %v5019_v14 = vpop.f32.mrb[31].mxu1 }
 0x4f5   : > { %v5020_v19 = vadd.f32 %v5019_v14, %v5018_v0  ;;  %v5056_v7 = vpop.f32.mrb[45].mxu0 }
 0x4f6   : > { %v5057_v21 = vadd.f32 %v5056_v7, %v5055_v48  ;;  %v5058_v11 = vpop.f32.mrb[46].mxu0 }
 0x4f7   : > { %v5059_v37 = vpop.f32.mrb[47].mxu0 }
 0x4f8   : > { %v4414_v6 = vadd.f32 %v5057_v21, %v5017_v4  ;;  %v5060_v1 = vadd.f32 %v5059_v37, %v5058_v11  ;;  %v4855_v37 = vld [vmem:[%s8126_s6] ss:$0 sm:$0xff] }
 0x4f9   : > { %v5077_v38 = vpop.f32.mrb[32].mxu1 }
 0x4fa   : > { %v4417_v8 = vadd.f32 %v5060_v1, %v5020_v19  ;;  %v5078_v43 = vpop.f32.mrb[33].mxu1 }
 0x4fb   : > { %v5079_v44 = vadd.f32 %v5078_v43, %v5077_v38  ;;  %v5080_v39 = vpop.f32.mrb[34].mxu1 }
 0x4fc   : > { %v5117_v16 = vpop.f32.mrb[48].mxu0  ;;  %v5081_v10 = vpop.f32.mrb[35].mxu1 }
 0x4fd   : > { %v4455_v29 = vadd.f32 %v5079_v44, %v4390_v33  ;;  %v5082_v40 = vadd.f32 %v5081_v10, %v5080_v39  ;;  %v5118_v32 = vpop.f32.mrb[49].mxu0  ;;  %v2968_v10 = vadd.f32 %v7770_v2, %v4855_v37 }
 0x4fe   : > { %v5119_v24 = vadd.f32 %v5118_v32, %v5117_v16  ;;  %v5120_v30 = vpop.f32.mrb[50].mxu0 }
 0x4ff   : > { %v4458_v9 = vadd.f32 %v5082_v40, %v4393_v49  ;;  %v5121_v60 = vpop.f32.mrb[51].mxu0  ;;  %v2960_v40 = vadd.f32 %v4855_v37, %v7772_v23 }
 0x500   : > { %v5122_v26 = vadd.f32 %v5121_v60, %v5120_v30  ;;  %v4520_v45 = vadd.f32 %v5119_v24, %v4455_v29  ;;  %v2971_v30 = vadd.f32 %v7774_v20, %v4855_v37 }
 0x501   : > { %v5083_v13 = vpop.f32.mrb[36].mxu1 }
 0x502   : > { %v5084_v31 = vpop.f32.mrb[37].mxu1  ;;  %v8088_v50 = vadd.f32 %v5122_v26, %v4458_v9  ;;  %v2963_v26 = vadd.f32 %v4855_v37, %v7779_v28  ;;  %v2993_v20 = vmax.f32 %v2971_v30, 0.0 }
 0x503   : > { %v5085_v27 = vadd.f32 %v5084_v31, %v5083_v13  ;;  %v5086_v53 = vpop.f32.mrb[38].mxu1  ;;  %v2992_v31 = vmax.f32 %v2968_v10, 0.0 }
 0x504   : > { %v5123_v54 = vpop.f32.mrb[52].mxu0  ;;  %v5087_v55 = vpop.f32.mrb[39].mxu1 }
 0x505   : > { %v4463_v58 = vadd.f32 %v5085_v27, %v4398_v57  ;;  %v5088_v59 = vadd.f32 %v5087_v55, %v5086_v53  ;;  %v5124_v35 = vpop.f32.mrb[53].mxu0 }
 0x506   : > { %v5125_v33 = vadd.f32 %v5124_v35, %v5123_v54  ;;  %v5126_v34 = vpop.f32.mrb[54].mxu0  ;;  %v2990_v54 = vmax.f32 %v2960_v40, 0.0 }
 0x507   : > { %v4466_v36 = vadd.f32 %v5088_v59, %v4401_v62  ;;  %v5127_v61 = vpop.f32.mrb[55].mxu0 }
 0x508   : > { %v5128_v63 = vadd.f32 %v5127_v61, %v5126_v34  ;;  %v4528_v49 = vadd.f32 %v5125_v33, %v4463_v58  ;;  %v2991_v58 = vmax.f32 %v2963_v26, 0.0  ;;  %v2984_v33 = vadd.f32 %v7838_v25, %v4855_v37 }
 0x509   : > { %v5089_v41 = vpop.f32.mrb[40].mxu1 }
 0x50a   : > { %v5090_v22 = vpop.f32.mrb[41].mxu1  ;;  %v4531_v12 = vadd.f32 %v5128_v63, %v4466_v36  ;;  %v2976_v36 = vadd.f32 %v4855_v37, %v7840_v51  ;;  %v2979_v63 = vadd.f32 %v4855_v37, %v7844_v46 }
 0x50b   : > { %v5091_v42 = vadd.f32 %v5090_v22, %v5089_v41  ;;  %v5092_v56 = vpop.f32.mrb[42].mxu1  ;;  %v2996_v41 = vmax.f32 %v2984_v33, 0.0 }
 0x50c   : > { %v5129_v5 = vpop.f32.mrb[56].mxu0  ;;  %v5093_v3 = vpop.f32.mrb[43].mxu1  ;;  %v2994_v25 = vmax.f32 %v2976_v36, 0.0 }
 0x50d   : > { %v4471_v52 = vadd.f32 %v5091_v42, %v4406_v17  ;;  %v5094_v18 = vadd.f32 %v5093_v3, %v5092_v56  ;;  %v5130_v4 = vpop.f32.mrb[57].mxu0 }
 0x50e   : > { %v5131_v0 = vadd.f32 %v5130_v4, %v5129_v5  ;;  %v5132_v57 = vpop.f32.mrb[58].mxu0 }
 0x50f   : > { %v4474_v48 = vadd.f32 %v5094_v18, %v4409_v15  ;;  %v5133_v14 = vpop.f32.mrb[59].mxu0 }
 0x510   : > { %v5134_v19 = vadd.f32 %v5133_v14, %v5132_v57  ;;  %v4536_v7 = vadd.f32 %v5131_v0, %v4471_v52 }
 0x511   : > { %v5095_v62 = vpop.f32.mrb[44].mxu1 }
 0x512   : > { %v5096_v21 = vpop.f32.mrb[45].mxu1  ;;  %v4539_v11 = vadd.f32 %v5134_v19, %v4474_v48 }
 0x513   : > { %v5097_v1 = vadd.f32 %v5096_v21, %v5095_v62  ;;  %v5098_v38 = vpop.f32.mrb[46].mxu1 }
 0x514   : > { %v5135_v43 = vpop.f32.mrb[60].mxu0  ;;  %v5099_v44 = vpop.f32.mrb[47].mxu1 }
 0x515   : > { %v4479_v17 = vadd.f32 %v5097_v1, %v4414_v6  ;;  %v5100_v39 = vadd.f32 %v5099_v44, %v5098_v38  ;;  %v5136_v16 = vpop.f32.mrb[61].mxu0 }
 0x516   : > { %v5137_v15 = vadd.f32 %v5136_v16, %v5135_v43  ;;  %v5138_v29 = vpop.f32.mrb[62].mxu0 }
 0x517   : > { %v4482_v32 = vadd.f32 %v5100_v39, %v4417_v8  ;;  %v5139_v24 = vpop.f32.mrb[63].mxu0 }
 0x518   : > { %v5140_v9 = vadd.f32 %v5139_v24, %v5138_v29  ;;  %v4544_v60 = vadd.f32 %v5137_v15, %v4479_v17 }
 0x519   : > { %v5237_v13 = vpop.f32.mrb[48].mxu1 }
 0x51a   : > { %v4593_v6 = vadd.f32 %v5237_v13, %v4528_v49  ;;  %v4584_v27 = vpop.f32.mrb[49].mxu1  ;;  %v4547_v53 = vadd.f32 %v5140_v9, %v4482_v32 }
 0x51b   : > { %v4585_v2 = vadd.f32 %v4584_v27, %v4520_v45  ;;  %v5238_v23 = vpop.f32.mrb[50].mxu1  ;;  %v2987_v45 = vadd.f32 %v7842_v47, %v4855_v37  ;;  %v2995_v47 = vmax.f32 %v2979_v63, 0.0 }
 0x51c   : > { %v4617_v28 = vadd.f32 %v4593_v6, %v2992_v31  ;;  %v4596_v8 = vadd.f32 %v5238_v23, %v4531_v12  ;;  %v4587_v55 = vpop.f32.mrb[51].mxu1 }
 0x51d   : > { %v4615_v59 = vadd.f32 %v4585_v2, %v2990_v54  ;;  %v4588_v35 = vadd.f32 %v4587_v55, %v8088_v50  ;;  %v2997_v51 = vmax.f32 %v2987_v45, 0.0 }
 0x51e   : > { %4625 = vst [vmem:[%s8102_s22 + $0x10] sm:$0xff] %v4617_v28  ;;  %v4618_v34 = vadd.f32 %v4596_v8, %v2993_v20 }
 0x51f   : > { %4623 = vst [vmem:[%s8102_s22] sm:$0xff] %v4615_v59  ;;  %v4616_v61 = vadd.f32 %v4588_v35, %v2991_v58 }
 0x520   : > { %4626 = vst [vmem:[%s8102_s22 + $0x18] sm:$0xff] %v4618_v34 }
 0x521   : > { %4624 = vst [vmem:[%s8102_s22 + $0x8] sm:$0xff] %v4616_v61  ;;  %v5241_v49 = vpop.f32.mrb[52].mxu1 }
 0x522   : > { %v4609_v22 = vadd.f32 %v5241_v49, %v4544_v60  ;;  %v4600_v50 = vpop.f32.mrb[53].mxu1 }
 0x523   : > { %v4601_v12 = vadd.f32 %v4600_v50, %v4536_v7  ;;  %v5242_v42 = vpop.f32.mrb[54].mxu1 }
 0x524   : > { %v4621_v56 = vadd.f32 %v4609_v22, %v2996_v41  ;;  %v4612_v5 = vadd.f32 %v5242_v42, %v4547_v53  ;;  %v4603_v3 = vpop.f32.mrb[55].mxu1 }
 0x525   : > { %v4619_v52 = vadd.f32 %v4601_v12, %v2994_v25  ;;  %v4604_v18 = vadd.f32 %v4603_v3, %v4539_v11 }
 0x526   : > { %4629 = vst [vmem:[%s8102_s22 + $0x30] sm:$0xff] %v4621_v56  ;;  %v4622_v46 = vadd.f32 %v4612_v5, %v2997_v51 }
 0x527   : > { %4627 = vst [vmem:[%s8102_s22 + $0x20] sm:$0xff] %v4619_v52  ;;  %v4620_v4 = vadd.f32 %v4604_v18, %v2995_v47 }
 0x528   : > { %4630 = vst [vmem:[%s8102_s22 + $0x38] sm:$0xff] %v4622_v46 }
 0x529   : > { %4628 = vst [vmem:[%s8102_s22 + $0x28] sm:$0xff] %v4620_v4 }
 0x52a PF: > { %s19_s27 = sadd.s32 1, %s6318_s27  }
 0x52b   : > { %p16_p4 = scmp.ge.s32.totalorder %s19_s27, 4  }
 0x52d   :  { %18 = sbr.rel (!%p16_p4) target bundleno = 1 (0x1), region = 240 }

</bundles_post_ra>
